<compile_context>
chip_gen: v6e
topology: v6e:2x2x1
jax: 0.10.0
libtpu: 0.0.40
codegen_flags: <defaults>
</compile_context>

<pallas_src>
import functools

import jax
import jax.numpy as jnp
from jax.experimental import pallas as pl
from jax.experimental.pallas import tpu as pltpu

# ---------------------------------------------------------------- configuration
INPUT_DIM = 4          # base scalar features
COND = 1               # last_feature_conditioning=True
IN_FEATS = INPUT_DIM + COND
HIDDEN = 32            # hidden_dim
NUM_LAYERS = 2         # num_layers (single scale) -> num_total_layers = 2
OUTPUT_DIM = 6
WIDEN = 4              # widening_factor
BASIS_DIM = HIDDEN     # basis_dim defaults to hidden_dim
BASIS_HID = BASIS_DIM  # basis_hidden_dim defaults to basis_dim
LN_EPS = 1e-5
READ_PAD = 128         # readout stored lane-dense; columns >= OUTPUT_DIM are zero, sliced outside


# ---------------------------------------------------------------- in-kernel math helpers
_SQRT_2_OVER_PI = 0.7978845608028654


def _gelu(x):
    # tanh-approx GELU (single EUP tanh).  TODO(synk): exact erf GELU if bit-closeness to
    # torch.nn.GELU() (erf form) is required.
    return 0.5 * x * (1.0 + jnp.tanh(_SQRT_2_OVER_PI * (x + 0.044715 * x * x * x)))


def _convnext_block(pos_tile, pos_src_ref, h_src_ref, h_res,
                    wk_ref, bconv_ref, gamma_ref, beta_ref,
                    w1_ref, b1_ref, w2_ref, b2_ref,
                    wb1_ref, bb1_ref, wb2_ref, bb2_ref,
                    *, n_src, src_chunk, edge_dtype):
    """One ConvNext block (fc depthwise edge conv -> LayerNorm -> MLP -> residual) for one
    destination-node tile.  Distances + spatial basis MLP are recomputed per source chunk
    (no HBM-materialized [N, N, B] basis); the chunk loop is a fori_loop carrying the f32
    conv accumulator so only one chunk of edge intermediates is ever live."""
    tn = pos_tile.shape[0]
    c = h_src_ref.shape[1]
    n_chunks = n_src // src_chunk

    # Tiny weights: load + cast once per tile.
    wb1 = wb1_ref[...].astype(edge_dtype)     # [2, BH]
    bb1 = bb1_ref[...].astype(edge_dtype)     # [1, BH]
    bb2 = bb2_ref[...].astype(edge_dtype)     # [1, B]
    wb2 = wb2_ref[...].astype(jnp.bfloat16)   # MXU operand
    wk = wk_ref[...].astype(jnp.bfloat16)     # MXU operand

    def chunk_body(ci, conv):
        c0 = pl.multiple_of(ci * src_chunk, src_chunk)
        ps = pos_src_ref[pl.ds(c0, src_chunk), :]          # [sc, 3] f32
        hc = h_src_ref[pl.ds(c0, src_chunk), :]            # [sc, C] f32

        # Distance invariant via per-coordinate FMAs (no [tn,sc,3] temp, no last-axis reduce).
        dx = pos_tile[:, None, 0:1] - ps[None, :, 0:1]
        dy = pos_tile[:, None, 1:2] - ps[None, :, 1:2]
        dz = pos_tile[:, None, 2:3] - ps[None, :, 2:3]
        d2 = (dx * dx + dy * dy + dz * dz).reshape(tn * src_chunk, 1)   # [E, 1]
        d = jnp.sqrt(d2)

        # spatial_basis_fn: [d, d^2] -> Linear -> GELU -> Linear -> GELU
        d_e = d.astype(edge_dtype)
        d2_e = d2.astype(edge_dtype)
        hfe = _gelu(d_e * wb1[0:1, :] + d2_e * wb1[1:2, :] + bb1)       # [E, BH]
        basis = _gelu(jnp.dot(hfe.astype(jnp.bfloat16), wb2,
                              preferred_element_type=jnp.float32).astype(edge_dtype)
                      + bb2)                                            # [E, B]

        # Depthwise kernel generation on the MXU; per-source accumulation kept in f32.
        k = jnp.dot(basis.astype(jnp.bfloat16), wk,
                    preferred_element_type=jnp.float32)                 # [E, C] f32
        k = k.reshape(tn, src_chunk, c)
        return conv + jnp.sum(k * hc[None, :, :], axis=1)               # [tn, C] f32

    conv = jax.lax.fori_loop(0, n_chunks, chunk_body,
                             jnp.zeros((tn, c), jnp.float32),
                             unroll=(n_chunks <= 2))
    conv = conv + bconv_ref[...]

    # LayerNorm over channels (eps=1e-5, biased variance), affine.  Stays f32.
    mean = jnp.mean(conv, axis=-1, keepdims=True)
    var = jnp.mean(jnp.square(conv - mean), axis=-1, keepdims=True)
    y = (conv - mean) * jax.lax.rsqrt(var + LN_EPS) * gamma_ref[...] + beta_ref[...]

    # Pointwise MLP (C -> 4C -> C) + residual (in == out channels).
    y = _gelu(jnp.dot(y, w1_ref[...], preferred_element_type=jnp.float32) + b1_ref[...])
    y = jnp.dot(y, w2_ref[...], preferred_element_type=jnp.float32) + b2_ref[...]
    return y + h_res


# ---------------------------------------------------------------- Pallas kernels
def _stage1_kernel(h_all_ref, pos_ref,
                   wk_ref, bconv_ref, gamma_ref, beta_ref,
                   w1_ref, b1_ref, w2_ref, b2_ref,
                   wb1_ref, bb1_ref, wb2_ref, bb2_ref,
                   h_out_ref, *, n_real, n_src, src_chunk, edge_dtype, mask_output):
    """ConvNext layer 0 for one destination tile; padded destination rows zeroed so the
    stage-2 conv needs no per-step source masking."""
    tn = h_out_ref.shape[0]
    row0 = pl.multiple_of(pl.program_id(0) * tn, tn)
    pos_tile = pos_ref[pl.ds(row0, tn), :]
    h_res = h_all_ref[pl.ds(row0, tn), :]
    h = _convnext_block(pos_tile, pos_ref, h_all_ref, h_res,
                        wk_ref, bconv_ref, gamma_ref, beta_ref,
                        w1_ref, b1_ref, w2_ref, b2_ref,
                        wb1_ref, bb1_ref, wb2_ref, bb2_ref,
                        n_src=n_src, src_chunk=src_chunk, edge_dtype=edge_dtype)
    if mask_output:
        rows = row0 + jax.lax.broadcasted_iota(jnp.int32, (tn, 1), 0)
        h = jnp.where(rows < n_real, h, 0.0)
    h_out_ref[...] = h


def _stage2_kernel(h_all_ref, pos_ref,
                   wk_ref, bconv_ref, gamma_ref, beta_ref,
                   w1_ref, b1_ref, w2_ref, b2_ref,
                   wb1_ref, bb1_ref, wb2_ref, bb2_ref,
                   w_read_ref, b_read_ref,
                   out_ref, *, n_src, src_chunk, edge_dtype):
    """ConvNext layer 1 + readout (stored lane-dense; padded columns sliced off outside)."""
    tn = out_ref.shape[0]
    row0 = pl.multiple_of(pl.program_id(0) * tn, tn)
    pos_tile = pos_ref[pl.ds(row0, tn), :]
    h_res = h_all_ref[pl.ds(row0, tn), :]
    h = _convnext_block(pos_tile, pos_ref, h_all_ref, h_res,
                        wk_ref, bconv_ref, gamma_ref, beta_ref,
                        w1_ref, b1_ref, w2_ref, b2_ref,
                        wb1_ref, bb1_ref, wb2_ref, bb2_ref,
                        n_src=n_src, src_chunk=src_chunk, edge_dtype=edge_dtype)
    out_ref[...] = (jnp.dot(h, w_read_ref[...], preferred_element_type=jnp.float32)
                    + b_read_ref[...])


# ---------------------------------------------------------------- tiling / wrapper
def _round_up(v, m):
    return ((v + m - 1) // m) * m


def _largest_div8(n, cap):
    """Largest multiple of 8 that divides n and is <= cap (n is a multiple of 8)."""
    cap = max(8, (cap // 8) * 8)
    best, d = 8, 8
    while d <= min(n, cap):
        if n % d == 0:
            best = d
        d += 8
    return best


def _device_plan():
    """Per-generation tuning: VMEM budget, tile caps, and whether the VPU/EUP is bf16-capable."""
    try:
        kind = jax.devices()[0].device_kind.lower()
    except Exception:  # pragma: no cover - defensive
        kind = ""
    big_vmem = any(s in kind for s in ("v5 lite", "v5e", "v5lite", "v6"))   # 128 MiB physical
    bf16_elem = any(s in kind for s in ("v6", "v7", "tpu7"))                # bf16 VPU/EUP
    vmem_limit = (100 if big_vmem else 48) * 1024 * 1024                    # v7x/unknown: tight
    return big_vmem, bf16_elem, vmem_limit


def _plan_tiles(n, big_vmem):
    """Pick (dst tile, padded node count, source chunk): both multiples of 8 that divide the
    padded node count (-> uniform fori_loop chunks, no extra padding beyond round-to-8), with
    per-chunk edge intermediates bounded and >= 2 grid steps whenever possible (v7x megacore)."""
    n_pad = _round_up(n, 8)
    max_dst, max_src, max_edge = (512, 512, 32768) if big_vmem else (256, 256, 8192)
    src_chunk = _largest_div8(n_pad, min(max_src, n_pad))
    dst_cap = min(max_dst, n_pad, max(8, (max_edge // src_chunk) // 8 * 8))
    if n_pad >= 16:
        dst_cap = min(dst_cap, n_pad // 2)   # at least 2 grid steps -> both v7x TCs busy
    tn = _largest_div8(n_pad, dst_cap)
    return tn, n_pad, src_chunk


def _pad_rows(a, n_pad):
    n = a.shape[0]
    a = a.astype(jnp.float32)
    if n_pad == n:
        return a
    return jnp.pad(a, ((0, n_pad - n), (0, 0)))


def rapidash_forward(params, x, pos, edge_index=None, batch=None, vec=None):
    """Rapidash.forward for the config above.

    x: [N, INPUT_DIM + 1] (last feature = conditioning), pos: [N, 3].
    edge_index is accepted but ignored (the reference recomputes the fc edge index);
    batch=None (single graph), vec=None, num_ori=0 -> _process_inputs is identity.
    Returns (output [N, OUTPUT_DIM], None).
    """
    n = pos.shape[0]
    big_vmem, bf16_elem, vmem_limit = _device_plan()
    tn, n_pad, src_chunk = _plan_tiles(n, big_vmem)
    grid = (n_pad // tn,)
    edge_dtype = jnp.bfloat16 if bf16_elem else jnp.float32

    x_pad = _pad_rows(x, n_pad)        # [Np, 5] (padded rows zero)
    pos_pad = _pad_rows(pos, n_pad)    # [Np, 3]

    # x_embedder (Linear, bias=False) hoisted out of the conv kernels: one tiny matmul,
    # padded rows stay exactly zero so they contribute nothing as conv sources.
    h0 = jnp.dot(x_pad, params["w_embed"], preferred_element_type=jnp.float32)   # [Np, HIDDEN]

    cparams = pltpu.CompilerParams(dimension_semantics=("parallel",),
                                   vmem_limit_bytes=vmem_limit)

    def _const(a):
        # full-array block, fetched once (block index never changes across the grid)
        return pl.BlockSpec(a.shape, lambda i: (0, 0))

    l0, l1 = params["layers"]
    basis_args = (params["wb1"], params["bb1"], params["wb2"], params["bb2"])

    def layer_args(lp):
        return (lp["wk"], lp["b_conv"], lp["gamma"], lp["beta"],
                lp["w1"], lp["b1"], lp["w2"], lp["b2"])

    common = dict(n_src=n_pad, src_chunk=src_chunk, edge_dtype=edge_dtype)

    # ---- stage 1: ConvNext layer 0 (+ zero padded destination rows) ----------------------
    s1_inputs = (h0, pos_pad) + layer_args(l0) + basis_args
    s1_specs = ([_const(h0), _const(pos_pad)]
                + [_const(a) for a in layer_args(l0) + basis_args])
    h1 = pl.pallas_call(
        functools.partial(_stage1_kernel, n_real=n, mask_output=(n_pad != n), **common),
        out_shape=jax.ShapeDtypeStruct((n_pad, HIDDEN), jnp.float32),
        grid=grid,
        in_specs=s1_specs,
        out_specs=pl.BlockSpec((tn, HIDDEN), lambda i: (i, 0)),
        compiler_params=cparams,
    )(*s1_inputs)

    # ---- stage 2: ConvNext layer 1 + readout (lane-dense padded output) ------------------
    s2_inputs = (h1, pos_pad) + layer_args(l1) + basis_args + (
        params["w_read_pad"], params["b_read_pad"])
    s2_specs = ([_const(h1), _const(pos_pad)]
                + [_const(a) for a in layer_args(l1) + basis_args
                   + (params["w_read_pad"], params["b_read_pad"])])
    out_pad = pl.pallas_call(
        functools.partial(_stage2_kernel, **common),
        out_shape=jax.ShapeDtypeStruct((n_pad, READ_PAD), jnp.float32),
        grid=grid,
        in_specs=s2_specs,
        out_specs=pl.BlockSpec((tn, READ_PAD), lambda i: (i, 0)),
        compiler_params=cparams,
    )(*s2_inputs)

    # sphere_grid is None -> no orientation mean; task_level='node' -> no global pooling.
    return out_pad[:n, :OUTPUT_DIM], None


# ---------------------------------------------------------------- deterministic params
def init_params(key):
    def uni(k, shape, fan_in):
        bound = 1.0 / jnp.sqrt(jnp.float32(fan_in))
        return jax.random.uniform(k, shape, jnp.float32, -bound, bound)

    ks = iter(jax.random.split(key, 32))
    p = {
        # spatial basis MLP: PolynomialFeatures(2) = [d, d^2] -> BASIS_HID -> BASIS_DIM
        # TODO(synk): the undefined reference PolynomialFeatures may also emit constant/d^3
        # terms; widen wb1's first dim accordingly if so.
        "wb1": uni(next(ks), (2, BASIS_HID), 2),
        "bb1": uni(next(ks), (1, BASIS_HID), 2),
        "wb2": uni(next(ks), (BASIS_HID, BASIS_DIM), BASIS_HID),
        "bb2": uni(next(ks), (1, BASIS_DIM), BASIS_HID),
        # x_embedder: Linear(INPUT_DIM+1 -> HIDDEN, bias=False)
        "w_embed": uni(next(ks), (IN_FEATS, HIDDEN), IN_FEATS),
        # readout: Linear(HIDDEN -> OUTPUT_DIM)
        "w_read": uni(next(ks), (HIDDEN, OUTPUT_DIM), HIDDEN),
        "b_read": uni(next(ks), (1, OUTPUT_DIM), HIDDEN),
        "layers": [],
    }
    for _ in range(NUM_LAYERS):
        p["layers"].append({
            "wk": uni(next(ks), (BASIS_DIM, HIDDEN), BASIS_DIM),   # depthwise conv kernel gen
            "b_conv": uni(next(ks), (1, HIDDEN), BASIS_DIM),
            "gamma": jnp.ones((1, HIDDEN), jnp.float32),           # LayerNorm affine
            "beta": jnp.zeros((1, HIDDEN), jnp.float32),
            "w1": uni(next(ks), (HIDDEN, WIDEN * HIDDEN), HIDDEN),
            "b1": uni(next(ks), (1, WIDEN * HIDDEN), HIDDEN),
            "w2": uni(next(ks), (WIDEN * HIDDEN, HIDDEN), WIDEN * HIDDEN),
            "b2": uni(next(ks), (1, HIDDEN), WIDEN * HIDDEN),
        })
    # lane-dense padded readout weights (unmasked 128-lane stores); extra columns are zero
    # and the wrapper slices them off, so the math is identical to w_read / b_read.
    p["w_read_pad"] = jnp.zeros((HIDDEN, READ_PAD), jnp.float32).at[:, :OUTPUT_DIM].set(p["w_read"])
    p["b_read_pad"] = jnp.zeros((1, READ_PAD), jnp.float32).at[:, :OUTPUT_DIM].set(p["b_read"])
    return p


# ---------------------------------------------------------------- pure-JAX reference
def _reference_forward(params, x, pos):
    """Same math in plain jnp / f32 (used only as a sanity check at the small test size)."""
    d = jnp.sqrt(jnp.sum((pos[:, None, :] - pos[None, :, :]) ** 2, axis=-1))[..., None]  # [N,N,1]
    feats = jnp.concatenate([d, d * d], axis=-1)                                          # [N,N,2]
    hfe = _gelu(feats @ params["wb1"] + params["bb1"])
    basis = _gelu(hfe @ params["wb2"] + params["bb2"])                                    # [N,N,B]
    h = x @ params["w_embed"]
    for lp in params["layers"]:
        k = basis @ lp["wk"]                                                              # [N,N,C]
        conv = jnp.sum(k * h[None, :, :], axis=1) + lp["b_conv"]
        mean = jnp.mean(conv, axis=-1, keepdims=True)
        var = jnp.mean((conv - mean) ** 2, axis=-1, keepdims=True)
        y = (conv - mean) * jax.lax.rsqrt(var + LN_EPS) * lp["gamma"] + lp["beta"]
        y = _gelu(y @ lp["w1"] + lp["b1"]) @ lp["w2"] + lp["b2"]
        h = y + h
    return h @ params["w_read"] + params["b_read"]


# ---------------------------------------------------------------- main
if __name__ == "__main__":
    key = jax.random.PRNGKey(0)
    kx, kpos, kp = jax.random.split(key, 3)

    N = 16
    x = jax.random.normal(kx, (N, IN_FEATS), jnp.float32)   # last column = conditioning
    pos = jax.random.normal(kpos, (N, 3), jnp.float32)
    params = init_params(kp)

    fwd = jax.jit(functools.partial(rapidash_forward, params))
    out, aux = fwd(x, pos)
    out = jax.block_until_ready(out)

    assert aux is None
    assert out.shape == (N, OUTPUT_DIM) and out.dtype == jnp.float32
    assert bool(jnp.all(jnp.isfinite(out)))
    ref = _reference_forward(params, x, pos)
    assert jnp.allclose(out, ref, rtol=5e-2, atol=5e-2), float(jnp.max(jnp.abs(out - ref)))
    print("KERNEL_OK")
</pallas_src>

<mosaic_0001>
module attributes {stable_mosaic.version = 11 : i64} {
  func.func @_stage1_kernel(%arg0: i32, %arg1: memref<16x32xf32, #tpu.memory_space<vmem>>, %arg2: memref<16x3xf32, #tpu.memory_space<vmem>>, %arg3: memref<32x32xf32, #tpu.memory_space<vmem>>, %arg4: memref<1x32xf32, #tpu.memory_space<vmem>>, %arg5: memref<1x32xf32, #tpu.memory_space<vmem>>, %arg6: memref<1x32xf32, #tpu.memory_space<vmem>>, %arg7: memref<32x128xf32, #tpu.memory_space<vmem>>, %arg8: memref<1x128xf32, #tpu.memory_space<vmem>>, %arg9: memref<128x32xf32, #tpu.memory_space<vmem>>, %arg10: memref<1x32xf32, #tpu.memory_space<vmem>>, %arg11: memref<2x32xf32, #tpu.memory_space<vmem>>, %arg12: memref<1x32xf32, #tpu.memory_space<vmem>>, %arg13: memref<32x32xf32, #tpu.memory_space<vmem>>, %arg14: memref<1x32xf32, #tpu.memory_space<vmem>>, %arg15: memref<8x32xf32, #tpu.memory_space<vmem>>) attributes {dimension_semantics = [#tpu.dimension_semantics<parallel>], iteration_bounds = array<i64: 2>, scalar_prefetch = 0 : i64, scratch_operands = 0 : i64, tpu.core_type = #tpu.core_type<tc>, window_params = [{pipeline_mode = #tpu.pipeline_mode<synchronous>, transform_indices = @transform_0, window_bounds = array<i64: 16, 32>}, {pipeline_mode = #tpu.pipeline_mode<synchronous>, transform_indices = @transform_1, window_bounds = array<i64: 16, 3>}, {pipeline_mode = #tpu.pipeline_mode<synchronous>, transform_indices = @transform_2, window_bounds = array<i64: 32, 32>}, {pipeline_mode = #tpu.pipeline_mode<synchronous>, transform_indices = @transform_3, window_bounds = array<i64: 1, 32>}, {pipeline_mode = #tpu.pipeline_mode<synchronous>, transform_indices = @transform_4, window_bounds = array<i64: 1, 32>}, {pipeline_mode = #tpu.pipeline_mode<synchronous>, transform_indices = @transform_5, window_bounds = array<i64: 1, 32>}, {pipeline_mode = #tpu.pipeline_mode<synchronous>, transform_indices = @transform_6, window_bounds = array<i64: 32, 128>}, {pipeline_mode = #tpu.pipeline_mode<synchronous>, transform_indices = @transform_7, window_bounds = array<i64: 1, 128>}, {pipeline_mode = #tpu.pipeline_mode<synchronous>, transform_indices = @transform_8, window_bounds = array<i64: 128, 32>}, {pipeline_mode = #tpu.pipeline_mode<synchronous>, transform_indices = @transform_9, window_bounds = array<i64: 1, 32>}, {pipeline_mode = #tpu.pipeline_mode<synchronous>, transform_indices = @transform_10, window_bounds = array<i64: 2, 32>}, {pipeline_mode = #tpu.pipeline_mode<synchronous>, transform_indices = @transform_11, window_bounds = array<i64: 1, 32>}, {pipeline_mode = #tpu.pipeline_mode<synchronous>, transform_indices = @transform_12, window_bounds = array<i64: 32, 32>}, {pipeline_mode = #tpu.pipeline_mode<synchronous>, transform_indices = @transform_13, window_bounds = array<i64: 1, 32>}, {transform_indices = @transform_14, window_bounds = array<i64: 8, 32>}]} {
    %c8_i32 = arith.constant 8 : i32
    %0 = arith.muli %arg0, %c8_i32 : i32
    %1 = tpu.assume_multiple %0, 8 : i32
    %2 = arith.index_cast %1 : i32 to index
    %c0 = arith.constant 0 : index
    %3 = vector.load %arg2[%2, %c0] : memref<16x3xf32, #tpu.memory_space<vmem>>, vector<8x3xf32>
    %4 = arith.index_cast %1 : i32 to index
    %c0_0 = arith.constant 0 : index
    %5 = vector.load %arg1[%4, %c0_0] : memref<16x32xf32, #tpu.memory_space<vmem>>, vector<8x32xf32>
    %c0_1 = arith.constant 0 : index
    %c0_2 = arith.constant 0 : index
    %6 = vector.load %arg11[%c0_1, %c0_2] : memref<2x32xf32, #tpu.memory_space<vmem>>, vector<2x32xf32>
    %c0_3 = arith.constant 0 : index
    %c0_4 = arith.constant 0 : index
    %7 = vector.load %arg12[%c0_3, %c0_4] : memref<1x32xf32, #tpu.memory_space<vmem>>, vector<1x32xf32>
    %c0_5 = arith.constant 0 : index
    %c0_6 = arith.constant 0 : index
    %8 = vector.load %arg14[%c0_5, %c0_6] : memref<1x32xf32, #tpu.memory_space<vmem>>, vector<1x32xf32>
    %c0_7 = arith.constant 0 : index
    %c0_8 = arith.constant 0 : index
    %9 = vector.load %arg13[%c0_7, %c0_8] : memref<32x32xf32, #tpu.memory_space<vmem>>, vector<32x32xf32>
    %10 = arith.truncf %9 : vector<32x32xf32> to vector<32x32xbf16>
    %c0_9 = arith.constant 0 : index
    %c0_10 = arith.constant 0 : index
    %11 = vector.load %arg3[%c0_9, %c0_10] : memref<32x32xf32, #tpu.memory_space<vmem>>, vector<32x32xf32>
    %12 = arith.truncf %11 : vector<32x32xf32> to vector<32x32xbf16>
    %cst = arith.constant 0.000000e+00 : f32
    %13 = vector.broadcast %cst : f32 to vector<8x32xf32>
    %c0_i32 = arith.constant 0 : i32
    %c16_i32 = arith.constant 16 : i32
    %14 = arith.muli %c0_i32, %c16_i32 : i32
    %15 = tpu.assume_multiple %14, 16 : i32
    %16 = arith.index_cast %15 : i32 to index
    %c0_11 = arith.constant 0 : index
    %17 = vector.load %arg2[%16, %c0_11] : memref<16x3xf32, #tpu.memory_space<vmem>>, vector<16x3xf32>
    %18 = arith.index_cast %15 : i32 to index
    %c0_12 = arith.constant 0 : index
    %19 = vector.load %arg1[%18, %c0_12] : memref<16x32xf32, #tpu.memory_space<vmem>>, vector<16x32xf32>
    %20 = vector.extract_strided_slice %3 {offsets = [0, 0], sizes = [8, 1], strides = [1, 1]} : vector<8x3xf32> to vector<8x1xf32>
    %21 = vector.shape_cast %20 : vector<8x1xf32> to vector<8x1x1xf32>
    %22 = vector.extract_strided_slice %17 {offsets = [0, 0], sizes = [16, 1], strides = [1, 1]} : vector<16x3xf32> to vector<16x1xf32>
    %23 = vector.shape_cast %22 : vector<16x1xf32> to vector<1x16x1xf32>
    %24 = vector.broadcast %21 : vector<8x1x1xf32> to vector<8x16x1xf32>
    %25 = vector.broadcast %23 : vector<1x16x1xf32> to vector<8x16x1xf32>
    %26 = arith.subf %24, %25 : vector<8x16x1xf32>
    %27 = vector.extract_strided_slice %3 {offsets = [0, 1], sizes = [8, 1], strides = [1, 1]} : vector<8x3xf32> to vector<8x1xf32>
    %28 = vector.shape_cast %27 : vector<8x1xf32> to vector<8x1x1xf32>
    %29 = vector.extract_strided_slice %17 {offsets = [0, 1], sizes = [16, 1], strides = [1, 1]} : vector<16x3xf32> to vector<16x1xf32>
    %30 = vector.shape_cast %29 : vector<16x1xf32> to vector<1x16x1xf32>
    %31 = vector.broadcast %28 : vector<8x1x1xf32> to vector<8x16x1xf32>
    %32 = vector.broadcast %30 : vector<1x16x1xf32> to vector<8x16x1xf32>
    %33 = arith.subf %31, %32 : vector<8x16x1xf32>
    %34 = vector.extract_strided_slice %3 {offsets = [0, 2], sizes = [8, 1], strides = [1, 1]} : vector<8x3xf32> to vector<8x1xf32>
    %35 = vector.shape_cast %34 : vector<8x1xf32> to vector<8x1x1xf32>
    %36 = vector.extract_strided_slice %17 {offsets = [0, 2], sizes = [16, 1], strides = [1, 1]} : vector<16x3xf32> to vector<16x1xf32>
    %37 = vector.shape_cast %36 : vector<16x1xf32> to vector<1x16x1xf32>
    %38 = vector.broadcast %35 : vector<8x1x1xf32> to vector<8x16x1xf32>
    %39 = vector.broadcast %37 : vector<1x16x1xf32> to vector<8x16x1xf32>
    %40 = arith.subf %38, %39 : vector<8x16x1xf32>
    %41 = arith.mulf %26, %26 : vector<8x16x1xf32>
    %42 = arith.mulf %33, %33 : vector<8x16x1xf32>
    %43 = arith.addf %41, %42 : vector<8x16x1xf32>
    %44 = arith.mulf %40, %40 : vector<8x16x1xf32>
    %45 = arith.addf %43, %44 : vector<8x16x1xf32>
    %46 = vector.shape_cast %45 : vector<8x16x1xf32> to vector<128x1xf32>
    %47 = math.sqrt %46 : vector<128x1xf32>
    %48 = vector.extract_strided_slice %6 {offsets = [0, 0], sizes = [1, 32], strides = [1, 1]} : vector<2x32xf32> to vector<1x32xf32>
    %49 = vector.broadcast %47 : vector<128x1xf32> to vector<128x32xf32>
    %50 = vector.broadcast %48 : vector<1x32xf32> to vector<128x32xf32>
    %51 = arith.mulf %49, %50 : vector<128x32xf32>
    %52 = vector.extract_strided_slice %6 {offsets = [1, 0], sizes = [1, 32], strides = [1, 1]} : vector<2x32xf32> to vector<1x32xf32>
    %53 = vector.broadcast %46 : vector<128x1xf32> to vector<128x32xf32>
    %54 = vector.broadcast %52 : vector<1x32xf32> to vector<128x32xf32>
    %55 = arith.mulf %53, %54 : vector<128x32xf32>
    %56 = arith.addf %51, %55 : vector<128x32xf32>
    %57 = vector.broadcast %7 : vector<1x32xf32> to vector<128x32xf32>
    %58 = arith.addf %56, %57 : vector<128x32xf32>
    %cst_13 = arith.constant 5.000000e-01 : f32
    %59 = vector.broadcast %cst_13 : f32 to vector<128x32xf32>
    %60 = arith.mulf %59, %58 : vector<128x32xf32>
    %cst_14 = arith.constant 4.471500e-02 : f32
    %61 = vector.broadcast %cst_14 : f32 to vector<128x32xf32>
    %62 = arith.mulf %61, %58 : vector<128x32xf32>
    %63 = arith.mulf %62, %58 : vector<128x32xf32>
    %64 = arith.mulf %63, %58 : vector<128x32xf32>
    %65 = arith.addf %58, %64 : vector<128x32xf32>
    %cst_15 = arith.constant 0.797884583 : f32
    %66 = vector.broadcast %cst_15 : f32 to vector<128x32xf32>
    %67 = arith.mulf %66, %65 : vector<128x32xf32>
    %68 = math.tanh %67 : vector<128x32xf32>
    %cst_16 = arith.constant 1.000000e+00 : f32
    %69 = vector.broadcast %cst_16 : f32 to vector<128x32xf32>
    %70 = arith.addf %69, %68 : vector<128x32xf32>
    %71 = arith.mulf %60, %70 : vector<128x32xf32>
    %72 = arith.truncf %71 : vector<128x32xf32> to vector<128x32xbf16>
    %cst_17 = arith.constant dense<0.000000e+00> : vector<128x32xf32>
    %73 = tpu.matmul %72, %10, %cst_17 {dimension_numbers = #tpu.dot_dimension_numbers<[1], [0], [0], [1], [0, 0, 1, 1], [], []>} : vector<128x32xbf16>, vector<32x32xbf16>, vector<128x32xf32> -> vector<128x32xf32>
    %74 = vector.broadcast %8 : vector<1x32xf32> to vector<128x32xf32>
    %75 = arith.addf %73, %74 : vector<128x32xf32>
    %cst_18 = arith.constant 5.000000e-01 : f32
    %76 = vector.broadcast %cst_18 : f32 to vector<128x32xf32>
    %77 = arith.mulf %76, %75 : vector<128x32xf32>
    %cst_19 = arith.constant 4.471500e-02 : f32
    %78 = vector.broadcast %cst_19 : f32 to vector<128x32xf32>
    %79 = arith.mulf %78, %75 : vector<128x32xf32>
    %80 = arith.mulf %79, %75 : vector<128x32xf32>
    %81 = arith.mulf %80, %75 : vector<128x32xf32>
    %82 = arith.addf %75, %81 : vector<128x32xf32>
    %cst_20 = arith.constant 0.797884583 : f32
    %83 = vector.broadcast %cst_20 : f32 to vector<128x32xf32>
    %84 = arith.mulf %83, %82 : vector<128x32xf32>
    %85 = math.tanh %84 : vector<128x32xf32>
    %cst_21 = arith.constant 1.000000e+00 : f32
    %86 = vector.broadcast %cst_21 : f32 to vector<128x32xf32>
    %87 = arith.addf %86, %85 : vector<128x32xf32>
    %88 = arith.mulf %77, %87 : vector<128x32xf32>
    %89 = arith.truncf %88 : vector<128x32xf32> to vector<128x32xbf16>
    %cst_22 = arith.constant dense<0.000000e+00> : vector<128x32xf32>
    %90 = tpu.matmul %89, %12, %cst_22 {dimension_numbers = #tpu.dot_dimension_numbers<[1], [0], [0], [1], [0, 0, 1, 1], [], []>} : vector<128x32xbf16>, vector<32x32xbf16>, vector<128x32xf32> -> vector<128x32xf32>
    %91 = vector.shape_cast %90 : vector<128x32xf32> to vector<8x16x32xf32>
    %92 = vector.shape_cast %19 : vector<16x32xf32> to vector<1x16x32xf32>
    %93 = vector.broadcast %92 : vector<1x16x32xf32> to vector<8x16x32xf32>
    %94 = arith.mulf %91, %93 : vector<8x16x32xf32>
    %cst_23 = arith.constant dense<0.000000e+00> : vector<8x32xf32>
    %95 = vector.multi_reduction <add>, %94, %cst_23 [1] : vector<8x16x32xf32> to vector<8x32xf32>
    %96 = arith.addf %13, %95 : vector<8x32xf32>
    %c1_i32 = arith.constant 1 : i32
    %c0_24 = arith.constant 0 : index
    %c0_25 = arith.constant 0 : index
    %97 = vector.load %arg4[%c0_24, %c0_25] : memref<1x32xf32, #tpu.memory_space<vmem>>, vector<1x32xf32>
    %98 = vector.broadcast %97 : vector<1x32xf32> to vector<8x32xf32>
    %99 = arith.addf %96, %98 : vector<8x32xf32>
    %cst_26 = arith.constant dense<0.000000e+00> : vector<8xf32>
    %100 = vector.multi_reduction <add>, %99, %cst_26 [1] : vector<8x32xf32> to vector<8xf32>
    %101 = vector.shape_cast %100 : vector<8xf32> to vector<8x1xf32>
    %cst_27 = arith.constant 3.200000e+01 : f32
    %102 = vector.broadcast %cst_27 : f32 to vector<8x1xf32>
    %103 = arith.divf %101, %102 : vector<8x1xf32>
    %104 = vector.broadcast %103 : vector<8x1xf32> to vector<8x32xf32>
    %105 = arith.subf %99, %104 : vector<8x32xf32>
    %106 = arith.mulf %105, %105 : vector<8x32xf32>
    %cst_28 = arith.constant dense<0.000000e+00> : vector<8xf32>
    %107 = vector.multi_reduction <add>, %106, %cst_28 [1] : vector<8x32xf32> to vector<8xf32>
    %108 = vector.shape_cast %107 : vector<8xf32> to vector<8x1xf32>
    %cst_29 = arith.constant 3.200000e+01 : f32
    %109 = vector.broadcast %cst_29 : f32 to vector<8x1xf32>
    %110 = arith.divf %108, %109 : vector<8x1xf32>
    %111 = vector.broadcast %103 : vector<8x1xf32> to vector<8x32xf32>
    %112 = arith.subf %99, %111 : vector<8x32xf32>
    %cst_30 = arith.constant 9.99999974E-6 : f32
    %113 = vector.broadcast %cst_30 : f32 to vector<8x1xf32>
    %114 = arith.addf %110, %113 : vector<8x1xf32>
    %115 = math.rsqrt %114 : vector<8x1xf32>
    %116 = vector.broadcast %115 : vector<8x1xf32> to vector<8x32xf32>
    %117 = arith.mulf %112, %116 : vector<8x32xf32>
    %c0_31 = arith.constant 0 : index
    %c0_32 = arith.constant 0 : index
    %118 = vector.load %arg5[%c0_31, %c0_32] : memref<1x32xf32, #tpu.memory_space<vmem>>, vector<1x32xf32>
    %119 = vector.broadcast %118 : vector<1x32xf32> to vector<8x32xf32>
    %120 = arith.mulf %117, %119 : vector<8x32xf32>
    %c0_33 = arith.constant 0 : index
    %c0_34 = arith.constant 0 : index
    %121 = vector.load %arg6[%c0_33, %c0_34] : memref<1x32xf32, #tpu.memory_space<vmem>>, vector<1x32xf32>
    %122 = vector.broadcast %121 : vector<1x32xf32> to vector<8x32xf32>
    %123 = arith.addf %120, %122 : vector<8x32xf32>
    %c0_35 = arith.constant 0 : index
    %c0_36 = arith.constant 0 : index
    %124 = vector.load %arg7[%c0_35, %c0_36] : memref<32x128xf32, #tpu.memory_space<vmem>>, vector<32x128xf32>
    %cst_37 = arith.constant dense<0.000000e+00> : vector<8x128xf32>
    %125 = tpu.matmul %123, %124, %cst_37 {dimension_numbers = #tpu.dot_dimension_numbers<[1], [0], [0], [1], [0, 0, 1, 1], [], []>} : vector<8x32xf32>, vector<32x128xf32>, vector<8x128xf32> -> vector<8x128xf32>
    %c0_38 = arith.constant 0 : index
    %c0_39 = arith.constant 0 : index
    %126 = vector.load %arg8[%c0_38, %c0_39] : memref<1x128xf32, #tpu.memory_space<vmem>>, vector<1x128xf32>
    %127 = vector.broadcast %126 : vector<1x128xf32> to vector<8x128xf32>
    %128 = arith.addf %125, %127 : vector<8x128xf32>
    %cst_40 = arith.constant 5.000000e-01 : f32
    %129 = vector.broadcast %cst_40 : f32 to vector<8x128xf32>
    %130 = arith.mulf %129, %128 : vector<8x128xf32>
    %cst_41 = arith.constant 4.471500e-02 : f32
    %131 = vector.broadcast %cst_41 : f32 to vector<8x128xf32>
    %132 = arith.mulf %131, %128 : vector<8x128xf32>
    %133 = arith.mulf %132, %128 : vector<8x128xf32>
    %134 = arith.mulf %133, %128 : vector<8x128xf32>
    %135 = arith.addf %128, %134 : vector<8x128xf32>
    %cst_42 = arith.constant 0.797884583 : f32
    %136 = vector.broadcast %cst_42 : f32 to vector<8x128xf32>
    %137 = arith.mulf %136, %135 : vector<8x128xf32>
    %138 = math.tanh %137 : vector<8x128xf32>
    %cst_43 = arith.constant 1.000000e+00 : f32
    %139 = vector.broadcast %cst_43 : f32 to vector<8x128xf32>
    %140 = arith.addf %139, %138 : vector<8x128xf32>
    %141 = arith.mulf %130, %140 : vector<8x128xf32>
    %c0_44 = arith.constant 0 : index
    %c0_45 = arith.constant 0 : index
    %142 = vector.load %arg9[%c0_44, %c0_45] : memref<128x32xf32, #tpu.memory_space<vmem>>, vector<128x32xf32>
    %cst_46 = arith.constant dense<0.000000e+00> : vector<8x32xf32>
    %143 = tpu.matmul %141, %142, %cst_46 {dimension_numbers = #tpu.dot_dimension_numbers<[1], [0], [0], [1], [0, 0, 1, 1], [], []>} : vector<8x128xf32>, vector<128x32xf32>, vector<8x32xf32> -> vector<8x32xf32>
    %c0_47 = arith.constant 0 : index
    %c0_48 = arith.constant 0 : index
    %144 = vector.load %arg10[%c0_47, %c0_48] : memref<1x32xf32, #tpu.memory_space<vmem>>, vector<1x32xf32>
    %145 = vector.broadcast %144 : vector<1x32xf32> to vector<8x32xf32>
    %146 = arith.addf %143, %145 : vector<8x32xf32>
    %147 = arith.addf %146, %5 : vector<8x32xf32>
    %c0_49 = arith.constant 0 : index
    %c0_50 = arith.constant 0 : index
    %148 = vector.load %arg15[%c0_49, %c0_50] : memref<8x32xf32, #tpu.memory_space<vmem>>, vector<8x32xf32>
    tpu.vector_store %arg15[%c0_49, %c0_50], %147 {strides = array<i32>} : memref<8x32xf32, #tpu.memory_space<vmem>>, vector<8x32xf32>,
    return
  }
  func.func @transform_0(%arg0: i32) -> (i32, i32) {
    %c0_i32 = arith.constant 0 : i32
    %c0_i32_0 = arith.constant 0 : i32
    %c0_i32_1 = arith.constant 0 : i32
    return %c0_i32, %c0_i32_0 : i32, i32
  }
  func.func @transform_1(%arg0: i32) -> (i32, i32) {
    %c0_i32 = arith.constant 0 : i32
    %c0_i32_0 = arith.constant 0 : i32
    %c0_i32_1 = arith.constant 0 : i32
    return %c0_i32, %c0_i32_0 : i32, i32
  }
  func.func @transform_2(%arg0: i32) -> (i32, i32) {
    %c0_i32 = arith.constant 0 : i32
    %c0_i32_0 = arith.constant 0 : i32
    %c0_i32_1 = arith.constant 0 : i32
    return %c0_i32, %c0_i32_0 : i32, i32
  }
  func.func @transform_3(%arg0: i32) -> (i32, i32) {
    %c0_i32 = arith.constant 0 : i32
    %c0_i32_0 = arith.constant 0 : i32
    %c0_i32_1 = arith.constant 0 : i32
    return %c0_i32, %c0_i32_0 : i32, i32
  }
  func.func @transform_4(%arg0: i32) -> (i32, i32) {
    %c0_i32 = arith.constant 0 : i32
    %c0_i32_0 = arith.constant 0 : i32
    %c0_i32_1 = arith.constant 0 : i32
    return %c0_i32, %c0_i32_0 : i32, i32
  }
  func.func @transform_5(%arg0: i32) -> (i32, i32) {
    %c0_i32 = arith.constant 0 : i32
    %c0_i32_0 = arith.constant 0 : i32
    %c0_i32_1 = arith.constant 0 : i32
    return %c0_i32, %c0_i32_0 : i32, i32
  }
  func.func @transform_6(%arg0: i32) -> (i32, i32) {
    %c0_i32 = arith.constant 0 : i32
    %c0_i32_0 = arith.constant 0 : i32
    %c0_i32_1 = arith.constant 0 : i32
    return %c0_i32, %c0_i32_0 : i32, i32
  }
  func.func @transform_7(%arg0: i32) -> (i32, i32) {
    %c0_i32 = arith.constant 0 : i32
    %c0_i32_0 = arith.constant 0 : i32
    %c0_i32_1 = arith.constant 0 : i32
    return %c0_i32, %c0_i32_0 : i32, i32
  }
  func.func @transform_8(%arg0: i32) -> (i32, i32) {
    %c0_i32 = arith.constant 0 : i32
    %c0_i32_0 = arith.constant 0 : i32
    %c0_i32_1 = arith.constant 0 : i32
    return %c0_i32, %c0_i32_0 : i32, i32
  }
  func.func @transform_9(%arg0: i32) -> (i32, i32) {
    %c0_i32 = arith.constant 0 : i32
    %c0_i32_0 = arith.constant 0 : i32
    %c0_i32_1 = arith.constant 0 : i32
    return %c0_i32, %c0_i32_0 : i32, i32
  }
  func.func @transform_10(%arg0: i32) -> (i32, i32) {
    %c0_i32 = arith.constant 0 : i32
    %c0_i32_0 = arith.constant 0 : i32
    %c0_i32_1 = arith.constant 0 : i32
    return %c0_i32, %c0_i32_0 : i32, i32
  }
  func.func @transform_11(%arg0: i32) -> (i32, i32) {
    %c0_i32 = arith.constant 0 : i32
    %c0_i32_0 = arith.constant 0 : i32
    %c0_i32_1 = arith.constant 0 : i32
    return %c0_i32, %c0_i32_0 : i32, i32
  }
  func.func @transform_12(%arg0: i32) -> (i32, i32) {
    %c0_i32 = arith.constant 0 : i32
    %c0_i32_0 = arith.constant 0 : i32
    %c0_i32_1 = arith.constant 0 : i32
    return %c0_i32, %c0_i32_0 : i32, i32
  }
  func.func @transform_13(%arg0: i32) -> (i32, i32) {
    %c0_i32 = arith.constant 0 : i32
    %c0_i32_0 = arith.constant 0 : i32
    %c0_i32_1 = arith.constant 0 : i32
    return %c0_i32, %c0_i32_0 : i32, i32
  }
  func.func @transform_14(%arg0: i32) -> (i32, i32) {
    %c0_i32 = arith.constant 0 : i32
    %c0_i32_0 = arith.constant 0 : i32
    return %arg0, %c0_i32 : i32, i32
  }
}

module attributes {stable_mosaic.version = 11 : i64} {
  func.func @_stage2_kernel(%arg0: i32, %arg1: memref<16x32xf32, #tpu.memory_space<vmem>>, %arg2: memref<16x3xf32, #tpu.memory_space<vmem>>, %arg3: memref<32x32xf32, #tpu.memory_space<vmem>>, %arg4: memref<1x32xf32, #tpu.memory_space<vmem>>, %arg5: memref<1x32xf32, #tpu.memory_space<vmem>>, %arg6: memref<1x32xf32, #tpu.memory_space<vmem>>, %arg7: memref<32x128xf32, #tpu.memory_space<vmem>>, %arg8: memref<1x128xf32, #tpu.memory_space<vmem>>, %arg9: memref<128x32xf32, #tpu.memory_space<vmem>>, %arg10: memref<1x32xf32, #tpu.memory_space<vmem>>, %arg11: memref<2x32xf32, #tpu.memory_space<vmem>>, %arg12: memref<1x32xf32, #tpu.memory_space<vmem>>, %arg13: memref<32x32xf32, #tpu.memory_space<vmem>>, %arg14: memref<1x32xf32, #tpu.memory_space<vmem>>, %arg15: memref<32x128xf32, #tpu.memory_space<vmem>>, %arg16: memref<1x128xf32, #tpu.memory_space<vmem>>, %arg17: memref<8x128xf32, #tpu.memory_space<vmem>>) attributes {dimension_semantics = [#tpu.dimension_semantics<parallel>], iteration_bounds = array<i64: 2>, scalar_prefetch = 0 : i64, scratch_operands = 0 : i64, tpu.core_type = #tpu.core_type<tc>, window_params = [{pipeline_mode = #tpu.pipeline_mode<synchronous>, transform_indices = @transform_0, window_bounds = array<i64: 16, 32>}, {pipeline_mode = #tpu.pipeline_mode<synchronous>, transform_indices = @transform_1, window_bounds = array<i64: 16, 3>}, {pipeline_mode = #tpu.pipeline_mode<synchronous>, transform_indices = @transform_2, window_bounds = array<i64: 32, 32>}, {pipeline_mode = #tpu.pipeline_mode<synchronous>, transform_indices = @transform_3, window_bounds = array<i64: 1, 32>}, {pipeline_mode = #tpu.pipeline_mode<synchronous>, transform_indices = @transform_4, window_bounds = array<i64: 1, 32>}, {pipeline_mode = #tpu.pipeline_mode<synchronous>, transform_indices = @transform_5, window_bounds = array<i64: 1, 32>}, {pipeline_mode = #tpu.pipeline_mode<synchronous>, transform_indices = @transform_6, window_bounds = array<i64: 32, 128>}, {pipeline_mode = #tpu.pipeline_mode<synchronous>, transform_indices = @transform_7, window_bounds = array<i64: 1, 128>}, {pipeline_mode = #tpu.pipeline_mode<synchronous>, transform_indices = @transform_8, window_bounds = array<i64: 128, 32>}, {pipeline_mode = #tpu.pipeline_mode<synchronous>, transform_indices = @transform_9, window_bounds = array<i64: 1, 32>}, {pipeline_mode = #tpu.pipeline_mode<synchronous>, transform_indices = @transform_10, window_bounds = array<i64: 2, 32>}, {pipeline_mode = #tpu.pipeline_mode<synchronous>, transform_indices = @transform_11, window_bounds = array<i64: 1, 32>}, {pipeline_mode = #tpu.pipeline_mode<synchronous>, transform_indices = @transform_12, window_bounds = array<i64: 32, 32>}, {pipeline_mode = #tpu.pipeline_mode<synchronous>, transform_indices = @transform_13, window_bounds = array<i64: 1, 32>}, {pipeline_mode = #tpu.pipeline_mode<synchronous>, transform_indices = @transform_14, window_bounds = array<i64: 32, 128>}, {pipeline_mode = #tpu.pipeline_mode<synchronous>, transform_indices = @transform_15, window_bounds = array<i64: 1, 128>}, {transform_indices = @transform_16, window_bounds = array<i64: 8, 128>}]} {
    %c8_i32 = arith.constant 8 : i32
    %0 = arith.muli %arg0, %c8_i32 : i32
    %1 = tpu.assume_multiple %0, 8 : i32
    %2 = arith.index_cast %1 : i32 to index
    %c0 = arith.constant 0 : index
    %3 = vector.load %arg2[%2, %c0] : memref<16x3xf32, #tpu.memory_space<vmem>>, vector<8x3xf32>
    %4 = arith.index_cast %1 : i32 to index
    %c0_0 = arith.constant 0 : index
    %5 = vector.load %arg1[%4, %c0_0] : memref<16x32xf32, #tpu.memory_space<vmem>>, vector<8x32xf32>
    %c0_1 = arith.constant 0 : index
    %c0_2 = arith.constant 0 : index
    %6 = vector.load %arg11[%c0_1, %c0_2] : memref<2x32xf32, #tpu.memory_space<vmem>>, vector<2x32xf32>
    %c0_3 = arith.constant 0 : index
    %c0_4 = arith.constant 0 : index
    %7 = vector.load %arg12[%c0_3, %c0_4] : memref<1x32xf32, #tpu.memory_space<vmem>>, vector<1x32xf32>
    %c0_5 = arith.constant 0 : index
    %c0_6 = arith.constant 0 : index
    %8 = vector.load %arg14[%c0_5, %c0_6] : memref<1x32xf32, #tpu.memory_space<vmem>>, vector<1x32xf32>
    %c0_7 = arith.constant 0 : index
    %c0_8 = arith.constant 0 : index
    %9 = vector.load %arg13[%c0_7, %c0_8] : memref<32x32xf32, #tpu.memory_space<vmem>>, vector<32x32xf32>
    %10 = arith.truncf %9 : vector<32x32xf32> to vector<32x32xbf16>
    %c0_9 = arith.constant 0 : index
    %c0_10 = arith.constant 0 : index
    %11 = vector.load %arg3[%c0_9, %c0_10] : memref<32x32xf32, #tpu.memory_space<vmem>>, vector<32x32xf32>
    %12 = arith.truncf %11 : vector<32x32xf32> to vector<32x32xbf16>
    %cst = arith.constant 0.000000e+00 : f32
    %13 = vector.broadcast %cst : f32 to vector<8x32xf32>
    %c0_i32 = arith.constant 0 : i32
    %c16_i32 = arith.constant 16 : i32
    %14 = arith.muli %c0_i32, %c16_i32 : i32
    %15 = tpu.assume_multiple %14, 16 : i32
    %16 = arith.index_cast %15 : i32 to index
    %c0_11 = arith.constant 0 : index
    %17 = vector.load %arg2[%16, %c0_11] : memref<16x3xf32, #tpu.memory_space<vmem>>, vector<16x3xf32>
    %18 = arith.index_cast %15 : i32 to index
    %c0_12 = arith.constant 0 : index
    %19 = vector.load %arg1[%18, %c0_12] : memref<16x32xf32, #tpu.memory_space<vmem>>, vector<16x32xf32>
    %20 = vector.extract_strided_slice %3 {offsets = [0, 0], sizes = [8, 1], strides = [1, 1]} : vector<8x3xf32> to vector<8x1xf32>
    %21 = vector.shape_cast %20 : vector<8x1xf32> to vector<8x1x1xf32>
    %22 = vector.extract_strided_slice %17 {offsets = [0, 0], sizes = [16, 1], strides = [1, 1]} : vector<16x3xf32> to vector<16x1xf32>
    %23 = vector.shape_cast %22 : vector<16x1xf32> to vector<1x16x1xf32>
    %24 = vector.broadcast %21 : vector<8x1x1xf32> to vector<8x16x1xf32>
    %25 = vector.broadcast %23 : vector<1x16x1xf32> to vector<8x16x1xf32>
    %26 = arith.subf %24, %25 : vector<8x16x1xf32>
    %27 = vector.extract_strided_slice %3 {offsets = [0, 1], sizes = [8, 1], strides = [1, 1]} : vector<8x3xf32> to vector<8x1xf32>
    %28 = vector.shape_cast %27 : vector<8x1xf32> to vector<8x1x1xf32>
    %29 = vector.extract_strided_slice %17 {offsets = [0, 1], sizes = [16, 1], strides = [1, 1]} : vector<16x3xf32> to vector<16x1xf32>
    %30 = vector.shape_cast %29 : vector<16x1xf32> to vector<1x16x1xf32>
    %31 = vector.broadcast %28 : vector<8x1x1xf32> to vector<8x16x1xf32>
    %32 = vector.broadcast %30 : vector<1x16x1xf32> to vector<8x16x1xf32>
    %33 = arith.subf %31, %32 : vector<8x16x1xf32>
    %34 = vector.extract_strided_slice %3 {offsets = [0, 2], sizes = [8, 1], strides = [1, 1]} : vector<8x3xf32> to vector<8x1xf32>
    %35 = vector.shape_cast %34 : vector<8x1xf32> to vector<8x1x1xf32>
    %36 = vector.extract_strided_slice %17 {offsets = [0, 2], sizes = [16, 1], strides = [1, 1]} : vector<16x3xf32> to vector<16x1xf32>
    %37 = vector.shape_cast %36 : vector<16x1xf32> to vector<1x16x1xf32>
    %38 = vector.broadcast %35 : vector<8x1x1xf32> to vector<8x16x1xf32>
    %39 = vector.broadcast %37 : vector<1x16x1xf32> to vector<8x16x1xf32>
    %40 = arith.subf %38, %39 : vector<8x16x1xf32>
    %41 = arith.mulf %26, %26 : vector<8x16x1xf32>
    %42 = arith.mulf %33, %33 : vector<8x16x1xf32>
    %43 = arith.addf %41, %42 : vector<8x16x1xf32>
    %44 = arith.mulf %40, %40 : vector<8x16x1xf32>
    %45 = arith.addf %43, %44 : vector<8x16x1xf32>
    %46 = vector.shape_cast %45 : vector<8x16x1xf32> to vector<128x1xf32>
    %47 = math.sqrt %46 : vector<128x1xf32>
    %48 = vector.extract_strided_slice %6 {offsets = [0, 0], sizes = [1, 32], strides = [1, 1]} : vector<2x32xf32> to vector<1x32xf32>
    %49 = vector.broadcast %47 : vector<128x1xf32> to vector<128x32xf32>
    %50 = vector.broadcast %48 : vector<1x32xf32> to vector<128x32xf32>
    %51 = arith.mulf %49, %50 : vector<128x32xf32>
    %52 = vector.extract_strided_slice %6 {offsets = [1, 0], sizes = [1, 32], strides = [1, 1]} : vector<2x32xf32> to vector<1x32xf32>
    %53 = vector.broadcast %46 : vector<128x1xf32> to vector<128x32xf32>
    %54 = vector.broadcast %52 : vector<1x32xf32> to vector<128x32xf32>
    %55 = arith.mulf %53, %54 : vector<128x32xf32>
    %56 = arith.addf %51, %55 : vector<128x32xf32>
    %57 = vector.broadcast %7 : vector<1x32xf32> to vector<128x32xf32>
    %58 = arith.addf %56, %57 : vector<128x32xf32>
    %cst_13 = arith.constant 5.000000e-01 : f32
    %59 = vector.broadcast %cst_13 : f32 to vector<128x32xf32>
    %60 = arith.mulf %59, %58 : vector<128x32xf32>
    %cst_14 = arith.constant 4.471500e-02 : f32
    %61 = vector.broadcast %cst_14 : f32 to vector<128x32xf32>
    %62 = arith.mulf %61, %58 : vector<128x32xf32>
    %63 = arith.mulf %62, %58 : vector<128x32xf32>
    %64 = arith.mulf %63, %58 : vector<128x32xf32>
    %65 = arith.addf %58, %64 : vector<128x32xf32>
    %cst_15 = arith.constant 0.797884583 : f32
    %66 = vector.broadcast %cst_15 : f32 to vector<128x32xf32>
    %67 = arith.mulf %66, %65 : vector<128x32xf32>
    %68 = math.tanh %67 : vector<128x32xf32>
    %cst_16 = arith.constant 1.000000e+00 : f32
    %69 = vector.broadcast %cst_16 : f32 to vector<128x32xf32>
    %70 = arith.addf %69, %68 : vector<128x32xf32>
    %71 = arith.mulf %60, %70 : vector<128x32xf32>
    %72 = arith.truncf %71 : vector<128x32xf32> to vector<128x32xbf16>
    %cst_17 = arith.constant dense<0.000000e+00> : vector<128x32xf32>
    %73 = tpu.matmul %72, %10, %cst_17 {dimension_numbers = #tpu.dot_dimension_numbers<[1], [0], [0], [1], [0, 0, 1, 1], [], []>} : vector<128x32xbf16>, vector<32x32xbf16>, vector<128x32xf32> -> vector<128x32xf32>
    %74 = vector.broadcast %8 : vector<1x32xf32> to vector<128x32xf32>
    %75 = arith.addf %73, %74 : vector<128x32xf32>
    %cst_18 = arith.constant 5.000000e-01 : f32
    %76 = vector.broadcast %cst_18 : f32 to vector<128x32xf32>
    %77 = arith.mulf %76, %75 : vector<128x32xf32>
    %cst_19 = arith.constant 4.471500e-02 : f32
    %78 = vector.broadcast %cst_19 : f32 to vector<128x32xf32>
    %79 = arith.mulf %78, %75 : vector<128x32xf32>
    %80 = arith.mulf %79, %75 : vector<128x32xf32>
    %81 = arith.mulf %80, %75 : vector<128x32xf32>
    %82 = arith.addf %75, %81 : vector<128x32xf32>
    %cst_20 = arith.constant 0.797884583 : f32
    %83 = vector.broadcast %cst_20 : f32 to vector<128x32xf32>
    %84 = arith.mulf %83, %82 : vector<128x32xf32>
    %85 = math.tanh %84 : vector<128x32xf32>
    %cst_21 = arith.constant 1.000000e+00 : f32
    %86 = vector.broadcast %cst_21 : f32 to vector<128x32xf32>
    %87 = arith.addf %86, %85 : vector<128x32xf32>
    %88 = arith.mulf %77, %87 : vector<128x32xf32>
    %89 = arith.truncf %88 : vector<128x32xf32> to vector<128x32xbf16>
    %cst_22 = arith.constant dense<0.000000e+00> : vector<128x32xf32>
    %90 = tpu.matmul %89, %12, %cst_22 {dimension_numbers = #tpu.dot_dimension_numbers<[1], [0], [0], [1], [0, 0, 1, 1], [], []>} : vector<128x32xbf16>, vector<32x32xbf16>, vector<128x32xf32> -> vector<128x32xf32>
    %91 = vector.shape_cast %90 : vector<128x32xf32> to vector<8x16x32xf32>
    %92 = vector.shape_cast %19 : vector<16x32xf32> to vector<1x16x32xf32>
    %93 = vector.broadcast %92 : vector<1x16x32xf32> to vector<8x16x32xf32>
    %94 = arith.mulf %91, %93 : vector<8x16x32xf32>
    %cst_23 = arith.constant dense<0.000000e+00> : vector<8x32xf32>
    %95 = vector.multi_reduction <add>, %94, %cst_23 [1] : vector<8x16x32xf32> to vector<8x32xf32>
    %96 = arith.addf %13, %95 : vector<8x32xf32>
    %c1_i32 = arith.constant 1 : i32
    %c0_24 = arith.constant 0 : index
    %c0_25 = arith.constant 0 : index
    %97 = vector.load %arg4[%c0_24, %c0_25] : memref<1x32xf32, #tpu.memory_space<vmem>>, vector<1x32xf32>
    %98 = vector.broadcast %97 : vector<1x32xf32> to vector<8x32xf32>
    %99 = arith.addf %96, %98 : vector<8x32xf32>
    %cst_26 = arith.constant dense<0.000000e+00> : vector<8xf32>
    %100 = vector.multi_reduction <add>, %99, %cst_26 [1] : vector<8x32xf32> to vector<8xf32>
    %101 = vector.shape_cast %100 : vector<8xf32> to vector<8x1xf32>
    %cst_27 = arith.constant 3.200000e+01 : f32
    %102 = vector.broadcast %cst_27 : f32 to vector<8x1xf32>
    %103 = arith.divf %101, %102 : vector<8x1xf32>
    %104 = vector.broadcast %103 : vector<8x1xf32> to vector<8x32xf32>
    %105 = arith.subf %99, %104 : vector<8x32xf32>
    %106 = arith.mulf %105, %105 : vector<8x32xf32>
    %cst_28 = arith.constant dense<0.000000e+00> : vector<8xf32>
    %107 = vector.multi_reduction <add>, %106, %cst_28 [1] : vector<8x32xf32> to vector<8xf32>
    %108 = vector.shape_cast %107 : vector<8xf32> to vector<8x1xf32>
    %cst_29 = arith.constant 3.200000e+01 : f32
    %109 = vector.broadcast %cst_29 : f32 to vector<8x1xf32>
    %110 = arith.divf %108, %109 : vector<8x1xf32>
    %111 = vector.broadcast %103 : vector<8x1xf32> to vector<8x32xf32>
    %112 = arith.subf %99, %111 : vector<8x32xf32>
    %cst_30 = arith.constant 9.99999974E-6 : f32
    %113 = vector.broadcast %cst_30 : f32 to vector<8x1xf32>
    %114 = arith.addf %110, %113 : vector<8x1xf32>
    %115 = math.rsqrt %114 : vector<8x1xf32>
    %116 = vector.broadcast %115 : vector<8x1xf32> to vector<8x32xf32>
    %117 = arith.mulf %112, %116 : vector<8x32xf32>
    %c0_31 = arith.constant 0 : index
    %c0_32 = arith.constant 0 : index
    %118 = vector.load %arg5[%c0_31, %c0_32] : memref<1x32xf32, #tpu.memory_space<vmem>>, vector<1x32xf32>
    %119 = vector.broadcast %118 : vector<1x32xf32> to vector<8x32xf32>
    %120 = arith.mulf %117, %119 : vector<8x32xf32>
    %c0_33 = arith.constant 0 : index
    %c0_34 = arith.constant 0 : index
    %121 = vector.load %arg6[%c0_33, %c0_34] : memref<1x32xf32, #tpu.memory_space<vmem>>, vector<1x32xf32>
    %122 = vector.broadcast %121 : vector<1x32xf32> to vector<8x32xf32>
    %123 = arith.addf %120, %122 : vector<8x32xf32>
    %c0_35 = arith.constant 0 : index
    %c0_36 = arith.constant 0 : index
    %124 = vector.load %arg7[%c0_35, %c0_36] : memref<32x128xf32, #tpu.memory_space<vmem>>, vector<32x128xf32>
    %cst_37 = arith.constant dense<0.000000e+00> : vector<8x128xf32>
    %125 = tpu.matmul %123, %124, %cst_37 {dimension_numbers = #tpu.dot_dimension_numbers<[1], [0], [0], [1], [0, 0, 1, 1], [], []>} : vector<8x32xf32>, vector<32x128xf32>, vector<8x128xf32> -> vector<8x128xf32>
    %c0_38 = arith.constant 0 : index
    %c0_39 = arith.constant 0 : index
    %126 = vector.load %arg8[%c0_38, %c0_39] : memref<1x128xf32, #tpu.memory_space<vmem>>, vector<1x128xf32>
    %127 = vector.broadcast %126 : vector<1x128xf32> to vector<8x128xf32>
    %128 = arith.addf %125, %127 : vector<8x128xf32>
    %cst_40 = arith.constant 5.000000e-01 : f32
    %129 = vector.broadcast %cst_40 : f32 to vector<8x128xf32>
    %130 = arith.mulf %129, %128 : vector<8x128xf32>
    %cst_41 = arith.constant 4.471500e-02 : f32
    %131 = vector.broadcast %cst_41 : f32 to vector<8x128xf32>
    %132 = arith.mulf %131, %128 : vector<8x128xf32>
    %133 = arith.mulf %132, %128 : vector<8x128xf32>
    %134 = arith.mulf %133, %128 : vector<8x128xf32>
    %135 = arith.addf %128, %134 : vector<8x128xf32>
    %cst_42 = arith.constant 0.797884583 : f32
    %136 = vector.broadcast %cst_42 : f32 to vector<8x128xf32>
    %137 = arith.mulf %136, %135 : vector<8x128xf32>
    %138 = math.tanh %137 : vector<8x128xf32>
    %cst_43 = arith.constant 1.000000e+00 : f32
    %139 = vector.broadcast %cst_43 : f32 to vector<8x128xf32>
    %140 = arith.addf %139, %138 : vector<8x128xf32>
    %141 = arith.mulf %130, %140 : vector<8x128xf32>
    %c0_44 = arith.constant 0 : index
    %c0_45 = arith.constant 0 : index
    %142 = vector.load %arg9[%c0_44, %c0_45] : memref<128x32xf32, #tpu.memory_space<vmem>>, vector<128x32xf32>
    %cst_46 = arith.constant dense<0.000000e+00> : vector<8x32xf32>
    %143 = tpu.matmul %141, %142, %cst_46 {dimension_numbers = #tpu.dot_dimension_numbers<[1], [0], [0], [1], [0, 0, 1, 1], [], []>} : vector<8x128xf32>, vector<128x32xf32>, vector<8x32xf32> -> vector<8x32xf32>
    %c0_47 = arith.constant 0 : index
    %c0_48 = arith.constant 0 : index
    %144 = vector.load %arg10[%c0_47, %c0_48] : memref<1x32xf32, #tpu.memory_space<vmem>>, vector<1x32xf32>
    %145 = vector.broadcast %144 : vector<1x32xf32> to vector<8x32xf32>
    %146 = arith.addf %143, %145 : vector<8x32xf32>
    %147 = arith.addf %146, %5 : vector<8x32xf32>
    %c0_49 = arith.constant 0 : index
    %c0_50 = arith.constant 0 : index
    %148 = vector.load %arg15[%c0_49, %c0_50] : memref<32x128xf32, #tpu.memory_space<vmem>>, vector<32x128xf32>
    %cst_51 = arith.constant dense<0.000000e+00> : vector<8x128xf32>
    %149 = tpu.matmul %147, %148, %cst_51 {dimension_numbers = #tpu.dot_dimension_numbers<[1], [0], [0], [1], [0, 0, 1, 1], [], []>} : vector<8x32xf32>, vector<32x128xf32>, vector<8x128xf32> -> vector<8x128xf32>
    %c0_52 = arith.constant 0 : index
    %c0_53 = arith.constant 0 : index
    %150 = vector.load %arg16[%c0_52, %c0_53] : memref<1x128xf32, #tpu.memory_space<vmem>>, vector<1x128xf32>
    %151 = vector.broadcast %150 : vector<1x128xf32> to vector<8x128xf32>
    %152 = arith.addf %149, %151 : vector<8x128xf32>
    %c0_54 = arith.constant 0 : index
    %c0_55 = arith.constant 0 : index
    %153 = vector.load %arg17[%c0_54, %c0_55] : memref<8x128xf32, #tpu.memory_space<vmem>>, vector<8x128xf32>
    tpu.vector_store %arg17[%c0_54, %c0_55], %152 {strides = array<i32>} : memref<8x128xf32, #tpu.memory_space<vmem>>, vector<8x128xf32>,
    return
  }
  func.func @transform_0(%arg0: i32) -> (i32, i32) {
    %c0_i32 = arith.constant 0 : i32
    %c0_i32_0 = arith.constant 0 : i32
    %c0_i32_1 = arith.constant 0 : i32
    return %c0_i32, %c0_i32_0 : i32, i32
  }
  func.func @transform_1(%arg0: i32) -> (i32, i32) {
    %c0_i32 = arith.constant 0 : i32
    %c0_i32_0 = arith.constant 0 : i32
    %c0_i32_1 = arith.constant 0 : i32
    return %c0_i32, %c0_i32_0 : i32, i32
  }
  func.func @transform_2(%arg0: i32) -> (i32, i32) {
    %c0_i32 = arith.constant 0 : i32
    %c0_i32_0 = arith.constant 0 : i32
    %c0_i32_1 = arith.constant 0 : i32
    return %c0_i32, %c0_i32_0 : i32, i32
  }
  func.func @transform_3(%arg0: i32) -> (i32, i32) {
    %c0_i32 = arith.constant 0 : i32
    %c0_i32_0 = arith.constant 0 : i32
    %c0_i32_1 = arith.constant 0 : i32
    return %c0_i32, %c0_i32_0 : i32, i32
  }
  func.func @transform_4(%arg0: i32) -> (i32, i32) {
    %c0_i32 = arith.constant 0 : i32
    %c0_i32_0 = arith.constant 0 : i32
    %c0_i32_1 = arith.constant 0 : i32
    return %c0_i32, %c0_i32_0 : i32, i32
  }
  func.func @transform_5(%arg0: i32) -> (i32, i32) {
    %c0_i32 = arith.constant 0 : i32
    %c0_i32_0 = arith.constant 0 : i32
    %c0_i32_1 = arith.constant 0 : i32
    return %c0_i32, %c0_i32_0 : i32, i32
  }
  func.func @transform_6(%arg0: i32) -> (i32, i32) {
    %c0_i32 = arith.constant 0 : i32
    %c0_i32_0 = arith.constant 0 : i32
    %c0_i32_1 = arith.constant 0 : i32
    return %c0_i32, %c0_i32_0 : i32, i32
  }
  func.func @transform_7(%arg0: i32) -> (i32, i32) {
    %c0_i32 = arith.constant 0 : i32
    %c0_i32_0 = arith.constant 0 : i32
    %c0_i32_1 = arith.constant 0 : i32
    return %c0_i32, %c0_i32_0 : i32, i32
  }
  func.func @transform_8(%arg0: i32) -> (i32, i32) {
    %c0_i32 = arith.constant 0 : i32
    %c0_i32_0 = arith.constant 0 : i32
    %c0_i32_1 = arith.constant 0 : i32
    return %c0_i32, %c0_i32_0 : i32, i32
  }
  func.func @transform_9(%arg0: i32) -> (i32, i32) {
    %c0_i32 = arith.constant 0 : i32
    %c0_i32_0 = arith.constant 0 : i32
    %c0_i32_1 = arith.constant 0 : i32
    return %c0_i32, %c0_i32_0 : i32, i32
  }
  func.func @transform_10(%arg0: i32) -> (i32, i32) {
    %c0_i32 = arith.constant 0 : i32
    %c0_i32_0 = arith.constant 0 : i32
    %c0_i32_1 = arith.constant 0 : i32
    return %c0_i32, %c0_i32_0 : i32, i32
  }
  func.func @transform_11(%arg0: i32) -> (i32, i32) {
    %c0_i32 = arith.constant 0 : i32
    %c0_i32_0 = arith.constant 0 : i32
    %c0_i32_1 = arith.constant 0 : i32
    return %c0_i32, %c0_i32_0 : i32, i32
  }
  func.func @transform_12(%arg0: i32) -> (i32, i32) {
    %c0_i32 = arith.constant 0 : i32
    %c0_i32_0 = arith.constant 0 : i32
    %c0_i32_1 = arith.constant 0 : i32
    return %c0_i32, %c0_i32_0 : i32, i32
  }
  func.func @transform_13(%arg0: i32) -> (i32, i32) {
    %c0_i32 = arith.constant 0 : i32
    %c0_i32_0 = arith.constant 0 : i32
    %c0_i32_1 = arith.constant 0 : i32
    return %c0_i32, %c0_i32_0 : i32, i32
  }
  func.func @transform_14(%arg0: i32) -> (i32, i32) {
    %c0_i32 = arith.constant 0 : i32
    %c0_i32_0 = arith.constant 0 : i32
    %c0_i32_1 = arith.constant 0 : i32
    return %c0_i32, %c0_i32_0 : i32, i32
  }
  func.func @transform_15(%arg0: i32) -> (i32, i32) {
    %c0_i32 = arith.constant 0 : i32
    %c0_i32_0 = arith.constant 0 : i32
    %c0_i32_1 = arith.constant 0 : i32
    return %c0_i32, %c0_i32_0 : i32, i32
  }
  func.func @transform_16(%arg0: i32) -> (i32, i32) {
    %c0_i32 = arith.constant 0 : i32
    %c0_i32_0 = arith.constant 0 : i32
    return %arg0, %c0_i32 : i32, i32
  }
}

</mosaic_0001>

<bundles_post_ra>
// kernel: rapidash_forward.3
= control target key start
LH: loop header
LB: loop body
LE: loop exit
PB: predicated region body
PF: predicated region fallthrough
CT: control target
= control target key end

     0   :  { %s2687_s21 = smov 0   ;;  %s3564_s0 = inlined_call_operand.vmem [shape: f32[16,32], index: 0, kind: input, shape index: {}]   ;;  %s3565_s1 = inlined_call_operand.vmem [shape: f32[16,3], index: 1, kind: input, shape index: {}]   ;;  %s3566_s2 = inlined_call_operand.vmem [shape: f32[32,32], index: 2, kind: input, shape index: {}]   ;;  %s3567_s3 = inlined_call_operand.vmem [shape: f32[1,32], index: 3, kind: input, shape index: {}]   ;;  %s3568_s4 = inlined_call_operand.vmem [shape: f32[1,32], index: 4, kind: input, shape index: {}]   ;;  %s3569_s5 = inlined_call_operand.vmem [shape: f32[1,32], index: 5, kind: input, shape index: {}]   ;;  %s3570_s6 = inlined_call_operand.vmem [shape: f32[32,128], index: 6, kind: input, shape index: {}]   ;;  %s3571_s7 = inlined_call_operand.vmem [shape: f32[1,128], index: 7, kind: input, shape index: {}]   ;;  %s3572_s8 = inlined_call_operand.vmem [shape: f32[128,32], index: 8, kind: input, shape index: {}]   ;;  %s3573_s9 = inlined_call_operand.vmem [shape: f32[1,32], index: 9, kind: input, shape index: {}]   ;;  %s3574_s10 = inlined_call_operand.vmem [shape: f32[2,32], index: 10, kind: input, shape index: {}]   ;;  %s3575_s11 = inlined_call_operand.vmem [shape: f32[1,32], index: 11, kind: input, shape index: {}]   ;;  %s3576_s12 = inlined_call_operand.vmem [shape: f32[32,32], index: 12, kind: input, shape index: {}]   ;;  %s3577_s13 = inlined_call_operand.vmem [shape: f32[1,32], index: 13, kind: input, shape index: {}]   ;;  %s3578_s14 = inlined_call_operand.vmem [shape: f32[32,128], index: 14, kind: input, shape index: {}]   ;;  %s3579_s15 = inlined_call_operand.vmem [shape: f32[1,128], index: 15, kind: input, shape index: {}]   ;;  %s3580_s16 = inlined_call_operand.vmem [shape: f32[16,128], index: 16, kind: output, shape index: {}]  }
   0x1   :  { %3582 = sst [smem:[#allocation2_spill]] %s3564_s0 }
   0x2 LB: > { %s2693_s22 = sadd.s32 4294967295, %s2594_s21   ;;  %p2296_p0 = scmp.ge.s32.totalorder %s2594_s21, 1  ;;  %s2594_s21 = sphi %s2687_s21, %s26_s21  }
   0x3   : > { %p452_p1 = scmp.lt.s32.totalorder %s2594_s21, 3 }
   0x5   : > { %p453_p2 = pnand %p2296_p0, %p452_p1 }
   0x6   : > { %s2298_s23 = sshll.u32 (!%p453_p2), %s2693_s22, 3  ;;  %s2598_s0 = smov (!%p453_p2), 126  }
   0x7   : > { %456 = sbr.rel (%p453_p2) target bundleno = 1806 (0x70e), region = 84  ;;  %s502_s26 = scalar_lea.vmem (!%p453_p2), %s3565_s1, %s2298_s23 }
   0x8   : > { %s2599_s17 = smov (!%p453_p2), 127   ;;  %s3583_s18 = sld [smem:[#allocation2_spill]] (!%p453_p2) }
   0x9   : > { %p496_p3 = scmp.lt.s32.totalorder (!%p453_p2), %s2693_s22, 1 }
   0xc   : > { %v530_v0 = vlaneseq  ;;  %v2596_v1 = vmov 1966171168   ;;  %v503_v5 = vld [vmem:[%s502_s26] sm:$0xff]  ;;  %v2712_v11 = vld [vmem:[%s3565_s1 + $0x8] sm:$0xff]  ;;  %v2597_v15 = vmov 0   ;;  %s3585_s22 = smov (!%p496_p3, %s2693_s22), 1 }
   0xd   : > { %v528_v2 = vunpack.c.l.s4 %v2596_v1  ;;  %v2717_v12 = vld [vmem:[%s3565_s1] sm:$0xff]  ;;  %2486 = vset.pattern.permute.xlu0 %v2597_v15  ;;  %2485 = vset.pattern.permute.xlu1 %v2597_v15  ;;  %v526_v29 = vcombine.high %v503_v5, %v503_v5  ;;  %s2297_s30 = sshll.u32 %s3585_s22, 3 }
   0xe   : > { %v2703_v3 = vshrl.u32 %v530_v0, 7  ;;  %s504_s27 = scalar_lea.vmem %s3583_s18, %s2298_s23  ;;  %s499_s20 = scalar_lea.vmem %s3580_s16, %s2297_s30 }
   0xf   : > { %v529_v4 = vunpack.c.0.s8 %v528_v2 }
  0x10   : > { %v2707_v8 = vsub.s32 0, %v2703_v3 }
  0x11   : > { %v532_v6 = vsub.s32 %v529_v4, %v2703_v3 }
  0x13   : > { %v533_v7 = vrot.slane %v503_v5, %v532_v6  ;;  %v540_v33 = vrot.slane %v526_v29, %v532_v6 }
  0x15   : > { %v549_v9 = vrot.slane %v533_v7, %v532_v6  ;;  %v541_v10 = vcombine.high %v533_v7, %v533_v7  ;;  %v556_v37 = vrot.slane %v540_v33, %v532_v6  ;;  %v542_v40 = vcombine.high %v540_v33, %v540_v33 }
  0x17   : > { %v578_v13 = vrot.slane %v549_v9, %v2707_v8  ;;  %v563_v14 = vrot.slane %v541_v10, %v532_v6  ;;  %v571_v22 = vcombine.high %v549_v9, %v549_v9  ;;  %v594_v41 = vrot.slane %v556_v37, %v2707_v8 }
  0x18   : > { %v570_v42 = vrot.slane %v542_v40, %v532_v6  ;;  %v572_v50 = vcombine.high %v556_v37, %v556_v37 }
  0x19   : > { %v616_v16 = vsub.f32 %v578_v13, %v2712_v11  ;;  %v615_v17 = vsub.f32 %v578_v13, %v2717_v12  ;;  %v582_v18 = vrot.slane %v563_v14, %v2707_v8  ;;  %v586_v25 = vrot.slane %v571_v22, %v2707_v8 }
  0x1a   : > { %v573_v27 = vcombine.high %v563_v14, %v563_v14  ;;  %v624_v43 = vsub.f32 %v594_v41, %v2712_v11  ;;  %v623_v44 = vsub.f32 %v594_v41, %v2717_v12  ;;  %v598_v45 = vrot.slane %v570_v42, %v2707_v8 }
  0x1b   : > { %v2723_v19 = vmul.f32 %v616_v16, %v616_v16  ;;  %v2725_v20 = vmul.f32 %v615_v17, %v615_v17  ;;  %v617_v21 = vsub.f32 %v582_v18, %v2717_v12  ;;  %v618_v24 = vsub.f32 %v582_v18, %v2712_v11 }
  0x1c   : > { %v619_v28 = vsub.f32 %v586_v25, %v2717_v12  ;;  %v620_v30 = vsub.f32 %v586_v25, %v2712_v11  ;;  %v590_v31 = vrot.slane %v573_v27, %v2707_v8  ;;  %v2779_v46 = vmul.f32 %v624_v43, %v624_v43 }
  0x1d   : > { %729 = vrot.lane.b32.xlu1 %v2723_v19, %s2598_s0  ;;  %663 = vrot.lane.b32.xlu0 %v2725_v20, %s2599_s17  ;;  %v2732_v23 = vmul.f32 %v617_v21, %v617_v21  ;;  %v2740_v26 = vmul.f32 %v618_v24, %v618_v24  ;;  %v2785_v47 = vmul.f32 %v623_v44, %v623_v44 }
  0x1e   : > { %v2749_v32 = vmul.f32 %v619_v28, %v619_v28  ;;  %v2755_v34 = vmul.f32 %v620_v30, %v620_v30  ;;  %v622_v35 = vsub.f32 %v590_v31, %v2712_v11  ;;  %v621_v36 = vsub.f32 %v590_v31, %v2717_v12 }
  0x1f   : > { %v626_v48 = vsub.f32 %v598_v45, %v2712_v11  ;;  %v625_v49 = vsub.f32 %v598_v45, %v2717_v12  ;;  %v602_v53 = vrot.slane %v572_v50, %v2707_v8  ;;  %v574_v54 = vcombine.high %v570_v42, %v570_v42 }
  0x20   : > { %v2763_v38 = vmul.f32 %v622_v35, %v622_v35  ;;  %v2765_v39 = vmul.f32 %v621_v36, %v621_v36 }
  0x21   : > { %665 = vrot.lane.b32.xlu0 %v2723_v19, %s2599_s17  ;;  %667 = vrot.lane.b32.xlu1 %v2732_v23, %s2599_s17  ;;  %v2793_v51 = vmul.f32 %v626_v48, %v626_v48  ;;  %v2795_v52 = vmul.f32 %v625_v49, %v625_v49  ;;  %v628_v55 = vsub.f32 %v602_v53, %v2712_v11 }
  0x22   : > { %v627_v56 = vsub.f32 %v602_v53, %v2717_v12  ;;  %v606_v57 = vrot.slane %v574_v54, %v2707_v8 }
  0x23   : > { %v2809_v58 = vmul.f32 %v628_v55, %v628_v55 }
  0x24   : > { %v2815_v59 = vmul.f32 %v627_v56, %v627_v56  ;;  %v630_v60 = vsub.f32 %v606_v57, %v2712_v11  ;;  %v629_v61 = vsub.f32 %v606_v57, %v2717_v12 }
  0x25   : > { %727 = vrot.lane.b32.xlu0 %v2725_v20, %s2598_s0  ;;  %669 = vrot.lane.b32.xlu1 %v2740_v26, %s2599_s17 }
  0x26   : > { %v2823_v62 = vmul.f32 %v630_v60, %v630_v60  ;;  %v2825_v63 = vmul.f32 %v629_v61, %v629_v61 }
  0x29   : > { %731 = vrot.lane.b32.xlu0 %v2732_v23, %s2598_s0  ;;  %733 = vrot.lane.b32.xlu1 %v2740_v26, %s2598_s0 }
  0x2d   : > { %671 = vrot.lane.b32.xlu0 %v2749_v32, %s2599_s17  ;;  %673 = vrot.lane.b32.xlu1 %v2755_v34, %s2599_s17 }
  0x31   : > { %677 = vrot.lane.b32.xlu1 %v2763_v38, %s2599_s17  ;;  %675 = vrot.lane.b32.xlu0 %v2765_v39, %s2599_s17 }
  0x35   : > { %737 = vrot.lane.b32.xlu1 %v2755_v34, %s2598_s0  ;;  %735 = vrot.lane.b32.xlu0 %v2749_v32, %s2598_s0 }
  0x39   : > { %741 = vrot.lane.b32.xlu1 %v2763_v38, %s2598_s0  ;;  %739 = vrot.lane.b32.xlu0 %v2765_v39, %s2598_s0 }
  0x3d   : > { %681 = vrot.lane.b32.xlu1 %v2779_v46, %s2599_s17  ;;  %679 = vrot.lane.b32.xlu0 %v2785_v47, %s2599_s17 }
  0x41   : > { %685 = vrot.lane.b32.xlu1 %v2793_v51, %s2599_s17  ;;  %683 = vrot.lane.b32.xlu0 %v2795_v52, %s2599_s17 }
  0x45   : > { %745 = vrot.lane.b32.xlu1 %v2779_v46, %s2598_s0  ;;  %743 = vrot.lane.b32.xlu0 %v2785_v47, %s2598_s0 }
  0x49   : > { %749 = vrot.lane.b32.xlu1 %v2793_v51, %s2598_s0  ;;  %747 = vrot.lane.b32.xlu0 %v2795_v52, %s2598_s0 }
  0x4d   : > { %689 = vrot.lane.b32.xlu1 %v2809_v58, %s2599_s17  ;;  %687 = vrot.lane.b32.xlu0 %v2815_v59, %s2599_s17 }
  0x51   : > { %693 = vrot.lane.b32.xlu1 %v2823_v62, %s2599_s17  ;;  %691 = vrot.lane.b32.xlu0 %v2825_v63, %s2599_s17 }
  0x55   : > { %753 = vrot.lane.b32.xlu1 %v2809_v58, %s2598_s0  ;;  %751 = vrot.lane.b32.xlu0 %v2815_v59, %s2598_s0 }
  0x59   : > { %757 = vrot.lane.b32.xlu1 %v2823_v62, %s2598_s0  ;;  %755 = vrot.lane.b32.xlu0 %v2825_v63, %s2598_s0 }
  0x8f   : > { %v730_v0 = vpop.permute.xlu1 %729  ;;  %v664_v1 = vpop.permute.xlu0 %663 }
  0x90   : > { %v711_v6 = vadd.f32 %v664_v1, %v2725_v20 }
  0x93   : > { %v666_v2 = vpop.permute.xlu0 %665  ;;  %v668_v4 = vpop.permute.xlu1 %667 }
  0x94   : > { %v712_v5 = vadd.f32 %v666_v2, %v2723_v19  ;;  %v713_v25 = vadd.f32 %v668_v4, %v2732_v23 }
  0x96   : > { %v2841_v7 = vadd.f32 %v730_v0, %v712_v5 }
  0x97   : > { %v728_v9 = vpop.permute.xlu0 %727  ;;  %v670_v10 = vpop.permute.xlu1 %669 }
  0x98   : > { %v2843_v11 = vadd.f32 %v728_v9, %v711_v6  ;;  %1010 = vperm.xlu0 %2486, %v2841_v7   ;;  %2488 = vrsqrt.f32 %v2841_v7  ;;  %v714_v30 = vadd.f32 %v670_v10, %v2740_v26  ;;  %vm800_vm0 = vcmp.eq.f32.partialorder %v2841_v7, inf }
  0x99   : > { %vm802_vm2 = vcmp.eq.f32.partialorder %v2841_v7, 0.0 }
  0x9a   : > { %1005 = vperm.xlu1 %2485, %v2843_v11   ;;  %2490 = vrsqrt.f32 %v2843_v11  ;;  %vm793_vm1 = vcmp.eq.f32.partialorder %v2843_v11, inf  ;;  %v796_v6 = vand.u32 2147483648, %v2843_v11  ;;  %vm795_vm3 = vcmp.eq.f32.partialorder %v2843_v11, 0.0 }
  0x9b   : > { %v732_v12 = vpop.permute.xlu0 %731  ;;  %v734_v13 = vpop.permute.xlu1 %733 }
  0x9c   : > { %v2849_v29 = vadd.f32 %v732_v12, %v713_v25  ;;  %v2855_v37 = vadd.f32 %v734_v13, %v714_v30 }
  0x9e   : > { %2492 = vrsqrt.f32 %v2849_v29  ;;  %vm807_vm6 = vcmp.eq.f32.partialorder %v2849_v29, inf  ;;  %vm814_vm9 = vcmp.eq.f32.partialorder %v2855_v37, inf  ;;  %vm809_vm10 = vcmp.eq.f32.partialorder %v2849_v29, 0.0 }
  0x9f   : > { %v672_v14 = vpop.permute.xlu0 %671  ;;  %v674_v15 = vpop.permute.xlu1 %673  ;;  %vm816_vm11 = vcmp.eq.f32.partialorder %v2855_v37, 0.0 }
  0xa0   : > { %v715_v26 = vadd.f32 %v672_v14, %v2749_v32  ;;  %v716_v43 = vadd.f32 %v674_v15, %v2755_v34 }
  0xa3   : > { %v678_v16 = vpop.permute.xlu1 %677  ;;  %v676_v17 = vpop.permute.xlu0 %675 }
  0xa5   : > { %v2489_v49 = vpop.eup %2488 }
  0xa6   : > { %v799_v56 = vmul.f32 %v2489_v49, %v2841_v7 }
  0xa7   : > { %v738_v18 = vpop.permute.xlu1 %737  ;;  %v736_v19 = vpop.permute.xlu0 %735 }
  0xa8   : > { %v2869_v44 = vadd.f32 %v736_v19, %v715_v26  ;;  %v2871_v45 = vadd.f32 %v738_v18, %v716_v43  ;;  %v2491_v34 = vpop.eup %2490  ;;  %v801_v10 = vsel %vm800_vm0, %v2841_v7, %v799_v56  ;;  %v817_v43 = vand.u32 2147483648, %v2855_v37 }
  0xa9   : > { %v792_v61 = vmul.f32 %v2491_v34, %v2843_v11 }
  0xaa   : > { %vm821_vm12 = vcmp.eq.f32.partialorder %v2869_v44, inf  ;;  %vm828_vm13 = vcmp.eq.f32.partialorder %v2871_v45, inf  ;;  %vm823_vm14 = vcmp.eq.f32.partialorder %v2869_v44, 0.0  ;;  %vm830_vm15 = vcmp.eq.f32.partialorder %v2871_v45, 0.0 }
  0xab   : > { %v742_v21 = vpop.permute.xlu1 %741  ;;  %v740_v20 = vpop.permute.xlu0 %739  ;;  %v794_v12 = vsel %vm793_vm1, %v2843_v11, %v792_v61 }
  0xac   : > { %v2493_v0 = vpop.eup %2492 }
  0xad   : > { %v806_v18 = vmul.f32 %v2493_v0, %v2849_v29 }
  0xaf   : > { %v682_v22 = vpop.permute.xlu1 %681  ;;  %v680_v24 = vpop.permute.xlu0 %679 }
  0xb0   : > { %v720_v31 = vadd.f32 %v682_v22, %v2779_v46  ;;  %v719_v33 = vadd.f32 %v680_v24, %v2785_v47 }
  0xb3   : > { %v686_v27 = vpop.permute.xlu1 %685  ;;  %v684_v28 = vpop.permute.xlu0 %683 }
  0xb4   : > { %v721_v46 = vadd.f32 %v684_v28, %v2795_v52  ;;  %v722_v48 = vadd.f32 %v686_v27, %v2793_v51  ;;  %v717_v52 = vadd.f32 %v676_v17, %v2765_v39  ;;  %v718_v51 = vadd.f32 %v678_v16, %v2763_v38 }
  0xb5   : > { %v797_v17 = vsel %vm795_vm3, %v796_v6, %v794_v12 }
  0xb6   : > { %v2888_v57 = vadd.f32 %v740_v20, %v717_v52  ;;  %v2893_v1 = vadd.f32 %v742_v21, %v718_v51 }
  0xb7   : > { %v746_v35 = vpop.permute.xlu1 %745  ;;  %v744_v36 = vpop.permute.xlu0 %743 }
  0xb8   : > { %v2857_v40 = vadd.f32 %v746_v35, %v720_v31  ;;  %v2859_v23 = vadd.f32 %v744_v36, %v719_v33 }
  0xba   : > { %1045 = vperm.xlu1 %2485, %v2859_v23   ;;  %1050 = vperm.xlu0 %2486, %v2857_v40   ;;  %2494 = vrsqrt.f32 %v2859_v23  ;;  %vm849_vm4 = vcmp.eq.f32.partialorder %v2859_v23, inf  ;;  %vm856_vm5 = vcmp.eq.f32.partialorder %v2857_v40, inf  ;;  %v852_v27 = vand.u32 2147483648, %v2859_v23 }
  0xbb   : > { %v750_v41 = vpop.permute.xlu1 %749  ;;  %v748_v42 = vpop.permute.xlu0 %747  ;;  %2496 = vrsqrt.f32 %v2857_v40  ;;  %v859_v28 = vand.u32 2147483648, %v2857_v40  ;;  %vm851_vm7 = vcmp.eq.f32.partialorder %v2859_v23, 0.0  ;;  %vm858_vm8 = vcmp.eq.f32.partialorder %v2857_v40, 0.0 }
  0xbc   : > { %2498 = vrsqrt.f32 %v2855_v37  ;;  %v2877_v50 = vadd.f32 %v748_v42, %v721_v46  ;;  %v2880_v53 = vadd.f32 %v750_v41, %v722_v48  ;;  %v810_v42 = vand.u32 2147483648, %v2849_v29 }
  0xbd   : > { %2500 = vrsqrt.f32 %v2869_v44  ;;  %v824_v46 = vand.u32 2147483648, %v2869_v44 }
  0xbe   : > { %1015 = vperm.xlu1 %2485, %v2849_v29   ;;  %1020 = vperm.xlu0 %2486, %v2855_v37   ;;  %2502 = vrsqrt.f32 %v2871_v45  ;;  %vm863_vm0 = vcmp.eq.f32.partialorder %v2877_v50, inf  ;;  %vm870_vm1 = vcmp.eq.f32.partialorder %v2880_v53, inf  ;;  %vm872_vm3 = vcmp.eq.f32.partialorder %v2880_v53, 0.0 }
  0xbf   : > { %v690_v47 = vpop.permute.xlu1 %689  ;;  %v688_v32 = vpop.permute.xlu0 %687  ;;  %2504 = vrsqrt.f32 %v2877_v50 }
  0xc0   : > { %v724_v60 = vadd.f32 %v690_v47, %v2809_v58  ;;  %v723_v2 = vadd.f32 %v688_v32, %v2815_v59  ;;  %2506 = vrsqrt.f32 %v2880_v53  ;;  %v803_v58 = vand.u32 2147483648, %v2841_v7 }
  0xc1   : > { %2508 = vrsqrt.f32 %v2888_v57 }
  0xc2   : > { %1025 = vperm.xlu1 %2485, %v2869_v44   ;;  %1030 = vperm.xlu0 %2486, %v2871_v45   ;;  %2510 = vrsqrt.f32 %v2893_v1  ;;  %v804_v16 = vsel %vm802_vm2, %v803_v58, %v801_v10  ;;  %vm865_vm2 = vcmp.eq.f32.partialorder %v2877_v50, 0.0 }
  0xc3   : > { %v694_v54 = vpop.permute.xlu1 %693  ;;  %v692_v55 = vpop.permute.xlu0 %691 }
  0xc4   : > { %v726_v21 = vadd.f32 %v694_v54, %v2823_v62  ;;  %v725_v22 = vadd.f32 %v692_v55, %v2825_v63  ;;  %v808_v63 = vsel %vm807_vm6, %v2849_v29, %v806_v18  ;;  %v831_v54 = vand.u32 2147483648, %v2871_v45 }
  0xc5   : > { %v811_v47 = vsel %vm809_vm10, %v810_v42, %v808_v63  ;;  %vm837_vm6 = vcmp.eq.f32.partialorder %v2888_v57, 0.0  ;;  %v510_v63 = vld [vmem:[%s3576_s12 + $0x8] sm:$0xff] }
  0xc6   : > { %1055 = vperm.xlu1 %2485, %v2877_v50   ;;  %1060 = vperm.xlu0 %2486, %v2880_v53  }
  0xc7   : > { %v2495_v38 = vpop.eup %2494  ;;  %v754_v39 = vpop.permute.xlu1 %753 }
  0xc8   : > { %v752_v4 = vpop.permute.xlu0 %751  ;;  %v2497_v5 = vpop.eup %2496  ;;  %v2903_v59 = vadd.f32 %v754_v39, %v724_v60  ;;  %v848_v14 = vmul.f32 %v2495_v38, %v2859_v23  ;;  %v866_v38 = vand.u32 2147483648, %v2877_v50 }
  0xc9   : > { %v2499_v9 = vpop.eup %2498  ;;  %v2908_v13 = vadd.f32 %v752_v4, %v723_v2  ;;  %v855_v15 = vmul.f32 %v2497_v5, %v2857_v40 }
  0xca   : > { %1035 = vperm.xlu1 %2485, %v2888_v57   ;;  %1040 = vperm.xlu0 %2486, %v2893_v1   ;;  %v813_v19 = vmul.f32 %v2499_v9, %v2855_v37  ;;  %2512 = vrsqrt.f32 %v2903_v59  ;;  %v2501_v20 = vpop.eup %2500  ;;  %v850_v11 = vsel %vm849_vm4, %v2859_v23, %v848_v14  ;;  %vm835_vm4 = vcmp.eq.f32.partialorder %v2888_v57, inf }
  0xcb   : > { %v758_v7 = vpop.permute.xlu1 %757  ;;  %v857_v24 = vsel %vm856_vm5, %v2857_v40, %v855_v15  ;;  %2514 = vrsqrt.f32 %v2908_v13  ;;  %v2503_v25 = vpop.eup %2502  ;;  %v853_v31 = vsel %vm851_vm7, %v852_v27, %v850_v11  ;;  %v820_v35 = vmul.f32 %v2501_v20, %v2869_v44 }
  0xcc   : > { %v756_v62 = vpop.permute.xlu0 %755  ;;  %v2934_v30 = vadd.f32 %v758_v7, %v726_v21  ;;  %v860_v33 = vsel %vm858_vm8, %v859_v28, %v857_v24  ;;  %v2505_v36 = vpop.eup %2504  ;;  %v815_v41 = vsel %vm814_vm9, %v2855_v37, %v813_v19  ;;  %v827_v23 = vmul.f32 %v2503_v25, %v2871_v45  ;;  %v509_v28 = vld [vmem:[%s3576_s12] sm:$0xff] }
  0xcd   : > { %v2937_v26 = vadd.f32 %v756_v62, %v725_v22  ;;  %v2507_v40 = vpop.eup %2506  ;;  %v818_v32 = vsel %vm816_vm11, %v817_v43, %v815_v41  ;;  %v822_v48 = vsel %vm821_vm12, %v2869_v44, %v820_v35  ;;  %v862_v34 = vmul.f32 %v2505_v36, %v2877_v50 }
  0xce   : > { %910 = vperm.xlu1 %2485, %v804_v16   ;;  %905 = vperm.xlu0 %2486, %v797_v17   ;;  %2516 = vrsqrt.f32 %v2934_v30  ;;  %v2509_v49 = vpop.eup %2508  ;;  %v829_v29 = vsel %vm828_vm13, %v2871_v45, %v827_v23  ;;  %v869_v37 = vmul.f32 %v2507_v40, %v2880_v53  ;;  %v825_v55 = vsel %vm823_vm14, %v824_v46, %v822_v48 }
  0xcf   : > { %2518 = vrsqrt.f32 %v2937_v26  ;;  %v2511_v52 = vpop.eup %2510  ;;  %v832_v51 = vsel %vm830_vm15, %v831_v54, %v829_v29  ;;  %v834_v56 = vmul.f32 %v2509_v49, %v2888_v57  ;;  %v864_v61 = vsel %vm863_vm0, %v2877_v50, %v862_v34 }
  0xd0   : > { %v871_v0 = vsel %vm870_vm1, %v2880_v53, %v869_v37  ;;  %v841_v44 = vmul.f32 %v2511_v52, %v2893_v1  ;;  %v873_v45 = vand.u32 2147483648, %v2880_v53  ;;  %v867_v39 = vsel %vm865_vm2, %v866_v38, %v864_v61 }
  0xd1   : > { %v836_v5 = vsel %vm835_vm4, %v2888_v57, %v834_v56  ;;  %vm842_vm5 = vcmp.eq.f32.partialorder %v2893_v1, inf  ;;  %v838_v50 = vand.u32 2147483648, %v2888_v57  ;;  %v845_v53 = vand.u32 2147483648, %v2893_v1 }
  0xd2   : > { %945 = vperm.xlu1 %2485, %v853_v31   ;;  %950 = vperm.xlu0 %2486, %v860_v33   ;;  %v874_v4 = vsel %vm872_vm3, %v873_v45, %v871_v0  ;;  %v843_v58 = vsel %vm842_vm5, %v2893_v1, %v841_v44  ;;  %vm844_vm7 = vcmp.eq.f32.partialorder %v2893_v1, 0.0  ;;  %vm884_vm8 = vcmp.eq.f32.partialorder %v2903_v59, inf }
  0xd3   : > { %v839_v10 = vsel %vm837_vm6, %v838_v50, %v836_v5  ;;  %v846_v12 = vsel %vm844_vm7, %v845_v53, %v843_v58  ;;  %vm877_vm9 = vcmp.eq.f32.partialorder %v2908_v13, inf  ;;  %v887_v18 = vand.u32 2147483648, %v2903_v59 }
  0xd4   : > { %v880_v57 = vand.u32 2147483648, %v2908_v13  ;;  %vm886_vm10 = vcmp.eq.f32.partialorder %v2903_v59, 0.0  ;;  %vm879_vm11 = vcmp.eq.f32.partialorder %v2908_v13, 0.0  ;;  %vm898_vm12 = vcmp.eq.f32.partialorder %v2934_v30, inf }
  0xd5   : > { %vm891_vm13 = vcmp.eq.f32.partialorder %v2937_v26, inf  ;;  %v901_v11 = vand.u32 2147483648, %v2934_v30  ;;  %v894_v24 = vand.u32 2147483648, %v2937_v26  ;;  %vm900_vm14 = vcmp.eq.f32.partialorder %v2934_v30, 0.0 }
  0xd6   : > { %915 = vperm.xlu1 %2485, %v811_v47   ;;  %920 = vperm.xlu0 %2486, %v818_v32   ;;  %vm893_vm15 = vcmp.eq.f32.partialorder %v2937_v26, 0.0  ;;  %v513_v31 = vpack.c.bf16 %v510_v63, %v509_v28  ;;  %v1085_v46 = vsub.s32 1, %v2703_v3  ;;  %v506_v47 = vld [vmem:[%s3574_s10] sm:$0x3]  ;;  %vm1299_vm0 = vcmask 261120  }
  0xd7   : > { %v2513_v60 = vpop.eup %2512  ;;  %v3016_v49 = vrot.slane %v506_v47, %v2707_v8  ;;  %vm1814_vm1 = vcmask 1041409   ;;  %vm1817_vm2 = vcmask 1042434   ;;  %vm1820_vm3 = vcmask 1043459  }
  0xd8   : > { %v2515_v2 = vpop.eup %2514  ;;  %v883_v6 = vmul.f32 %v2513_v60, %v2903_v59  ;;  %v3018_v29 = vrot.slane %v506_v47, %v1085_v46  ;;  %vm1823_vm4 = vcmask 1044484   ;;  %vm1826_vm5 = vcmask 1045509  }
  0xd9   : > { %v876_v9 = vmul.f32 %v2515_v2, %v2908_v13  ;;  %vm1829_vm6 = vcmask 1046534   ;;  %vm1832_vm7 = vcmask 1047559  }
  0xda   : > { %925 = vperm.xlu1 %2485, %v825_v55   ;;  %930 = vperm.xlu0 %2486, %v832_v51   ;;  %v885_v15 = vsel %vm884_vm8, %v2903_v59, %v883_v6  ;;  %v3027_v51 = vld [vmem:[%s3575_s11] ss:$0 sm:$0xff]  ;;  %vm2601_vm8 = vmmov 0  }
  0xdb   : > { %v2517_v14 = vpop.eup %2516  ;;  %v878_v16 = vsel %vm877_vm9, %v2908_v13, %v876_v9  ;;  %v888_v1 = vsel %vm886_vm10, %v887_v18, %v885_v15 }
  0xdc   : > { %v2519_v17 = vpop.eup %2518  ;;  %v881_v19 = vsel %vm879_vm11, %v880_v57, %v878_v16  ;;  %v897_v21 = vmul.f32 %v2517_v14, %v2934_v30 }
  0xdd   : > { %v890_v20 = vmul.f32 %v2519_v17, %v2937_v26 }
  0xde   : > { %955 = vperm.xlu1 %2485, %v867_v39   ;;  %960 = vperm.xlu0 %2486, %v874_v4   ;;  %v899_v22 = vsel %vm898_vm12, %v2934_v30, %v897_v21 }
  0xdf   : > { %v892_v7 = vsel %vm891_vm13, %v2937_v26, %v890_v20  ;;  %v902_v25 = vsel %vm900_vm14, %v901_v11, %v899_v22 }
  0xe0   : > { %v895_v62 = vsel %vm893_vm15, %v894_v24, %v892_v7 }
  0xe2   : > { %935 = vperm.xlu1 %2485, %v839_v10   ;;  %940 = vperm.xlu0 %2486, %v846_v12  }
  0xe6   : > { %970 = vperm.xlu0 %2486, %v888_v1   ;;  %965 = vperm.xlu1 %2485, %v881_v19  }
  0xea   : > { %1070 = vperm.xlu0 %2486, %v2903_v59   ;;  %1065 = vperm.xlu1 %2485, %v2908_v13   ;;  %v511_v59 = vld [vmem:[%s3576_s12 + $0x10] sm:$0xff]  ;;  %v512_v13 = vld [vmem:[%s3576_s12 + $0x18] sm:$0xff] }
  0xeb   : > { %v514_v27 = vpack.c.bf16 %v512_v13, %v511_v59 }
  0xed   : > { %2374 = vmatprep.subr.bf16.mxu0 %v514_v27 }
  0xee   : > { %980 = vperm.xlu0 %2486, %v902_v25   ;;  %975 = vperm.xlu1 %2485, %v895_v62  }
  0xef   : > { %2375 = vmatpush3.bf16.msra.mxu0 %v514_v27 }
  0xf0   : > { %2376 = vmatprep.subr.bf16.mxu0 %v513_v31 }
  0xf2   : > { %1080 = vperm.xlu0 %2486, %v2934_v30   ;;  %1075 = vperm.xlu1 %2485, %v2937_v26  }
  0xf3   : > { %2377 = vmatpush3.bf16.msra.mxu0 %v513_v31 }
 0x113   : > { %v1011_v33 = vpop.permute.xlu0 %1010 }
 0x114   : > { %v1088_v52 = vmul.f32 %v3018_v29, %v1011_v33 }
 0x115   : > { %v1006_v35 = vpop.permute.xlu1 %1005 }
 0x116   : > { %v1087_v54 = vmul.f32 %v3018_v29, %v1006_v35 }
 0x135   : > { %v1046_v36 = vpop.permute.xlu1 %1045  ;;  %v1051_v41 = vpop.permute.xlu0 %1050 }
 0x136   : > { %v1095_v60 = vmul.f32 %v3018_v29, %v1046_v36  ;;  %v1096_v61 = vmul.f32 %v3018_v29, %v1051_v41 }
 0x139   : > { %v1016_v23 = vpop.permute.xlu1 %1015  ;;  %v1021_v30 = vpop.permute.xlu0 %1020 }
 0x13a   : > { %v1089_v58 = vmul.f32 %v3018_v29, %v1016_v23  ;;  %v1090_v10 = vmul.f32 %v3018_v29, %v1021_v30 }
 0x13d   : > { %v1026_v40 = vpop.permute.xlu1 %1025  ;;  %v1031_v26 = vpop.permute.xlu0 %1030 }
 0x13e   : > { %v1091_v16 = vmul.f32 %v3018_v29, %v1026_v40  ;;  %v1092_v57 = vmul.f32 %v3018_v29, %v1031_v26 }
 0x141   : > { %v1056_v42 = vpop.permute.xlu1 %1055  ;;  %v1061_v43 = vpop.permute.xlu0 %1060 }
 0x142   : > { %v1097_v20 = vmul.f32 %v3018_v29, %v1056_v42  ;;  %v1098_v22 = vmul.f32 %v3018_v29, %v1061_v43 }
 0x145   : > { %v1036_v32 = vpop.permute.xlu1 %1035  ;;  %v1041_v48 = vpop.permute.xlu0 %1040 }
 0x146   : > { %v1093_v62 = vmul.f32 %v3018_v29, %v1036_v32  ;;  %v1094_v35 = vmul.f32 %v3018_v29, %v1041_v48 }
 0x149   : > { %v911_v34 = vpop.permute.xlu1 %910  ;;  %v906_v37 = vpop.permute.xlu0 %905 }
 0x14a   : > { %v988_v55 = vmul.f32 %v3016_v49, %v911_v34  ;;  %v987_v3 = vmul.f32 %v3016_v49, %v906_v37 }
 0x14c   : > { %v1104_v56 = vadd.f32 %v1088_v52, %v988_v55  ;;  %v1103_v8 = vadd.f32 %v1087_v54, %v987_v3 }
 0x14d   : > { %v946_v0 = vpop.permute.xlu1 %945  ;;  %v951_v44 = vpop.permute.xlu0 %950 }
 0x14e   : > { %v3032_v2 = vadd.f32 %v3027_v51, %v1104_v56  ;;  %v3035_v38 = vadd.f32 %v3027_v51, %v1103_v8  ;;  %v995_v45 = vmul.f32 %v3016_v49, %v946_v0  ;;  %v996_v39 = vmul.f32 %v3016_v49, %v951_v44 }
 0x150   : > { %v1111_v4 = vadd.f32 %v1095_v60, %v995_v45  ;;  %v1112_v5 = vadd.f32 %v1096_v61, %v996_v39  ;;  %v1157_v50 = vmul.f32 0.044715, %v3035_v38  ;;  %v1158_v53 = vmul.f32 0.044715, %v3032_v2 }
 0x151   : > { %v916_v6 = vpop.permute.xlu1 %915  ;;  %v921_v9 = vpop.permute.xlu0 %920 }
 0x152   : > { %v3044_v12 = vadd.f32 %v3027_v51, %v1111_v4  ;;  %v989_v14 = vmul.f32 %v3016_v49, %v916_v6  ;;  %v990_v15 = vmul.f32 %v3016_v49, %v921_v9  ;;  %v1173_v17 = vmul.f32 %v1157_v50, %v3035_v38 }
 0x153   : > { %v1174_v18 = vmul.f32 %v1158_v53, %v3032_v2  ;;  %v3053_v1 = vadd.f32 %v3027_v51, %v1112_v5 }
 0x154   : > { %v1105_v19 = vadd.f32 %v1089_v58, %v989_v14  ;;  %v1106_v21 = vadd.f32 %v1090_v10, %v990_v15  ;;  %v1189_v24 = vmul.f32 %v1173_v17, %v3035_v38  ;;  %v1165_v59 = vmul.f32 0.044715, %v3044_v12 }
 0x155   : > { %v926_v7 = vpop.permute.xlu1 %925  ;;  %v931_v11 = vpop.permute.xlu0 %930  ;;  %v1190_v25 = vmul.f32 %v1174_v18, %v3032_v2  ;;  %v1166_v36 = vmul.f32 0.044715, %v3053_v1 }
 0x156   : > { %v3062_v13 = vadd.f32 %v3027_v51, %v1105_v19  ;;  %v3065_v27 = vadd.f32 %v3027_v51, %v1106_v21  ;;  %v991_v28 = vmul.f32 %v3016_v49, %v926_v7  ;;  %v992_v63 = vmul.f32 %v3016_v49, %v931_v11 }
 0x157   : > { %v1205_v31 = vadd.f32 %v1189_v24, %v3035_v38  ;;  %v1206_v33 = vadd.f32 %v1190_v25, %v3032_v2  ;;  %v1181_v37 = vmul.f32 %v1165_v59, %v3044_v12  ;;  %v1182_v60 = vmul.f32 %v1166_v36, %v3053_v1 }
 0x158   : > { %v1159_v41 = vmul.f32 0.044715, %v3062_v13  ;;  %v1160_v23 = vmul.f32 0.044715, %v3065_v27  ;;  %v1107_v30 = vadd.f32 %v1091_v16, %v991_v28  ;;  %v1108_v40 = vadd.f32 %v1092_v57, %v992_v63 }
 0x159   : > { %v956_v26 = vpop.permute.xlu1 %955  ;;  %v961_v42 = vpop.permute.xlu0 %960  ;;  %v1221_v43 = vmul.f32 0.7978846, %v1205_v31  ;;  %v1222_v46 = vmul.f32 0.7978846, %v1206_v33  ;;  %v1141_v11 = vmul.f32 0.5, %v3035_v38  ;;  %v1197_v24 = vmul.f32 %v1181_v37, %v3044_v12 }
 0x15a   : > { %v1175_v47 = vmul.f32 %v1159_v41, %v3062_v13  ;;  %v1176_v32 = vmul.f32 %v1160_v23, %v3065_v27  ;;  %v997_v34 = vmul.f32 %v3016_v49, %v956_v26  ;;  %v998_v48 = vmul.f32 %v3016_v49, %v961_v42 }
 0x15b   : > { %v3081_v52 = vadd.f32 %v3027_v51, %v1107_v30  ;;  %v3084_v54 = vadd.f32 %v3027_v51, %v1108_v40  ;;  %2520 = vtanh.f32 %v1221_v43  ;;  %v1198_v25 = vmul.f32 %v1182_v60, %v3053_v1 }
 0x15c   : > { %v1191_v55 = vmul.f32 %v1175_v47, %v3062_v13  ;;  %v1192_v3 = vmul.f32 %v1176_v32, %v3065_v27  ;;  %v1113_v56 = vadd.f32 %v1097_v20, %v997_v34  ;;  %v1114_v8 = vadd.f32 %v1098_v22, %v998_v48 }
 0x15d   : > { %v1161_v61 = vmul.f32 0.044715, %v3081_v52  ;;  %v1162_v0 = vmul.f32 0.044715, %v3084_v54  ;;  %v936_v44 = vpop.permute.xlu1 %935  ;;  %v941_v45 = vpop.permute.xlu0 %940  ;;  %2522 = vtanh.f32 %v1222_v46  ;;  %v1142_v42 = vmul.f32 0.5, %v3032_v2 }
 0x15e   : > { %v3092_v39 = vadd.f32 %v3027_v51, %v1113_v56  ;;  %v3095_v4 = vadd.f32 %v3027_v51, %v1114_v8  ;;  %v993_v5 = vmul.f32 %v3016_v49, %v936_v44  ;;  %v994_v58 = vmul.f32 %v3016_v49, %v941_v45 }
 0x15f   : > { %v1177_v6 = vmul.f32 %v1161_v61, %v3081_v52  ;;  %v1178_v9 = vmul.f32 %v1162_v0, %v3084_v54  ;;  %v1207_v50 = vadd.f32 %v1191_v55, %v3062_v13  ;;  %v1208_v53 = vadd.f32 %v1192_v3, %v3065_v27 }
 0x160   : > { %v1167_v10 = vmul.f32 0.044715, %v3092_v39  ;;  %v1168_v14 = vmul.f32 0.044715, %v3095_v4  ;;  %v1109_v15 = vadd.f32 %v1093_v62, %v993_v5  ;;  %v1110_v16 = vadd.f32 %v1094_v35, %v994_v58 }
 0x161   : > { %v1193_v17 = vmul.f32 %v1177_v6, %v3081_v52  ;;  %v1194_v18 = vmul.f32 %v1178_v9, %v3084_v54  ;;  %v966_v57 = vpop.permute.xlu1 %965  ;;  %v971_v19 = vpop.permute.xlu0 %970  ;;  %v1223_v21 = vmul.f32 0.7978846, %v1207_v50  ;;  %v1224_v20 = vmul.f32 0.7978846, %v1208_v53 }
 0x162   : > { %v3108_v22 = vadd.f32 %v3027_v51, %v1109_v15  ;;  %v3111_v7 = vadd.f32 %v3027_v51, %v1110_v16  ;;  %v1183_v62 = vmul.f32 %v1167_v10, %v3092_v39  ;;  %v1184_v59 = vmul.f32 %v1168_v14, %v3095_v4 }
 0x163   : > { %2524 = vtanh.f32 %v1223_v21  ;;  %v999_v31 = vmul.f32 %v3016_v49, %v966_v57  ;;  %v1000_v33 = vmul.f32 %v3016_v49, %v971_v19  ;;  %v1209_v38 = vadd.f32 %v1193_v17, %v3081_v52 }
 0x164   : > { %v1163_v28 = vmul.f32 0.044715, %v3108_v22  ;;  %v1164_v63 = vmul.f32 0.044715, %v3111_v7  ;;  %2526 = vtanh.f32 %v1224_v20  ;;  %v1210_v41 = vadd.f32 %v1194_v18, %v3084_v54 }
 0x165   : > { %v1066_v35 = vpop.permute.xlu1 %1065  ;;  %v1071_v36 = vpop.permute.xlu0 %1070  ;;  %v1143_v43 = vmul.f32 0.5, %v3062_v13  ;;  %v1225_v46 = vmul.f32 0.7978846, %v1209_v38  ;;  %v1199_v3 = vmul.f32 %v1183_v62, %v3092_v39  ;;  %v1213_v61 = vadd.f32 %v1197_v24, %v3044_v12 }
 0x166   : > { %v1179_v23 = vmul.f32 %v1163_v28, %v3108_v22  ;;  %v1180_v30 = vmul.f32 %v1164_v63, %v3111_v7  ;;  %v1099_v40 = vmul.f32 %v3018_v29, %v1066_v35  ;;  %v1100_v26 = vmul.f32 %v3018_v29, %v1071_v36 }
 0x167   : > { %v1226_v47 = vmul.f32 0.7978846, %v1210_v41  ;;  %2528 = vtanh.f32 %v1225_v46  ;;  %v1200_v13 = vmul.f32 %v1184_v59, %v3095_v4  ;;  %v1214_v45 = vadd.f32 %v1198_v25, %v3053_v1 }
 0x168   : > { %v2521_v32 = vpop.eup %2520  ;;  %v1195_v34 = vmul.f32 %v1179_v23, %v3108_v22  ;;  %v1196_v48 = vmul.f32 %v1180_v30, %v3111_v7  ;;  %v1115_v37 = vadd.f32 %v1099_v40, %v999_v31  ;;  %v1116_v55 = vadd.f32 %v1100_v26, %v1000_v33 }
 0x169   : > { %v976_v56 = vpop.permute.xlu1 %975  ;;  %v981_v8 = vpop.permute.xlu0 %980  ;;  %v1253_v60 = vadd.f32 1.0, %v2521_v32  ;;  %2530 = vtanh.f32 %v1226_v47  ;;  %v1229_v57 = vmul.f32 0.7978846, %v1213_v61  ;;  %v1230_v62 = vmul.f32 0.7978846, %v1214_v45 }
 0x16a   : > { %v2523_v2 = vpop.eup %2522  ;;  %v3136_v0 = vadd.f32 %v3027_v51, %v1115_v37  ;;  %v3139_v44 = vadd.f32 %v3027_v51, %v1116_v55  ;;  %v1211_v6 = vadd.f32 %v1195_v34, %v3108_v22  ;;  %v1001_v53 = vmul.f32 %v3016_v49, %v976_v56 }
 0x16b   : > { %v1254_v5 = vadd.f32 1.0, %v2523_v2  ;;  %v1269_v58 = vmul.f32 %v1253_v60, %v1141_v11  ;;  %v1212_v10 = vadd.f32 %v1196_v48, %v3111_v7  ;;  %v1002_v14 = vmul.f32 %v3016_v49, %v981_v8 }
 0x16c   : > { %v1169_v9 = vmul.f32 0.044715, %v3136_v0  ;;  %v1170_v50 = vmul.f32 0.044715, %v3139_v44  ;;  %v1227_v18 = vmul.f32 0.7978846, %v1211_v6  ;;  %v1215_v35 = vadd.f32 %v1199_v3, %v3092_v39 }
 0x16d   : > { %v1076_v15 = vpop.permute.xlu1 %1075  ;;  %v1081_v16 = vpop.permute.xlu0 %1080  ;;  %v1270_v17 = vmul.f32 %v1254_v5, %v1142_v42  ;;  %v1228_v25 = vmul.f32 0.7978846, %v1212_v10  ;;  %v1216_v36 = vadd.f32 %v1200_v13, %v3095_v4  ;;  %v1144_v23 = vmul.f32 0.5, %v3065_v27 }
 0x16e   : > { %v1185_v19 = vmul.f32 %v1169_v9, %v3136_v0  ;;  %v1186_v21 = vmul.f32 %v1170_v50, %v3139_v44  ;;  %v1101_v20 = vmul.f32 %v3018_v29, %v1076_v15  ;;  %v1102_v11 = vmul.f32 %v3018_v29, %v1081_v16 }
 0x16f   : > { %v1285_v24 = vpack.c.bf16 %v1270_v17, %v1269_v58  ;;  %2532 = vtanh.f32 %v1227_v18  ;;  %v1231_v26 = vmul.f32 0.7978846, %v1215_v35  ;;  %v1232_v47 = vmul.f32 0.7978846, %v1216_v36 }
 0x170   : > { %v2525_v59 = vpop.eup %2524  ;;  %v1201_v49 = vmul.f32 %v1185_v19, %v3136_v0  ;;  %v1202_v28 = vmul.f32 %v1186_v21, %v3139_v44  ;;  %v1117_v63 = vadd.f32 %v1101_v20, %v1001_v53  ;;  %v1118_v31 = vadd.f32 %v1102_v11, %v1002_v14 }
 0x171   : > { %2378 = vmatprep.mubr.msk.bf16.mxu0 %vm1299_vm0, %v1285_v24  ;;  %v1255_v33 = vadd.f32 1.0, %v2525_v59  ;;  %2534 = vtanh.f32 %v1228_v25  ;;  %v2527_v29 = vpop.eup %2526  ;;  %v1145_v3 = vmul.f32 0.5, %v3081_v52  ;;  %v1146_v13 = vmul.f32 0.5, %v3084_v54 }
 0x172   : > { %v3158_v38 = vadd.f32 %v3027_v51, %v1117_v63  ;;  %v3161_v41 = vadd.f32 %v3027_v51, %v1118_v31  ;;  %2536 = vtanh.f32 %v1229_v57  ;;  %v1256_v30 = vadd.f32 1.0, %v2527_v29 }
 0x173   : > { %v1271_v40 = vmul.f32 %v1255_v33, %v1143_v43  ;;  %2538 = vtanh.f32 %v1230_v62  ;;  %v1217_v32 = vadd.f32 %v1201_v49, %v3136_v0  ;;  %v1218_v48 = vadd.f32 %v1202_v28, %v3139_v44 }
 0x174   : > { %v1171_v42 = vmul.f32 0.044715, %v3158_v38  ;;  %v1172_v46 = vmul.f32 0.044715, %v3161_v41  ;;  %v1272_v34 = vmul.f32 %v1256_v30, %v1144_v23  ;;  %2540 = vtanh.f32 %v1231_v26  ;;  %v2529_v51 = vpop.eup %2528 }
 0x175   : > { %2542 = vtanh.f32 %v1232_v47  ;;  %v1233_v43 = vmul.f32 0.7978846, %v1217_v32  ;;  %v1257_v56 = vadd.f32 1.0, %v2529_v51  ;;  %v1234_v8 = vmul.f32 0.7978846, %v1218_v48 }
 0x176   : > { %v1187_v37 = vmul.f32 %v1171_v42, %v3158_v38  ;;  %v1188_v27 = vmul.f32 %v1172_v46, %v3161_v41  ;;  %v1286_v55 = vpack.c.bf16 %v1272_v34, %v1271_v40  ;;  %v2531_v60 = vpop.eup %2530  ;;  %v1147_v14 = vmul.f32 0.5, %v3108_v22 }
 0x177   : > { %2544 = vtanh.f32 %v1233_v43  ;;  %v1258_v45 = vadd.f32 1.0, %v2531_v60  ;;  %v1273_v5 = vmul.f32 %v1257_v56, %v1145_v3  ;;  %v1148_v54 = vmul.f32 0.5, %v3111_v7  ;;  %v517_v43 = vld [vmem:[%s3566_s2 + $0x10] sm:$0xff]  ;;  %v516_v3 = vld [vmem:[%s3566_s2 + $0x8] sm:$0xff] }
 0x178   : > { %v1203_v61 = vmul.f32 %v1187_v37, %v3158_v38  ;;  %v1204_v2 = vmul.f32 %v1188_v27, %v3161_v41  ;;  %2379 = vmatmul.mubr.msk.bf16.vlgmr.msra.gmra.mxu0 %vm1299_vm0, %v1286_v55  ;;  %2546 = vtanh.f32 %v1234_v8  ;;  %v1149_v21 = vmul.f32 0.5, %v3044_v12  ;;  %v3208_v8 = vld [vmem:[%s3577_s13] ss:$0 sm:$0xff] }
 0x179   : > { %v1274_v52 = vmul.f32 %v1258_v45, %v1146_v13  ;;  %v1150_v24 = vmul.f32 0.5, %v3053_v1  ;;  %v1151_v63 = vmul.f32 0.5, %v3092_v39  ;;  %v1152_v7 = vmul.f32 0.5, %v3095_v4 }
 0x17a   : > { %v1219_v58 = vadd.f32 %v1203_v61, %v3158_v38  ;;  %v1220_v6 = vadd.f32 %v1204_v2, %v3161_v41  ;;  %v1153_v1 = vmul.f32 0.5, %v3136_v0  ;;  %v1154_v40 = vmul.f32 0.5, %v3139_v44 }
 0x17b   : > { %v1287_v10 = vpack.c.bf16 %v1274_v52, %v1273_v5  ;;  %v1155_v34 = vmul.f32 0.5, %v3158_v38  ;;  %v1156_v51 = vmul.f32 0.5, %v3161_v41  ;;  %v518_v38 = vld [vmem:[%s3566_s2 + $0x18] sm:$0xff]  ;;  %v515_v41 = vld [vmem:[%s3566_s2] sm:$0xff] }
 0x17c   : > { %v2533_v9 = vpop.eup %2532  ;;  %v1235_v50 = vmul.f32 0.7978846, %v1219_v58  ;;  %v1236_v53 = vmul.f32 0.7978846, %v1220_v6  ;;  %v520_v55 = vpack.c.bf16 %v518_v38, %v517_v43  ;;  %v519_v56 = vpack.c.bf16 %v516_v3, %v515_v41 }
 0x17d   : > { %v1259_v15 = vadd.f32 1.0, %v2533_v9  ;;  %2382 = vmatprep.mubr.msk.bf16.mxu0 %vm1299_vm0, %v1287_v10 }
 0x17e   : > { %v2535_v16 = vpop.eup %2534  ;;  %2548 = vtanh.f32 %v1235_v50  ;;  %2394 = vmatprep.subr.bf16.mxu1 %v520_v55 }
 0x17f   : > { %v2537_v17 = vpop.eup %2536  ;;  %v1260_v18 = vadd.f32 1.0, %v2535_v16  ;;  %v1275_v57 = vmul.f32 %v1259_v15, %v1147_v14  ;;  %2550 = vtanh.f32 %v1236_v53  ;;  %2395 = vmatpush3.bf16.msra.mxu1 %v520_v55 }
 0x180   : > { %v2539_v19 = vpop.eup %2538  ;;  %v1261_v20 = vadd.f32 1.0, %v2537_v17  ;;  %2396 = vmatprep.subr.bf16.mxu1 %v519_v56 }
 0x181   : > { %v1276_v11 = vmul.f32 %v1260_v18, %v1148_v54  ;;  %v1262_v25 = vadd.f32 1.0, %v2539_v19  ;;  %v2541_v22 = vpop.eup %2540 }
 0x182   : > { %v1277_v62 = vmul.f32 %v1261_v20, %v1149_v21  ;;  %v2543_v59 = vpop.eup %2542  ;;  %v1263_v31 = vadd.f32 1.0, %v2541_v22 }
 0x183   : > { %v1288_v49 = vpack.c.bf16 %v1276_v11, %v1275_v57  ;;  %v1278_v28 = vmul.f32 %v1262_v25, %v1150_v24  ;;  %v1264_v33 = vadd.f32 1.0, %v2543_v59  ;;  %2397 = vmatpush3.bf16.msra.mxu1 %v519_v56 }
 0x184   : > { %v2545_v35 = vpop.eup %2544  ;;  %v1279_v36 = vmul.f32 %v1263_v31, %v1151_v63 }
 0x185   : > { %2383 = vmatmul.mubr.msk.bf16.gmra.mxu0 %vm1299_vm0, %v1288_v49  ;;  %v1289_v12 = vpack.c.bf16 %v1278_v28, %v1277_v62  ;;  %v2547_v29 = vpop.eup %2546  ;;  %v1280_v23 = vmul.f32 %v1264_v33, %v1152_v7  ;;  %v1265_v30 = vadd.f32 1.0, %v2545_v35 }
 0x186   : > { %v1266_v26 = vadd.f32 1.0, %v2547_v29 }
 0x187   : > { %2386 = vmatprep.mubr.msk.bf16.mxu0 %vm1299_vm0, %v1289_v12  ;;  %v1290_v39 = vpack.c.bf16 %v1280_v23, %v1279_v36  ;;  %v1281_v42 = vmul.f32 %v1265_v30, %v1153_v1 }
 0x188   : > { %v1282_v46 = vmul.f32 %v1266_v26, %v1154_v40 }
 0x18a   : > { %v1291_v47 = vpack.c.bf16 %v1282_v46, %v1281_v42 }
 0x18b   : > { %v2549_v4 = vpop.eup %2548 }
 0x18c   : > { %v2551_v32 = vpop.eup %2550  ;;  %v1267_v48 = vadd.f32 1.0, %v2549_v4 }
 0x18d   : > { %2387 = vmatmul.mubr.msk.bf16.gmra.mxu0 %vm1299_vm0, %v1290_v39  ;;  %v1268_v0 = vadd.f32 1.0, %v2551_v32 }
 0x18e   : > { %2390 = vmatprep.mubr.msk.bf16.mxu0 %vm1299_vm0, %v1291_v47  ;;  %v1283_v37 = vmul.f32 %v1267_v48, %v1155_v34 }
 0x18f   : > { %v1284_v27 = vmul.f32 %v1268_v0, %v1156_v51 }
 0x191   : > { %v1292_v44 = vpack.c.bf16 %v1284_v27, %v1283_v37 }
 0x195   : > { %2391 = vmatmul.mubr.msk.bf16.gmra.mxu0 %vm1299_vm0, %v1292_v44 }
 0x238   : > { %v2380_v60 = vpop.f32.mrf.mxu0 }
 0x239   : > { %v1367_v61 = vadd.f32 %v2380_v60, %v3208_v8 }
 0x23a   : > { %v1358_v2 = vpop.f32.mrf.mxu0 }
 0x23b   : > { %v1439_v13 = vmul.f32 0.044715, %v1367_v61  ;;  %v1359_v45 = vadd.f32 %v3208_v8, %v1358_v2  ;;  %v3239_v32 = vmul.f32 0.5, %v1367_v61 }
 0x23c   : > { %v2381_v5 = vpop.f32.mrf.mxu0 }
 0x23d   : > { %v1455_v58 = vmul.f32 %v1439_v13, %v1367_v61  ;;  %v1437_v6 = vmul.f32 0.044715, %v1359_v45  ;;  %v1370_v52 = vadd.f32 %v2381_v5, %v3208_v8  ;;  %v1421_v43 = vmul.f32 0.5, %v1359_v45 }
 0x23e   : > { %v1361_v9 = vpop.f32.mrf.mxu0 }
 0x23f   : > { %v1471_v50 = vmul.f32 %v1455_v58, %v1367_v61  ;;  %v1453_v53 = vmul.f32 %v1437_v6, %v1359_v45  ;;  %v1440_v10 = vmul.f32 0.044715, %v1370_v52  ;;  %v1362_v14 = vadd.f32 %v3208_v8, %v1361_v9 }
 0x240   : > { %v3248_v38 = vmul.f32 0.5, %v1370_v52 }
 0x241   : > { %v1487_v15 = vadd.f32 %v1471_v50, %v1367_v61  ;;  %v1456_v16 = vmul.f32 %v1440_v10, %v1370_v52  ;;  %v1438_v17 = vmul.f32 0.044715, %v1362_v14  ;;  %v1469_v54 = vmul.f32 %v1453_v53, %v1359_v45 }
 0x242   : > { %v1422_v56 = vmul.f32 0.5, %v1362_v14 }
 0x243   : > { %v1503_v18 = vmul.f32 0.7978846, %v1487_v15  ;;  %v1472_v57 = vmul.f32 %v1456_v16, %v1370_v52  ;;  %v1454_v19 = vmul.f32 %v1438_v17, %v1362_v14  ;;  %v1485_v20 = vadd.f32 %v1469_v54, %v1359_v45 }
 0x245   : > { %v2384_v21 = vpop.f32.mrf.mxu0  ;;  %2552 = vtanh.f32 %v1503_v18  ;;  %v1470_v24 = vmul.f32 %v1454_v19, %v1362_v14  ;;  %v1488_v25 = vadd.f32 %v1472_v57, %v1370_v52  ;;  %v1501_v62 = vmul.f32 0.7978846, %v1485_v20 }
 0x246   : > { %v3215_v11 = vadd.f32 %v2384_v21, %v3208_v8 }
 0x247   : > { %v1374_v22 = vpop.f32.mrf.mxu0  ;;  %v1486_v28 = vadd.f32 %v1470_v24, %v1362_v14  ;;  %2554 = vtanh.f32 %v1501_v62  ;;  %v1504_v35 = vmul.f32 0.7978846, %v1488_v25 }
 0x248   : > { %v1443_v59 = vmul.f32 0.044715, %v3215_v11  ;;  %v3219_v49 = vadd.f32 %v3208_v8, %v1374_v22 }
 0x249   : > { %v2385_v63 = vpop.f32.mrf.mxu0  ;;  %v1502_v36 = vmul.f32 0.7978846, %v1486_v28 }
 0x24a   : > { %v1459_v31 = vmul.f32 %v1443_v59, %v3215_v11  ;;  %v1441_v7 = vmul.f32 0.044715, %v3219_v49  ;;  %v3224_v33 = vadd.f32 %v2385_v63, %v3208_v8 }
 0x24b   : > { %v1377_v12 = vpop.f32.mrf.mxu0  ;;  %2556 = vtanh.f32 %v1502_v36 }
 0x24c   : > { %v1475_v29 = vmul.f32 %v1459_v31, %v3215_v11  ;;  %v1457_v23 = vmul.f32 %v1441_v7, %v3219_v49  ;;  %v1444_v1 = vmul.f32 0.044715, %v3224_v33  ;;  %v3230_v30 = vadd.f32 %v3208_v8, %v1377_v12 }
 0x24d   : > { %v2388_v40 = vpop.f32.mrf.mxu0  ;;  %2558 = vtanh.f32 %v1504_v35 }
 0x24e   : > { %v1491_v26 = vadd.f32 %v1475_v29, %v3215_v11  ;;  %v1473_v39 = vmul.f32 %v1457_v23, %v3219_v49  ;;  %v1460_v42 = vmul.f32 %v1444_v1, %v3224_v33  ;;  %v1442_v46 = vmul.f32 0.044715, %v3230_v30 }
 0x24f   : > { %v3237_v4 = vadd.f32 %v2388_v40, %v3208_v8  ;;  %v1390_v47 = vpop.f32.mrf.mxu0 }
 0x250   : > { %v1507_v34 = vmul.f32 0.7978846, %v1491_v26  ;;  %v1489_v48 = vadd.f32 %v1473_v39, %v3219_v49  ;;  %v1476_v51 = vmul.f32 %v1460_v42, %v3224_v33  ;;  %v1458_v0 = vmul.f32 %v1442_v46, %v3230_v30 }
 0x251   : > { %v1447_v37 = vmul.f32 0.044715, %v3237_v4  ;;  %v3246_v27 = vadd.f32 %v3208_v8, %v1390_v47  ;;  %v2389_v44 = vpop.f32.mrf.mxu0 }
 0x252   : > { %v1505_v55 = vmul.f32 0.7978846, %v1489_v48  ;;  %v1492_v41 = vadd.f32 %v1476_v51, %v3224_v33  ;;  %v1474_v3 = vmul.f32 %v1458_v0, %v3230_v30  ;;  %v2553_v60 = vpop.eup %2552  ;;  %2560 = vtanh.f32 %v1507_v34 }
 0x253   : > { %v1463_v61 = vmul.f32 %v1447_v37, %v3237_v4  ;;  %v1445_v2 = vmul.f32 0.044715, %v3246_v27  ;;  %v3255_v13 = vadd.f32 %v2389_v44, %v3208_v8  ;;  %v1393_v5 = vpop.f32.mrf.mxu0  ;;  %v1535_v10 = vadd.f32 1.0, %v2553_v60 }
 0x254   : > { %2562 = vtanh.f32 %v1505_v55  ;;  %v1508_v45 = vmul.f32 0.7978846, %v1492_v41  ;;  %v1490_v58 = vadd.f32 %v1474_v3, %v3230_v30  ;;  %v3259_v6 = vadd.f32 %v3208_v8, %v1393_v5  ;;  %v2555_v14 = vpop.eup %2554 }
 0x255   : > { %v1479_v52 = vmul.f32 %v1463_v61, %v3237_v4  ;;  %v1461_v9 = vmul.f32 %v1445_v2, %v3246_v27  ;;  %v1448_v50 = vmul.f32 0.044715, %v3255_v13  ;;  %v2392_v53 = vpop.f32.mrf.mxu0  ;;  %v1533_v21 = vadd.f32 1.0, %v2555_v14 }
 0x256   : > { %2564 = vtanh.f32 %v1508_v45  ;;  %v1506_v15 = vmul.f32 0.7978846, %v1490_v58  ;;  %v1446_v16 = vmul.f32 0.044715, %v3259_v6  ;;  %v3266_v17 = vadd.f32 %v2392_v53, %v3208_v8 }
 0x257   : > { %v1495_v54 = vadd.f32 %v1479_v52, %v3237_v4  ;;  %v1477_v18 = vmul.f32 %v1461_v9, %v3246_v27  ;;  %v1464_v57 = vmul.f32 %v1448_v50, %v3255_v13  ;;  %v1406_v19 = vpop.f32.mrf.mxu0  ;;  %v1549_v63 = vmul.f32 %v1533_v21, %v1421_v43 }
 0x258   : > { %2566 = vtanh.f32 %v1506_v15  ;;  %v1462_v20 = vmul.f32 %v1446_v16, %v3259_v6  ;;  %v1451_v24 = vmul.f32 0.044715, %v3266_v17  ;;  %v3274_v25 = vadd.f32 %v3208_v8, %v1406_v19  ;;  %v2557_v31 = vpop.eup %2556 }
 0x259   : > { %v1511_v22 = vmul.f32 0.7978846, %v1495_v54  ;;  %v1493_v62 = vadd.f32 %v1477_v18, %v3246_v27  ;;  %v1480_v59 = vmul.f32 %v1464_v57, %v3255_v13  ;;  %v2393_v28 = vpop.f32.mrf.mxu0  ;;  %v1534_v40 = vadd.f32 1.0, %v2557_v31 }
 0x25a   : > { %v1478_v7 = vmul.f32 %v1462_v20, %v3259_v6  ;;  %v1467_v35 = vmul.f32 %v1451_v24, %v3266_v17  ;;  %v1449_v12 = vmul.f32 0.044715, %v3274_v25  ;;  %v3282_v36 = vadd.f32 %v2393_v28, %v3208_v8  ;;  %v2559_v26 = vpop.eup %2558 }
 0x25b   : > { %2568 = vtanh.f32 %v1511_v22  ;;  %v1509_v29 = vmul.f32 0.7978846, %v1493_v62  ;;  %v1496_v23 = vadd.f32 %v1480_v59, %v3255_v13  ;;  %v1409_v1 = vpop.f32.mrf.mxu0  ;;  %v1550_v51 = vmul.f32 %v1534_v40, %v1422_v56 }
 0x25c   : > { %v1494_v39 = vadd.f32 %v1478_v7, %v3259_v6  ;;  %v1483_v42 = vmul.f32 %v1467_v35, %v3266_v17  ;;  %v1465_v46 = vmul.f32 %v1449_v12, %v3274_v25  ;;  %v1452_v47 = vmul.f32 0.044715, %v3282_v36 }
 0x25d   : > { %2570 = vtanh.f32 %v1509_v29  ;;  %v1512_v34 = vmul.f32 0.7978846, %v1496_v23  ;;  %v3290_v48 = vadd.f32 %v3208_v8, %v1409_v1  ;;  %v1565_v41 = vpack.c.bf16 %v1550_v51, %v1549_v63 }
 0x25e   : > { %v1510_v0 = vmul.f32 0.7978846, %v1494_v39  ;;  %v1499_v37 = vadd.f32 %v1483_v42, %v3266_v17  ;;  %v1481_v44 = vmul.f32 %v1465_v46, %v3274_v25  ;;  %v1468_v43 = vmul.f32 %v1452_v47, %v3282_v36 }
 0x25f   : > { %2572 = vtanh.f32 %v1512_v34  ;;  %v1450_v55 = vmul.f32 0.044715, %v3290_v48  ;;  %v1536_v3 = vadd.f32 1.0, %v2559_v26  ;;  %v2561_v60 = vpop.eup %2560  ;;  %2398 = vmatprep.mubr.msk.bf16.mxu1 %vm1299_vm0, %v1565_v41  ;;  %v1551_v45 = vmul.f32 %v1535_v10, %v3239_v32 }
 0x260   : > { %2574 = vtanh.f32 %v1510_v0  ;;  %v1515_v61 = vmul.f32 0.7978846, %v1499_v37  ;;  %v1497_v2 = vadd.f32 %v1481_v44, %v3274_v25  ;;  %v1484_v8 = vmul.f32 %v1468_v43, %v3282_v36 }
 0x261   : > { %v2563_v56 = vpop.eup %2562  ;;  %v1466_v5 = vmul.f32 %v1450_v55, %v3290_v48  ;;  %v1552_v58 = vmul.f32 %v1536_v3, %v3248_v38  ;;  %v1428_v32 = vmul.f32 0.5, %v3224_v33  ;;  %v1539_v38 = vadd.f32 1.0, %v2561_v60 }
 0x262   : > { %v1513_v52 = vmul.f32 0.7978846, %v1497_v2  ;;  %v1500_v9 = vadd.f32 %v1484_v8, %v3282_v36  ;;  %2576 = vtanh.f32 %v1515_v61  ;;  %v1537_v16 = vadd.f32 1.0, %v2563_v56 }
 0x263   : > { %v2565_v50 = vpop.eup %2564  ;;  %v1482_v53 = vmul.f32 %v1466_v5, %v3290_v48  ;;  %v1566_v14 = vpack.c.bf16 %v1552_v58, %v1551_v45  ;;  %v1425_v10 = vmul.f32 0.5, %v3219_v49  ;;  %v1426_v19 = vmul.f32 0.5, %v3230_v30 }
 0x264   : > { %v1516_v15 = vmul.f32 0.7978846, %v1500_v9  ;;  %v1540_v54 = vadd.f32 1.0, %v2565_v50  ;;  %2578 = vtanh.f32 %v1513_v52  ;;  %v1427_v24 = vmul.f32 0.5, %v3215_v11 }
 0x265   : > { %v2567_v18 = vpop.eup %2566  ;;  %v1498_v57 = vadd.f32 %v1482_v53, %v3290_v48  ;;  %2399 = vmatmul.mubr.msk.bf16.vlgmr.msra.gmra.mxu1 %vm1299_vm0, %v1566_v14  ;;  %v1553_v59 = vmul.f32 %v1537_v16, %v1425_v10  ;;  %v1432_v30 = vmul.f32 0.5, %v3255_v13  ;;  %v1429_v23 = vmul.f32 0.5, %v3246_v27 }
 0x266   : > { %2580 = vtanh.f32 %v1516_v15  ;;  %v1538_v21 = vadd.f32 1.0, %v2567_v18  ;;  %v1556_v22 = vmul.f32 %v1540_v54, %v1428_v32  ;;  %v1555_v63 = vmul.f32 %v1539_v38, %v1427_v24 }
 0x267   : > { %v1514_v20 = vmul.f32 0.7978846, %v1498_v57  ;;  %v1430_v1 = vmul.f32 0.5, %v3259_v6  ;;  %v1431_v26 = vmul.f32 0.5, %v3237_v4  ;;  %v1436_v6 = vmul.f32 0.5, %v3282_v36  ;;  %v3327_v36 = vld [vmem:[%s3583_s18] sm:$0xff] }
 0x268   : > { %v2569_v62 = vpop.eup %2568  ;;  %v1554_v28 = vmul.f32 %v1538_v21, %v1426_v19  ;;  %v1568_v35 = vpack.c.bf16 %v1556_v22, %v1555_v63  ;;  %v1433_v4 = vmul.f32 0.5, %v3274_v25  ;;  %v1434_v41 = vmul.f32 0.5, %v3290_v48 }
 0x269   : > { %2582 = vtanh.f32 %v1514_v20  ;;  %v1543_v29 = vadd.f32 1.0, %v2569_v62  ;;  %v1435_v60 = vmul.f32 0.5, %v3266_v17  ;;  %v3332_v17 = vld [vmem:[%s3583_s18 + $0x8] sm:$0xff] }
 0x26a   : > { %v2571_v31 = vpop.eup %2570  ;;  %v1567_v7 = vpack.c.bf16 %v1554_v28, %v1553_v59 }
 0x26b   : > { %v1541_v12 = vadd.f32 1.0, %v2571_v31  ;;  %v1559_v34 = vmul.f32 %v1543_v29, %v1431_v26 }
 0x26c   : > { %v2573_v33 = vpop.eup %2572  ;;  %2402 = vmatprep.mubr.msk.bf16.mxu1 %vm1299_vm0, %v1567_v7 }
 0x26d   : > { %v2575_v49 = vpop.eup %2574  ;;  %2403 = vmatmul.mubr.msk.bf16.gmra.mxu1 %vm1299_vm0, %v1568_v35  ;;  %v1544_v11 = vadd.f32 1.0, %v2573_v33  ;;  %v1557_v42 = vmul.f32 %v1541_v12, %v1429_v23 }
 0x26e   : > { %v1542_v40 = vadd.f32 1.0, %v2575_v49 }
 0x26f   : > { %v1560_v39 = vmul.f32 %v1544_v11, %v1432_v30  ;;  %v2577_v47 = vpop.eup %2576 }
 0x270   : > { %v1558_v46 = vmul.f32 %v1542_v40, %v1430_v1  ;;  %v1547_v55 = vadd.f32 1.0, %v2577_v47 }
 0x271   : > { %v2579_v51 = vpop.eup %2578  ;;  %v1570_v44 = vpack.c.bf16 %v1560_v39, %v1559_v34 }
 0x272   : > { %v1569_v0 = vpack.c.bf16 %v1558_v46, %v1557_v42  ;;  %v1545_v27 = vadd.f32 1.0, %v2579_v51  ;;  %v1563_v56 = vmul.f32 %v1547_v55, %v1435_v60 }
 0x273   : > { %v2581_v37 = vpop.eup %2580 }
 0x274   : > { %2406 = vmatprep.mubr.msk.bf16.mxu1 %vm1299_vm0, %v1569_v0  ;;  %v1548_v13 = vadd.f32 1.0, %v2581_v37  ;;  %v1561_v2 = vmul.f32 %v1545_v27, %v1433_v4 }
 0x275   : > { %2407 = vmatmul.mubr.msk.bf16.gmra.mxu1 %vm1299_vm0, %v1570_v44 }
 0x276   : > { %v2583_v43 = vpop.eup %2582  ;;  %v1564_v61 = vmul.f32 %v1548_v13, %v1436_v6 }
 0x277   : > { %v1546_v3 = vadd.f32 1.0, %v2583_v43 }
 0x278   : > { %v1572_v45 = vpack.c.bf16 %v1564_v61, %v1563_v56 }
 0x279   : > { %v1562_v8 = vmul.f32 %v1546_v3, %v1434_v41 }
 0x27b   : > { %v1571_v5 = vpack.c.bf16 %v1562_v8, %v1561_v2 }
 0x27d   : > { %2410 = vmatprep.mubr.msk.bf16.mxu1 %vm1299_vm0, %v1571_v5 }
 0x27e   : > { %2411 = vmatmul.mubr.msk.bf16.gmra.mxu1 %vm1299_vm0, %v1572_v45 }
 0x325   : > { %v2400_v25 = vpop.f32.mrf.mxu1 }
 0x326   : > { %v1696_v58 = vmul.f32 %v2400_v25, %v3327_v36 }
 0x327   : > { %v1631_v48 = vpop.f32.mrf.mxu1 }
 0x328   : > { %v1719_v53 = vsel %vm1299_vm0, %v1696_v58, 0.0  ;;  %v1694_v16 = vmul.f32 %v1631_v48, %v3327_v36 }
 0x329   : > { %v2401_v52 = vpop.f32.mrf.mxu1 }
 0x32a   : > { %v1697_v9 = vmul.f32 %v2401_v52, %v3332_v17  ;;  %v1710_v10 = vsel %vm1299_vm0, %v1694_v16, 0.0 }
 0x32b   : > { %v1634_v50 = vpop.f32.mrf.mxu1 }
 0x32c   : > { %v1720_v14 = vsel %vm1299_vm0, %v1697_v9, 0.0  ;;  %v1695_v15 = vmul.f32 %v1634_v50, %v3332_v17 }
 0x32d   : > { %v1721_v54 = vadd.f32 %v1720_v14, %v1719_v53  ;;  %v2404_v18 = vpop.f32.mrf.mxu1 }
 0x32e   : > { %v1711_v57 = vsel %vm1299_vm0, %v1695_v15, 0.0  ;;  %v1700_v38 = vmul.f32 %v2404_v18, %v3327_v36 }
 0x32f   : > { %v1647_v32 = vpop.f32.mrf.mxu1  ;;  %v1722_v19 = vrot.slane %v1721_v54, 4  ;;  %v1712_v20 = vadd.f32 %v1711_v57, %v1710_v10 }
 0x330   : > { %v1698_v24 = vmul.f32 %v1647_v32, %v3327_v36  ;;  %v1737_v59 = vsel %vm1299_vm0, %v1700_v38, 0.0 }
 0x331   : > { %v2405_v21 = vpop.f32.mrf.mxu1  ;;  %v1723_v31 = vadd.f32 %v1722_v19, %v1721_v54  ;;  %v1713_v33 = vrot.slane %v1712_v20, 4 }
 0x332   : > { %v1701_v22 = vmul.f32 %v2405_v21, %v3332_v17  ;;  %v1728_v12 = vsel %vm1299_vm0, %v1698_v24, 0.0  ;;  %v2317_v21 = vld [vmem:[%s3567_s3] ss:$0 sm:$0xff] }
 0x333   : > { %v1650_v62 = vpop.f32.mrf.mxu1  ;;  %v1724_v23 = vrot.slane %v1723_v31, 2  ;;  %v1714_v39 = vadd.f32 %v1713_v33, %v1712_v20 }
 0x334   : > { %v1738_v28 = vsel %vm1299_vm0, %v1701_v22, 0.0  ;;  %v1699_v63 = vmul.f32 %v1650_v62, %v3332_v17 }
 0x335   : > { %v1739_v7 = vadd.f32 %v1738_v28, %v1737_v59  ;;  %v2408_v35 = vpop.f32.mrf.mxu1  ;;  %v1725_v44 = vadd.f32 %v1724_v23, %v1723_v31  ;;  %v1715_v43 = vrot.slane %v1714_v39, 2 }
 0x336   : > { %v1729_v49 = vsel %vm1299_vm0, %v1699_v63, 0.0  ;;  %v1704_v40 = vmul.f32 %v2408_v35, %v3327_v36 }
 0x337   : > { %v1740_v30 = vrot.slane %v1739_v7, 4  ;;  %v1730_v29 = vadd.f32 %v1729_v49, %v1728_v12  ;;  %v1663_v11 = vpop.f32.mrf.mxu1  ;;  %v1726_v45 = vrot.slane %v1725_v44, 1  ;;  %v1716_v25 = vadd.f32 %v1715_v43, %v1714_v39 }
 0x338   : > { %v1702_v42 = vmul.f32 %v1663_v11, %v3327_v36  ;;  %v1755_v27 = vsel %vm1299_vm0, %v1704_v40, 0.0 }
 0x339   : > { %v1731_v1 = vrot.slane %v1730_v29, 4  ;;  %v2409_v26 = vpop.f32.mrf.mxu1  ;;  %v1741_v47 = vadd.f32 %v1740_v30, %v1739_v7  ;;  %v1727_v32 = vadd.f32 %v1726_v45, %v1725_v44  ;;  %v1717_v38 = vrot.slane %v1716_v25, 1 }
 0x33a   : > { %v1705_v46 = vmul.f32 %v2409_v26, %v3332_v17  ;;  %v1746_v6 = vsel %vm1299_vm0, %v1702_v42, 0.0 }
 0x33b   : > { %v1732_v34 = vadd.f32 %v1731_v1, %v1730_v29  ;;  %v1666_v51 = vpop.f32.mrf.mxu1  ;;  %v1742_v3 = vrot.slane %v1741_v47, 2  ;;  %v1798_v7 = vadd.f32 %v2317_v21, %v1727_v32  ;;  %v1718_v35 = vadd.f32 %v1717_v38, %v1716_v25 }
 0x33c   : > { %v1756_v0 = vsel %vm1299_vm0, %v1705_v46, 0.0  ;;  %v1703_v37 = vmul.f32 %v1666_v51, %v3332_v17 }
 0x33d   : > { %v1733_v13 = vrot.slane %v1732_v34, 2  ;;  %v1757_v55 = vadd.f32 %v1756_v0, %v1755_v27  ;;  %v1743_v52 = vadd.f32 %v1742_v3, %v1741_v47  ;;  %v1813_v1 = vrot.slane %v1798_v7, 7 }
 0x33e   : > { %v1747_v4 = vsel %vm1299_vm0, %v1703_v37, 0.0  ;;  %v2412_v41 = vpop.f32.mrf.mxu1  ;;  %v1797_v40 = vadd.f32 %v2317_v21, %v1718_v35 }
 0x33f   : > { %v1734_v60 = vadd.f32 %v1733_v13, %v1732_v34  ;;  %v1748_v61 = vadd.f32 %v1747_v4, %v1746_v6  ;;  %v1758_v2 = vrot.slane %v1757_v55, 4  ;;  %v1708_v5 = vmul.f32 %v2412_v41, %v3327_v36 }
 0x340   : > { %v1679_v8 = vpop.f32.mrf.mxu1  ;;  %v1744_v20 = vrot.slane %v1743_v52, 1  ;;  %v1815_v44 = vsel %vm1814_vm1, %v1813_v1, %v1797_v40 }
 0x341   : > { %v1749_v56 = vrot.slane %v1748_v61, 4  ;;  %v1759_v48 = vadd.f32 %v1758_v2, %v1757_v55  ;;  %v1735_v9 = vrot.slane %v1734_v60, 1  ;;  %v1706_v15 = vmul.f32 %v1679_v8, %v3327_v36 }
 0x342   : > { %v2413_v58 = vpop.f32.mrf.mxu1  ;;  %v1773_v18 = vsel %vm1299_vm0, %v1708_v5, 0.0  ;;  %v1745_v30 = vadd.f32 %v1744_v20, %v1743_v52 }
 0x343   : > { %v1750_v50 = vadd.f32 %v1749_v56, %v1748_v61  ;;  %v1709_v53 = vmul.f32 %v2413_v58, %v3332_v17  ;;  %v1760_v14 = vrot.slane %v1759_v48, 2  ;;  %v1736_v24 = vadd.f32 %v1735_v9, %v1734_v60 }
 0x344   : > { %v1682_v16 = vpop.f32.mrf.mxu1  ;;  %v1764_v36 = vsel %vm1299_vm0, %v1706_v15, 0.0  ;;  %v1800_v47 = vadd.f32 %v2317_v21, %v1745_v30 }
 0x345   : > { %v1751_v54 = vrot.slane %v1750_v50, 2  ;;  %v1774_v57 = vsel %vm1299_vm0, %v1709_v53, 0.0  ;;  %v1707_v19 = vmul.f32 %v1682_v16, %v3332_v17  ;;  %v1761_v62 = vadd.f32 %v1760_v14, %v1759_v48 }
 0x346   : > { %v1775_v10 = vadd.f32 %v1774_v57, %v1773_v18  ;;  %v1799_v12 = vadd.f32 %v2317_v21, %v1736_v24  ;;  %v1819_v6 = vrot.slane %v1800_v47, 5 }
 0x347   : > { %v1752_v22 = vadd.f32 %v1751_v54, %v1750_v50  ;;  %v1765_v28 = vsel %vm1299_vm0, %v1707_v19, 0.0  ;;  %v1762_v29 = vrot.slane %v1761_v62, 1 }
 0x348   : > { %v1776_v59 = vrot.slane %v1775_v10, 4  ;;  %v1766_v31 = vadd.f32 %v1765_v28, %v1764_v36  ;;  %v1816_v39 = vrot.slane %v1799_v12, 6 }
 0x349   : > { %v1753_v63 = vrot.slane %v1752_v22, 1  ;;  %v1763_v34 = vadd.f32 %v1762_v29, %v1761_v62 }
 0x34a   : > { %v1777_v33 = vadd.f32 %v1776_v59, %v1775_v10  ;;  %v1767_v49 = vrot.slane %v1766_v31, 4  ;;  %v1818_v27 = vsel %vm1817_vm2, %v1816_v39, %v1815_v44 }
 0x34b   : > { %v1754_v17 = vadd.f32 %v1753_v63, %v1752_v22  ;;  %v1802_v55 = vadd.f32 %v2317_v21, %v1763_v34  ;;  %v1821_v3 = vsel %vm1820_vm3, %v1819_v6, %v1818_v27  ;;  %v1957_v34 = vld [vmem:[%s3570_s6 + $0x10] sm:$0xff] }
 0x34c   : > { %v1778_v11 = vrot.slane %v1777_v33, 2  ;;  %v1768_v23 = vadd.f32 %v1767_v49, %v1766_v31 }
 0x34d   : > { %v1801_v42 = vadd.f32 %v2317_v21, %v1754_v17  ;;  %v1825_v2 = vrot.slane %v1802_v55, 3 }
 0x34e   : > { %v1779_v26 = vadd.f32 %v1778_v11, %v1777_v33  ;;  %v1769_v46 = vrot.slane %v1768_v23, 2 }
 0x34f   : > { %v1822_v43 = vrot.slane %v1801_v42, 4 }
 0x350   : > { %v1780_v51 = vrot.slane %v1779_v26, 1  ;;  %v1770_v0 = vadd.f32 %v1769_v46, %v1768_v23  ;;  %v1958_v46 = vld [vmem:[%s3570_s6 + $0x18] sm:$0xff] }
 0x351   : > { %v1824_v61 = vsel %vm1823_vm4, %v1822_v43, %v1821_v3  ;;  %v2318_v3 = vld [vmem:[%s3568_s4] ss:$0 sm:$0xff] }
 0x352   : > { %v1781_v37 = vadd.f32 %v1780_v51, %v1779_v26  ;;  %v1771_v13 = vrot.slane %v1770_v0, 1  ;;  %v1827_v56 = vsel %vm1826_vm5, %v1825_v2, %v1824_v61  ;;  %v1956_v51 = vld [vmem:[%s3570_s6 + $0x8] sm:$0xff] }
 0x354   : > { %v1772_v4 = vadd.f32 %v1771_v13, %v1770_v0  ;;  %v1804_v41 = vadd.f32 %v2317_v21, %v1781_v37  ;;  %v1955_v0 = vld [vmem:[%s3570_s6] sm:$0xff]  ;;  %v2084_v37 = vld [vmem:[%s3572_s8 + $0x78] sm:$0xff] }
 0x356   : > { %v1803_v60 = vadd.f32 %v2317_v21, %v1772_v4  ;;  %v1831_v5 = vrot.slane %v1804_v41, 1 }
 0x358   : > { %v1828_v8 = vrot.slane %v1803_v60, 2 }
 0x35a   : > { %v1830_v45 = vsel %vm1829_vm6, %v1828_v8, %v1827_v56 }
 0x35b   : > { %v1833_v25 = vsel %vm1832_vm7, %v1831_v5, %v1830_v45 }
 0x35c   : > { %v1835_v48 = vsel %vm1299_vm0, %v1833_v25, 0.0 }
 0x35d   : > { %1836 = vadd.xlane.f32.xlu1 %v1835_v48 }
 0x3e6   : > { %v1837_v58 = vpop.xlane.xlu1 %1836 }
 0x3e7   : > { %v1839_v52 = vmul.f32 0.03125, %v1837_v58 }
 0x3e9   : > { %v1841_v9 = vrot.slane %v1839_v52, 1  ;;  %v1842_v50 = vrot.slane %v1839_v52, 2  ;;  %v1843_v53 = vrot.slane %v1839_v52, 3  ;;  %v1844_v14 = vrot.slane %v1839_v52, 4 }
 0x3ea   : > { %v1845_v15 = vrot.slane %v1839_v52, 5  ;;  %v1846_v16 = vrot.slane %v1839_v52, 6  ;;  %v1847_v54 = vrot.slane %v1839_v52, 7  ;;  %v3377_v18 = vsub.f32 %v1797_v40, %v1839_v52 }
 0x3eb   : > { %v3379_v57 = vsub.f32 %v1798_v7, %v1841_v9  ;;  %v3381_v32 = vsub.f32 %v1799_v12, %v1842_v50  ;;  %v3383_v38 = vsub.f32 %v1800_v47, %v1843_v53  ;;  %v3385_v10 = vsub.f32 %v1801_v42, %v1844_v14 }
 0x3ec   : > { %v3387_v19 = vsub.f32 %v1802_v55, %v1845_v15  ;;  %v3389_v21 = vsub.f32 %v1803_v60, %v1846_v16  ;;  %v3391_v20 = vsub.f32 %v1804_v41, %v1847_v54  ;;  %v1864_v59 = vmul.f32 %v3377_v18, %v3377_v18 }
 0x3ed   : > { %v1865_v24 = vmul.f32 %v3379_v57, %v3379_v57  ;;  %v1866_v22 = vmul.f32 %v3381_v32, %v3381_v32  ;;  %v1867_v62 = vmul.f32 %v3383_v38, %v3383_v38  ;;  %v1868_v36 = vmul.f32 %v3385_v10, %v3385_v10 }
 0x3ee   : > { %v1869_v28 = vmul.f32 %v3387_v19, %v3387_v19  ;;  %v1870_v7 = vmul.f32 %v3389_v21, %v3389_v21  ;;  %v1871_v35 = vmul.f32 %v3391_v20, %v3391_v20  ;;  %v2600_v47 = vmov 0.0  }
 0x3ef   : > { %v1880_v63 = vrot.slane %v1865_v24, 7  ;;  %v1882_v31 = vrot.slane %v1866_v22, 6  ;;  %v1884_v12 = vrot.slane %v1867_v62, 5  ;;  %v1886_v49 = vrot.slane %v1868_v36, 4  ;;  %2414 = vmatprep.subr.mxu0 %v2600_v47  ;;  %2422 = vmatprep.mubr.msk.f32.mxu0 %vm2601_vm8, %v2600_v47 }
 0x3f0   : > { %v1888_v29 = vrot.slane %v1869_v28, 3  ;;  %v1890_v23 = vrot.slane %v1870_v7, 2  ;;  %v1892_v40 = vrot.slane %v1871_v35, 1  ;;  %2415 = vmatpush3.msra.mxu0 %v1958_v46  ;;  %2425 = vmatprep.subr.mxu1 %v2600_v47  ;;  %v2076_v46 = vld [vmem:[%s3572_s8 + $0x38] sm:$0xff] }
 0x3f1   : > { %v1881_v33 = vsel %vm1814_vm1, %v1880_v63, %v1864_v59  ;;  %2416 = vmatprep.subr.mxu0 %v2600_v47  ;;  %2457 = vmatprep.mubr.msk.f32.mxu1 %vm2601_vm8, %v2600_v47 }
 0x3f2   : > { %v1883_v17 = vsel %vm1817_vm2, %v1882_v31, %v1881_v33  ;;  %2417 = vmatpush3.msra.mxu0 %v1957_v34  ;;  %2426 = vmatpush3.msra.mxu1 %v2084_v37  ;;  %v2075_v34 = vld [vmem:[%s3572_s8 + $0x30] sm:$0xff]  ;;  %v2166_v37 = vld [vmem:[%s3578_s14 + $0x18] sm:$0xff] }
 0x3f3   : > { %v1885_v30 = vsel %vm1820_vm3, %v1884_v12, %v1883_v17  ;;  %2418 = vmatprep.subr.mxu0 %v2600_v47  ;;  %2427 = vmatprep.subr.mxu1 %v2600_v47 }
 0x3f4   : > { %v1887_v11 = vsel %vm1823_vm4, %v1886_v49, %v1885_v30  ;;  %2419 = vmatpush3.msra.mxu0 %v1956_v51  ;;  %v2074_v51 = vld [vmem:[%s3572_s8 + $0x28] sm:$0xff] }
 0x3f5   : > { %v1889_v1 = vsel %vm1826_vm5, %v1888_v29, %v1887_v11  ;;  %2420 = vmatprep.subr.mxu0 %v2600_v47  ;;  %v2083_v11 = vld [vmem:[%s3572_s8 + $0x70] sm:$0xff] }
 0x3f6   : > { %v1891_v26 = vsel %vm1829_vm6, %v1890_v23, %v1889_v1  ;;  %2421 = vmatpush3.msra.mxu0 %v1955_v0  ;;  %v2082_v23 = vld [vmem:[%s3572_s8 + $0x68] sm:$0xff]  ;;  %2428 = vmatpush3.msra.mxu1 %v2083_v11  ;;  %v2081_v1 = vld [vmem:[%s3572_s8 + $0x60] sm:$0xff] }
 0x3f7   : > { %v1893_v39 = vsel %vm1832_vm7, %v1892_v40, %v1891_v26  ;;  %2460 = vmatprep.subr.mxu0 %v2600_v47  ;;  %2429 = vmatprep.subr.mxu1 %v2600_v47  ;;  %v2080_v40 = vld [vmem:[%s3572_s8 + $0x58] sm:$0xff]  ;;  %v2079_v26 = vld [vmem:[%s3572_s8 + $0x50] sm:$0xff]  ;;  %v2073_v0 = vld [vmem:[%s3572_s8 + $0x20] sm:$0xff] }
 0x3f8   : > { %v1895_v42 = vsel %vm1299_vm0, %v1893_v39, 0.0  ;;  %2430 = vmatpush3.msra.mxu1 %v2082_v23  ;;  %v2078_v39 = vld [vmem:[%s3572_s8 + $0x48] sm:$0xff] }
 0x3f9   : > { %1896 = vadd.xlane.f32.xlu0 %v1895_v42  ;;  %2431 = vmatprep.subr.mxu1 %v2600_v47  ;;  %v2077_v42 = vld [vmem:[%s3572_s8 + $0x40] sm:$0xff] }
 0x3fa   : > { %2432 = vmatpush3.msra.mxu1 %v2081_v1 }
 0x3fb   : > { %2433 = vmatprep.subr.mxu1 %v2600_v47 }
 0x3fc   : > { %2434 = vmatpush3.msra.mxu1 %v2080_v40 }
 0x3fd   : > { %2435 = vmatprep.subr.mxu1 %v2600_v47 }
 0x3fe   : > { %2436 = vmatpush3.msra.mxu1 %v2079_v26 }
 0x3ff   : > { %2437 = vmatprep.subr.mxu1 %v2600_v47 }
 0x400   : > { %2438 = vmatpush3.msra.mxu1 %v2078_v39 }
 0x401   : > { %2439 = vmatprep.subr.mxu1 %v2600_v47 }
 0x402   : > { %2440 = vmatpush3.msra.mxu1 %v2077_v42 }
 0x403   : > { %2441 = vmatprep.subr.mxu1 %v2600_v47 }
 0x404   : > { %2442 = vmatpush3.msra.mxu1 %v2076_v46 }
 0x405   : > { %2443 = vmatprep.subr.mxu1 %v2600_v47 }
 0x406   : > { %2444 = vmatpush3.msra.mxu1 %v2075_v34 }
 0x407   : > { %2445 = vmatprep.subr.mxu1 %v2600_v47 }
 0x408   : > { %2446 = vmatpush3.msra.mxu1 %v2074_v51 }
 0x409   : > { %2447 = vmatprep.subr.mxu1 %v2600_v47 }
 0x40a   : > { %2448 = vmatpush3.msra.mxu1 %v2073_v0 }
 0x40b   : > { %2449 = vmatprep.subr.mxu1 %v2600_v47 }
 0x482   : > { %v1897_v44 = vpop.xlane.xlu0 %1896 }
 0x483   : > { %v1898_v13 = vmul.f32 0.03125, %v1897_v44  ;;  %v2072_v44 = vld [vmem:[%s3572_s8 + $0x18] sm:$0xff] }
 0x484   : > { %2450 = vmatpush3.msra.mxu1 %v2072_v44 }
 0x485   : > { %v1899_v27 = vadd.f32 1e-05, %v1898_v13  ;;  %v2071_v13 = vld [vmem:[%s3572_s8 + $0x10] sm:$0xff]  ;;  %2451 = vmatprep.subr.mxu1 %v2600_v47 }
 0x486   : > { %2452 = vmatpush3.msra.mxu1 %v2071_v13 }
 0x487   : > { %2584 = vrsqrt.f32 %v1899_v27  ;;  %v2070_v27 = vld [vmem:[%s3572_s8 + $0x8] sm:$0xff]  ;;  %2453 = vmatprep.subr.mxu1 %v2600_v47 }
 0x488   : > { %2454 = vmatpush3.msra.mxu1 %v2070_v27 }
 0x489   : > { %2455 = vmatprep.subr.mxu1 %v2600_v47 }
 0x494   : > { %v2585_v43 = vpop.eup %2584 }
 0x495   : > { %v1902_v6 = vrot.slane %v2585_v43, 1  ;;  %v1903_v55 = vrot.slane %v2585_v43, 2  ;;  %v1904_v4 = vrot.slane %v2585_v43, 3  ;;  %v1905_v41 = vrot.slane %v2585_v43, 4 }
 0x496   : > { %v1906_v60 = vrot.slane %v2585_v43, 5  ;;  %v1907_v61 = vrot.slane %v2585_v43, 6  ;;  %v1908_v2 = vrot.slane %v2585_v43, 7  ;;  %v1917_v8 = vmul.f32 %v2585_v43, %v3377_v18  ;;  %v2319_v18 = vld [vmem:[%s3569_s5] ss:$0 sm:$0xff] }
 0x497   : > { %v1918_v56 = vmul.f32 %v1902_v6, %v3379_v57  ;;  %v1919_v5 = vmul.f32 %v1903_v55, %v3381_v32  ;;  %v1920_v45 = vmul.f32 %v1904_v4, %v3383_v38  ;;  %v1921_v25 = vmul.f32 %v1905_v41, %v3385_v10  ;;  %v2069_v43 = vld [vmem:[%s3572_s8] sm:$0xff] }
 0x498   : > { %v1922_v48 = vmul.f32 %v1906_v60, %v3387_v19  ;;  %v1923_v58 = vmul.f32 %v1907_v61, %v3389_v21  ;;  %v1924_v52 = vmul.f32 %v1908_v2, %v3391_v20  ;;  %v1932_v9 = vmul.f32 %v2318_v3, %v1917_v8  ;;  %2456 = vmatpush3.msra.mxu1 %v2069_v43  ;;  %v2320_v6 = vld [vmem:[%s3571_s7] ss:$0 sm:$0xff] }
 0x499   : > { %v1933_v50 = vmul.f32 %v2318_v3, %v1918_v56  ;;  %v1934_v53 = vmul.f32 %v2318_v3, %v1919_v5  ;;  %v1935_v14 = vmul.f32 %v2318_v3, %v1920_v45  ;;  %v1936_v15 = vmul.f32 %v2318_v3, %v1921_v25 }
 0x49a   : > { %v1937_v16 = vmul.f32 %v2318_v3, %v1922_v48  ;;  %v1938_v54 = vmul.f32 %v2318_v3, %v1923_v58  ;;  %v1939_v57 = vmul.f32 %v2318_v3, %v1924_v52  ;;  %v1947_v24 = vadd.f32 %v2319_v18, %v1932_v9  ;;  %v2165_v48 = vld [vmem:[%s3578_s14 + $0x10] sm:$0xff]  ;;  %v2164_v58 = vld [vmem:[%s3578_s14 + $0x8] sm:$0xff]  ;;  %v2163_v52 = vld [vmem:[%s3578_s14] sm:$0xff] }
 0x49b   : > { %v1948_v32 = vadd.f32 %v2319_v18, %v1933_v50  ;;  %v1949_v38 = vadd.f32 %v2319_v18, %v1934_v53  ;;  %v1950_v10 = vadd.f32 %v2319_v18, %v1935_v14  ;;  %v1951_v19 = vadd.f32 %v2319_v18, %v1936_v15  ;;  %v2322_v9 = vld [vmem:[%s3573_s9] ss:$0 sm:$0xff] }
 0x49c   : > { %v1952_v21 = vadd.f32 %v2319_v18, %v1937_v16  ;;  %v1953_v62 = vadd.f32 %v2319_v18, %v1938_v54  ;;  %v1954_v36 = vadd.f32 %v2319_v18, %v1939_v57  ;;  %v505_v50 = vld [vmem:[%s504_s27] sm:$0xff] }
 0x49d   : > { %v1974_v22 = vrot.slane %v1948_v32, 7  ;;  %v1976_v20 = vrot.slane %v1949_v38, 6  ;;  %v1978_v28 = vrot.slane %v1950_v10, 5  ;;  %v1980_v31 = vrot.slane %v1951_v19, 4 }
 0x49e   : > { %v1982_v35 = vrot.slane %v1952_v21, 3  ;;  %v1984_v12 = vrot.slane %v1953_v62, 2  ;;  %v1986_v49 = vrot.slane %v1954_v36, 1 }
 0x49f   : > { %v1975_v59 = vsel %vm1814_vm1, %v1974_v22, %v1947_v24 }
 0x4a0   : > { %v1977_v63 = vsel %vm1817_vm2, %v1976_v20, %v1975_v59 }
 0x4a1   : > { %v1979_v7 = vsel %vm1820_vm3, %v1978_v28, %v1977_v63 }
 0x4a2   : > { %v1981_v33 = vsel %vm1823_vm4, %v1980_v31, %v1979_v7 }
 0x4a3   : > { %v1983_v17 = vsel %vm1826_vm5, %v1982_v35, %v1981_v33 }
 0x4a4   : > { %v1985_v30 = vsel %vm1829_vm6, %v1984_v12, %v1983_v17 }
 0x4a5   : > { %v1987_v29 = vsel %vm1832_vm7, %v1986_v49, %v1985_v30 }
 0x4a6   : > { %2423 = vmatmul.mubr.msk.f32.vlgmr.msra.gmra.mxu0 %vm1299_vm0, %v1987_v29 }
 0x4a7   : > { %2468 = vmatprep.mubr.msk.f32.mxu0 %vm2601_vm8, %v2600_v47  ;;  %2461 = vmatpush3.msra.mxu0 %v2166_v37 }
 0x4a8   : > { %2462 = vmatprep.subr.mxu0 %v2600_v47 }
 0x4a9   : > { %2463 = vmatpush3.msra.mxu0 %v2165_v48 }
 0x4aa   : > { %2464 = vmatprep.subr.mxu0 %v2600_v47 }
 0x4ab   : > { %2465 = vmatpush3.msra.mxu0 %v2164_v58 }
 0x4ac   : > { %2466 = vmatprep.subr.mxu0 %v2600_v47  ;;  %v2323_v47 = vld [vmem:[%s3579_s15] ss:$0 sm:$0xff] }
 0x4ad   : > { %2467 = vmatpush3.msra.mxu0 %v2163_v52 }
 0x566   : > { %v2056_v55 = vpop.f32.mrf.mxu0 }
 0x567   : > { %v2057_v4 = vadd.f32 %v2320_v6, %v2056_v55 }
 0x568   : > { %v2424_v41 = vpop.f32.mrf.mxu0 }
 0x569   : > { %v2061_v3 = vmul.f32 0.044715, %v2057_v4  ;;  %v2060_v5 = vmul.f32 0.5, %v2057_v4 }
 0x56b   : > { %v2062_v60 = vmul.f32 %v2061_v3, %v2057_v4 }
 0x56d   : > { %v2063_v61 = vmul.f32 %v2062_v60, %v2057_v4 }
 0x56f   : > { %v2064_v2 = vadd.f32 %v2063_v61, %v2057_v4 }
 0x571   : > { %v2065_v8 = vmul.f32 0.7978846, %v2064_v2 }
 0x573   : > { %2586 = vtanh.f32 %v2065_v8 }
 0x580   : > { %v2587_v56 = vpop.eup %2586 }
 0x581   : > { %v2067_v45 = vadd.f32 1.0, %v2587_v56 }
 0x583   : > { %v2068_v25 = vmul.f32 %v2067_v45, %v2060_v5 }
 0x585   : > { %2458 = vmatmul.mubr.f32.vlgmr.msra.gmra.mxu1 %v2068_v25 }
 0x645   : > { %v2158_v53 = vpop.f32.mrf.mxu1 }
 0x646   : > { %v2159_v14 = vadd.f32 %v2322_v9, %v2158_v53 }
 0x647   : > { %v2459_v15 = vpop.f32.mrf.mxu1 }
 0x648   : > { %v2162_v16 = vadd.f32 %v2159_v14, %v505_v50 }
 0x64a   : > { %2469 = vmatmul.mubr.msk.f32.vlgmr.msra.gmra.mxu0 %vm1299_vm0, %v2162_v16 }
 0x70a   : > { %v2243_v54 = vpop.f32.mrf.mxu0 }
 0x70b   : > { %v2244_v18 = vadd.f32 %v2323_v47, %v2243_v54 }
 0x70c   : > { %v2470_v57 = vpop.f32.mrf.mxu0 }
 0x70d   : > { %2247 = vst [vmem:[%s499_s20] sm:$0xff] %v2244_v18 }
 0x70e PF: > { %s26_s21 = sadd.s32 1, %s2594_s21  }
 0x70f   : > { %p23_p4 = scmp.ge.s32.totalorder %s26_s21, 4  }
 0x711   :  { %25 = sbr.rel (!%p23_p4) target bundleno = 2 (0x2), region = 113 }

// kernel: rapidash_forward.2
= control target key start
LH: loop header
LB: loop body
LE: loop exit
PB: predicated region body
PF: predicated region fallthrough
CT: control target
= control target key end

     0   :  { %19 = vsyncpa [#allocation3], 0  ;;  %s2596_s29 = smov 0   ;;  %s3435_s0 = inlined_call_operand.vmem [shape: f32[16,32], index: 0, kind: input, shape index: {}]   ;;  %s3436_s1 = inlined_call_operand.vmem [shape: f32[16,3], index: 1, kind: input, shape index: {}]   ;;  %s3437_s2 = inlined_call_operand.vmem [shape: f32[32,32], index: 2, kind: input, shape index: {}]   ;;  %s3438_s3 = inlined_call_operand.vmem [shape: f32[1,32], index: 3, kind: input, shape index: {}]   ;;  %s3439_s4 = inlined_call_operand.vmem [shape: f32[1,32], index: 4, kind: input, shape index: {}]   ;;  %s3440_s5 = inlined_call_operand.vmem [shape: f32[1,32], index: 5, kind: input, shape index: {}]   ;;  %s3441_s6 = inlined_call_operand.vmem [shape: f32[32,128], index: 6, kind: input, shape index: {}]   ;;  %s3442_s7 = inlined_call_operand.vmem [shape: f32[1,128], index: 7, kind: input, shape index: {}]   ;;  %s3443_s8 = inlined_call_operand.hbm [shape: f32[128,32], index: 8, kind: input, shape index: {}]   ;;  %s3444_s9 = inlined_call_operand.vmem [shape: f32[1,32], index: 9, kind: input, shape index: {}]   ;;  %s3445_s10 = inlined_call_operand.vmem [shape: f32[2,32], index: 10, kind: input, shape index: {}]   ;;  %s3446_s11 = inlined_call_operand.vmem [shape: f32[1,32], index: 11, kind: input, shape index: {}]   ;;  %s3447_s12 = inlined_call_operand.vmem [shape: f32[32,32], index: 12, kind: input, shape index: {}]   ;;  %s3448_s13 = inlined_call_operand.vmem [shape: f32[1,32], index: 13, kind: input, shape index: {}]   ;;  %s3449_s14 = inlined_call_operand.vmem [shape: f32[16,32], index: 14, kind: output, shape index: {}]  }
   0x1 LB: > { %s2602_s30 = sadd.s32 4294967295, %s2510_s29   ;;  %p2184_p0 = scmp.ge.s32.totalorder %s2510_s29, 1  ;;  %s2510_s29 = sphi %s2596_s29, %s25_s29  }
   0x2   : > { %p350_p1 = scmp.lt.s32.totalorder %s2510_s29, 3  ;;  %s2512_s15 = smov [#allocation2]  }
   0x3   : > { %s386_s16 = sshll.u32 %s2512_s15, 4  ;;  %p2352_p3 = scmp.eq.s32.totalorder %s2602_s30, 0  ;;  %s387_s16 = int_to_ptr.vmem [resolvable:$true] %s386_s16 }
   0x4   : > { %p2606_p2 = pnand %p2184_p0, %p350_p1  ;;  %s2485_s18 = scalar_lea.vmem %s387_s16, 2048 }
   0x5   : > { %p2486_p7 = scmp.ne.s32.totalorder %s387_s16, %s2485_s18  ;;  %p2493_p10 = scmp.lt.s32.totalorder %s387_s16, %s387_s16 }
   0x6   : > { %p2348_p4 = pneg %p2606_p2  ;;  %p2494_p11 = scmp.lt.s32.totalorder %s2485_s18, %s2485_s18 }
   0x8   : > { %p2349_p5 = pnand %p2352_p3, %p2348_p4  ;;  %p2495_p12 = por %p2494_p11, %p2493_p10 }
   0xa   : > { %p2476_p6 = pneg %p2349_p5 }
   0xc   : > { %p2488_p8 = pnand %p2486_p7, %p2476_p6 }
   0xe   : > { %p2489_p9 = pneg %p2488_p8 }
  0x10   : > { %p2496_p13 = pnand %p2495_p12, %p2489_p9 }
  0x12   : > { %2499 = shalt.err (!%p2496_p13)
}
  0x13   : > { %s2513_s19 = smov 128   ;;  %s2514_s20 = smov 8  }
  0x14   : > { %2351 = dma.hbm_to_vmem [thread:$0]  (!%p2349_p5), %s3443_s8, 2048, %s387_s16, [#allocation3], %s2513_s19, %s2513_s19, %s2514_s20  }
  0x15   : > { %417 = sbr.rel (%p2606_p2) target bundleno = 1623 (0x657), region = 76 }
  0x1a   : > { %2505 = dma.done.wait (%p2352_p3), [#allocation3], 2048  }
  0x1b   : > { %2507 = vsyncadd (%p2352_p3), [#allocation3], 4294965248  ;;  %v491_v0 = vlaneseq  ;;  %s2189_s23 = sshll.u32 %s2602_s30, 3  ;;  %v2515_v1 = vmov 1966171168   ;;  %v2639_v11 = vld [vmem:[%s3436_s1 + $0x8] sm:$0xff] }
  0x1c   : > { %v489_v2 = vunpack.c.l.s4 %v2515_v1  ;;  %s463_s26 = scalar_lea.vmem %s3436_s1, %s2189_s23  ;;  %v2644_v12 = vld [vmem:[%s3436_s1] sm:$0xff]  ;;  %v2516_v15 = vmov 0   ;;  %s2517_s17 = smov 126  }
  0x1d   : > { %v2625_v3 = vshrl.u32 %v491_v0, 7  ;;  %v464_v6 = vld [vmem:[%s463_s26] sm:$0xff]  ;;  %2372 = vset.pattern.permute.xlu0 %v2516_v15  ;;  %2371 = vset.pattern.permute.xlu1 %v2516_v15  ;;  %s2518_s18 = smov 127   ;;  %p457_p0 = scmp.lt.s32.totalorder %s2602_s30, 1 }
  0x1e   : > { %v490_v4 = vunpack.c.0.s8 %v489_v2  ;;  %v487_v29 = vcombine.high %v464_v6, %v464_v6  ;;  %s465_s26 = scalar_lea.vmem %s3435_s0, %s2189_s23 }
  0x1f   : > { %v2634_v8 = vsub.s32 0, %v2625_v3  ;;  %s458_s22 = scalar_select %p457_p0, %s2602_s30, 1 }
  0x20   : > { %v493_v5 = vsub.s32 %v490_v4, %v2625_v3 }
  0x21   : > { %s2188_s15 = sshll.u32 %s458_s22, 3 }
  0x22   : > { %v494_v7 = vrot.slane %v464_v6, %v493_v5  ;;  %v501_v33 = vrot.slane %v487_v29, %v493_v5 }
  0x24   : > { %v510_v9 = vrot.slane %v494_v7, %v493_v5  ;;  %v502_v10 = vcombine.high %v494_v7, %v494_v7  ;;  %v517_v37 = vrot.slane %v501_v33, %v493_v5  ;;  %v503_v40 = vcombine.high %v501_v33, %v501_v33 }
  0x26   : > { %v539_v13 = vrot.slane %v510_v9, %v2634_v8  ;;  %v524_v14 = vrot.slane %v502_v10, %v493_v5  ;;  %v532_v22 = vcombine.high %v510_v9, %v510_v9  ;;  %v555_v41 = vrot.slane %v517_v37, %v2634_v8 }
  0x27   : > { %v531_v42 = vrot.slane %v503_v40, %v493_v5  ;;  %v533_v50 = vcombine.high %v517_v37, %v517_v37 }
  0x28   : > { %v577_v16 = vsub.f32 %v539_v13, %v2639_v11  ;;  %v576_v17 = vsub.f32 %v539_v13, %v2644_v12  ;;  %v543_v18 = vrot.slane %v524_v14, %v2634_v8  ;;  %v547_v25 = vrot.slane %v532_v22, %v2634_v8 }
  0x29   : > { %v534_v27 = vcombine.high %v524_v14, %v524_v14  ;;  %v585_v43 = vsub.f32 %v555_v41, %v2639_v11  ;;  %v584_v44 = vsub.f32 %v555_v41, %v2644_v12  ;;  %v559_v45 = vrot.slane %v531_v42, %v2634_v8 }
  0x2a   : > { %v2650_v19 = vmul.f32 %v577_v16, %v577_v16  ;;  %v2652_v20 = vmul.f32 %v576_v17, %v576_v17  ;;  %v578_v21 = vsub.f32 %v543_v18, %v2644_v12  ;;  %v579_v24 = vsub.f32 %v543_v18, %v2639_v11 }
  0x2b   : > { %v580_v28 = vsub.f32 %v547_v25, %v2644_v12  ;;  %v581_v30 = vsub.f32 %v547_v25, %v2639_v11  ;;  %v551_v31 = vrot.slane %v534_v27, %v2634_v8  ;;  %v2706_v46 = vmul.f32 %v585_v43, %v585_v43 }
  0x2c   : > { %690 = vrot.lane.b32.xlu1 %v2650_v19, %s2517_s17  ;;  %624 = vrot.lane.b32.xlu0 %v2652_v20, %s2518_s18  ;;  %v2659_v23 = vmul.f32 %v578_v21, %v578_v21  ;;  %v2667_v26 = vmul.f32 %v579_v24, %v579_v24  ;;  %v2712_v47 = vmul.f32 %v584_v44, %v584_v44 }
  0x2d   : > { %v2676_v32 = vmul.f32 %v580_v28, %v580_v28  ;;  %v2682_v34 = vmul.f32 %v581_v30, %v581_v30  ;;  %v583_v35 = vsub.f32 %v551_v31, %v2639_v11  ;;  %v582_v36 = vsub.f32 %v551_v31, %v2644_v12 }
  0x2e   : > { %v587_v48 = vsub.f32 %v559_v45, %v2639_v11  ;;  %v586_v49 = vsub.f32 %v559_v45, %v2644_v12  ;;  %v563_v53 = vrot.slane %v533_v50, %v2634_v8  ;;  %v535_v54 = vcombine.high %v531_v42, %v531_v42 }
  0x2f   : > { %v2690_v38 = vmul.f32 %v583_v35, %v583_v35  ;;  %v2692_v39 = vmul.f32 %v582_v36, %v582_v36 }
  0x30   : > { %626 = vrot.lane.b32.xlu0 %v2650_v19, %s2518_s18  ;;  %628 = vrot.lane.b32.xlu1 %v2659_v23, %s2518_s18  ;;  %v2720_v51 = vmul.f32 %v587_v48, %v587_v48  ;;  %v2722_v52 = vmul.f32 %v586_v49, %v586_v49  ;;  %v589_v55 = vsub.f32 %v563_v53, %v2639_v11 }
  0x31   : > { %v588_v56 = vsub.f32 %v563_v53, %v2644_v12  ;;  %v567_v57 = vrot.slane %v535_v54, %v2634_v8 }
  0x32   : > { %v2736_v58 = vmul.f32 %v589_v55, %v589_v55 }
  0x33   : > { %v2742_v59 = vmul.f32 %v588_v56, %v588_v56  ;;  %v591_v60 = vsub.f32 %v567_v57, %v2639_v11  ;;  %v590_v61 = vsub.f32 %v567_v57, %v2644_v12 }
  0x34   : > { %688 = vrot.lane.b32.xlu0 %v2652_v20, %s2517_s17  ;;  %630 = vrot.lane.b32.xlu1 %v2667_v26, %s2518_s18 }
  0x35   : > { %v2750_v62 = vmul.f32 %v591_v60, %v591_v60  ;;  %v2752_v63 = vmul.f32 %v590_v61, %v590_v61 }
  0x38   : > { %692 = vrot.lane.b32.xlu0 %v2659_v23, %s2517_s17  ;;  %694 = vrot.lane.b32.xlu1 %v2667_v26, %s2517_s17 }
  0x3c   : > { %632 = vrot.lane.b32.xlu0 %v2676_v32, %s2518_s18  ;;  %634 = vrot.lane.b32.xlu1 %v2682_v34, %s2518_s18 }
  0x40   : > { %638 = vrot.lane.b32.xlu1 %v2690_v38, %s2518_s18  ;;  %636 = vrot.lane.b32.xlu0 %v2692_v39, %s2518_s18 }
  0x44   : > { %698 = vrot.lane.b32.xlu1 %v2682_v34, %s2517_s17  ;;  %696 = vrot.lane.b32.xlu0 %v2676_v32, %s2517_s17 }
  0x48   : > { %702 = vrot.lane.b32.xlu1 %v2690_v38, %s2517_s17  ;;  %700 = vrot.lane.b32.xlu0 %v2692_v39, %s2517_s17 }
  0x4c   : > { %642 = vrot.lane.b32.xlu1 %v2706_v46, %s2518_s18  ;;  %640 = vrot.lane.b32.xlu0 %v2712_v47, %s2518_s18 }
  0x50   : > { %646 = vrot.lane.b32.xlu1 %v2720_v51, %s2518_s18  ;;  %644 = vrot.lane.b32.xlu0 %v2722_v52, %s2518_s18 }
  0x54   : > { %706 = vrot.lane.b32.xlu1 %v2706_v46, %s2517_s17  ;;  %704 = vrot.lane.b32.xlu0 %v2712_v47, %s2517_s17 }
  0x58   : > { %710 = vrot.lane.b32.xlu1 %v2720_v51, %s2517_s17  ;;  %708 = vrot.lane.b32.xlu0 %v2722_v52, %s2517_s17 }
  0x5c   : > { %650 = vrot.lane.b32.xlu1 %v2736_v58, %s2518_s18  ;;  %648 = vrot.lane.b32.xlu0 %v2742_v59, %s2518_s18 }
  0x60   : > { %654 = vrot.lane.b32.xlu1 %v2750_v62, %s2518_s18  ;;  %652 = vrot.lane.b32.xlu0 %v2752_v63, %s2518_s18  ;;  %s460_s18 = scalar_lea.vmem %s3449_s14, %s2188_s15 }
  0x64   : > { %714 = vrot.lane.b32.xlu1 %v2736_v58, %s2517_s17  ;;  %712 = vrot.lane.b32.xlu0 %v2742_v59, %s2517_s17 }
  0x68   : > { %718 = vrot.lane.b32.xlu1 %v2750_v62, %s2517_s17  ;;  %716 = vrot.lane.b32.xlu0 %v2752_v63, %s2517_s17 }
  0x9e   : > { %v691_v0 = vpop.permute.xlu1 %690  ;;  %v625_v1 = vpop.permute.xlu0 %624 }
  0x9f   : > { %v672_v6 = vadd.f32 %v625_v1, %v2652_v20 }
  0xa2   : > { %v627_v2 = vpop.permute.xlu0 %626  ;;  %v629_v4 = vpop.permute.xlu1 %628 }
  0xa3   : > { %v673_v5 = vadd.f32 %v627_v2, %v2650_v19  ;;  %v674_v12 = vadd.f32 %v629_v4, %v2659_v23 }
  0xa5   : > { %v2768_v7 = vadd.f32 %v691_v0, %v673_v5 }
  0xa6   : > { %v689_v9 = vpop.permute.xlu0 %688  ;;  %v631_v10 = vpop.permute.xlu1 %630 }
  0xa7   : > { %v2770_v11 = vadd.f32 %v689_v9, %v672_v6  ;;  %971 = vperm.xlu0 %2372, %v2768_v7   ;;  %v675_v13 = vadd.f32 %v631_v10, %v2667_v26  ;;  %2374 = vrsqrt.f32 %v2768_v7  ;;  %vm761_vm1 = vcmp.eq.f32.partialorder %v2768_v7, inf }
  0xa8   : > { %vm763_vm3 = vcmp.eq.f32.partialorder %v2768_v7, 0.0 }
  0xa9   : > { %966 = vperm.xlu1 %2371, %v2770_v11   ;;  %2376 = vrsqrt.f32 %v2770_v11  ;;  %vm754_vm0 = vcmp.eq.f32.partialorder %v2770_v11, inf  ;;  %vm756_vm2 = vcmp.eq.f32.partialorder %v2770_v11, 0.0 }
  0xaa   : > { %v693_v14 = vpop.permute.xlu0 %692  ;;  %v695_v15 = vpop.permute.xlu1 %694 }
  0xab   : > { %v2776_v16 = vadd.f32 %v693_v14, %v674_v12  ;;  %v2778_v17 = vadd.f32 %v695_v15, %v675_v13  ;;  %v757_v12 = vand.u32 2147483648, %v2770_v11  ;;  %v764_v13 = vand.u32 2147483648, %v2768_v7 }
  0xad   : > { %976 = vperm.xlu1 %2371, %v2776_v16   ;;  %981 = vperm.xlu0 %2372, %v2778_v17   ;;  %2378 = vrsqrt.f32 %v2778_v17  ;;  %vm775_vm4 = vcmp.eq.f32.partialorder %v2778_v17, inf  ;;  %vm768_vm5 = vcmp.eq.f32.partialorder %v2776_v16, inf  ;;  %vm777_vm6 = vcmp.eq.f32.partialorder %v2778_v17, 0.0 }
  0xae   : > { %v633_v18 = vpop.permute.xlu0 %632  ;;  %v635_v19 = vpop.permute.xlu1 %634  ;;  %2380 = vrsqrt.f32 %v2776_v16  ;;  %vm770_vm7 = vcmp.eq.f32.partialorder %v2776_v16, 0.0 }
  0xaf   : > { %v676_v22 = vadd.f32 %v633_v18, %v2676_v32  ;;  %v677_v23 = vadd.f32 %v635_v19, %v2682_v34 }
  0xb2   : > { %v639_v20 = vpop.permute.xlu1 %638  ;;  %v637_v21 = vpop.permute.xlu0 %636 }
  0xb3   : > { %v679_v42 = vadd.f32 %v639_v20, %v2690_v38  ;;  %v678_v43 = vadd.f32 %v637_v21, %v2692_v39 }
  0xb4   : > { %v2375_v54 = vpop.eup %2374 }
  0xb5   : > { %v760_v57 = vmul.f32 %v2375_v54, %v2768_v7 }
  0xb6   : > { %v699_v24 = vpop.permute.xlu1 %698  ;;  %v697_v25 = vpop.permute.xlu0 %696 }
  0xb7   : > { %v2784_v26 = vadd.f32 %v699_v24, %v677_v23  ;;  %v2786_v27 = vadd.f32 %v697_v25, %v676_v22  ;;  %v2377_v55 = vpop.eup %2376  ;;  %v762_v10 = vsel %vm761_vm1, %v2768_v7, %v760_v57 }
  0xb8   : > { %v753_v56 = vmul.f32 %v2377_v55, %v2770_v11  ;;  %v765_v23 = vsel %vm763_vm3, %v764_v13, %v762_v10 }
  0xb9   : > { %986 = vperm.xlu1 %2371, %v2786_v27   ;;  %991 = vperm.xlu0 %2372, %v2784_v26   ;;  %2382 = vrsqrt.f32 %v2784_v26  ;;  %vm789_vm8 = vcmp.eq.f32.partialorder %v2784_v26, inf  ;;  %vm782_vm9 = vcmp.eq.f32.partialorder %v2786_v27, inf  ;;  %vm791_vm10 = vcmp.eq.f32.partialorder %v2784_v26, 0.0 }
  0xba   : > { %v703_v28 = vpop.permute.xlu1 %702  ;;  %v701_v29 = vpop.permute.xlu0 %700  ;;  %2384 = vrsqrt.f32 %v2786_v27  ;;  %v755_v9 = vsel %vm754_vm0, %v2770_v11, %v753_v56  ;;  %vm784_vm11 = vcmp.eq.f32.partialorder %v2786_v27, 0.0 }
  0xbb   : > { %v2379_v60 = vpop.eup %2378  ;;  %v758_v22 = vsel %vm756_vm2, %v757_v12, %v755_v9 }
  0xbc   : > { %v2381_v1 = vpop.eup %2380 }
  0xbd   : > { %v767_v14 = vmul.f32 %v2381_v1, %v2776_v16 }
  0xbe   : > { %v643_v30 = vpop.permute.xlu1 %642  ;;  %v641_v31 = vpop.permute.xlu0 %640 }
  0xbf   : > { %v681_v32 = vadd.f32 %v643_v30, %v2706_v46  ;;  %v680_v34 = vadd.f32 %v641_v31, %v2712_v47  ;;  %v2804_v46 = vadd.f32 %v703_v28, %v679_v42  ;;  %v2806_v47 = vadd.f32 %v701_v29, %v678_v43 }
  0xc0   : > { %v769_v7 = vsel %vm768_vm5, %v2776_v16, %v767_v14  ;;  %v778_v30 = vand.u32 2147483648, %v2778_v17  ;;  %v771_v31 = vand.u32 2147483648, %v2776_v16  ;;  %v792_v42 = vand.u32 2147483648, %v2784_v26 }
  0xc1   : > { %v785_v43 = vand.u32 2147483648, %v2786_v27  ;;  %vm803_vm0 = vcmp.eq.f32.partialorder %v2804_v46, inf  ;;  %vm796_vm1 = vcmp.eq.f32.partialorder %v2806_v47, inf  ;;  %v799_v1 = vand.u32 2147483648, %v2806_v47 }
  0xc2   : > { %v647_v33 = vpop.permute.xlu1 %646  ;;  %v645_v35 = vpop.permute.xlu0 %644  ;;  %vm805_vm2 = vcmp.eq.f32.partialorder %v2804_v46, 0.0  ;;  %vm798_vm3 = vcmp.eq.f32.partialorder %v2806_v47, 0.0 }
  0xc3   : > { %v683_v48 = vadd.f32 %v647_v33, %v2720_v51  ;;  %v682_v38 = vadd.f32 %v645_v35, %v2722_v52  ;;  %v772_v35 = vsel %vm770_vm7, %v771_v31, %v769_v7  ;;  %v470_v31 = vld [vmem:[%s3447_s12] sm:$0xff] }
  0xc6   : > { %v707_v36 = vpop.permute.xlu1 %706  ;;  %v705_v37 = vpop.permute.xlu0 %704 }
  0xc7   : > { %v2794_v40 = vadd.f32 %v707_v36, %v681_v32  ;;  %v2796_v41 = vadd.f32 %v705_v37, %v680_v34 }
  0xc9   : > { %1006 = vperm.xlu1 %2371, %v2796_v41   ;;  %1011 = vperm.xlu0 %2372, %v2794_v40   ;;  %2386 = vrsqrt.f32 %v2794_v40  ;;  %vm817_vm12 = vcmp.eq.f32.partialorder %v2794_v40, inf  ;;  %vm810_vm13 = vcmp.eq.f32.partialorder %v2796_v41, inf  ;;  %v813_v55 = vand.u32 2147483648, %v2796_v41 }
  0xca   : > { %v711_v44 = vpop.permute.xlu1 %710  ;;  %v709_v45 = vpop.permute.xlu0 %708  ;;  %2388 = vrsqrt.f32 %v2796_v41  ;;  %vm819_vm14 = vcmp.eq.f32.partialorder %v2794_v40, 0.0  ;;  %vm812_vm15 = vcmp.eq.f32.partialorder %v2796_v41, 0.0 }
  0xcb   : > { %v2814_v50 = vadd.f32 %v711_v44, %v683_v48  ;;  %v2816_v53 = vadd.f32 %v709_v45, %v682_v38  ;;  %2390 = vrsqrt.f32 %v2804_v46 }
  0xcc   : > { %2392 = vrsqrt.f32 %v2806_v47 }
  0xcd   : > { %996 = vperm.xlu1 %2371, %v2806_v47   ;;  %1001 = vperm.xlu0 %2372, %v2804_v46   ;;  %2394 = vrsqrt.f32 %v2814_v50  ;;  %vm824_vm5 = vcmp.eq.f32.partialorder %v2816_v53, inf  ;;  %v827_v13 = vand.u32 2147483648, %v2816_v53  ;;  %vm826_vm7 = vcmp.eq.f32.partialorder %v2816_v53, 0.0 }
  0xce   : > { %v651_v39 = vpop.permute.xlu1 %650  ;;  %v649_v49 = vpop.permute.xlu0 %648  ;;  %2396 = vrsqrt.f32 %v2816_v53 }
  0xcf   : > { %v685_v61 = vadd.f32 %v651_v39, %v2736_v58  ;;  %v684_v0 = vadd.f32 %v649_v49, %v2742_v59  ;;  %v774_v58 = vmul.f32 %v2379_v60, %v2778_v17  ;;  %v2383_v59 = vpop.eup %2382 }
  0xd0   : > { %v2385_v15 = vpop.eup %2384 }
  0xd1   : > { %1016 = vperm.xlu1 %2371, %v2816_v53   ;;  %1021 = vperm.xlu0 %2372, %v2814_v50   ;;  %v776_v25 = vsel %vm775_vm4, %v2778_v17, %v774_v58  ;;  %vm831_vm4 = vcmp.eq.f32.partialorder %v2814_v50, inf }
  0xd2   : > { %v655_v51 = vpop.permute.xlu1 %654  ;;  %v653_v52 = vpop.permute.xlu0 %652  ;;  %v779_v33 = vsel %vm777_vm6, %v778_v30, %v776_v25  ;;  %vm833_vm6 = vcmp.eq.f32.partialorder %v2814_v50, 0.0 }
  0xd3   : > { %v687_v18 = vadd.f32 %v655_v51, %v2750_v62  ;;  %v686_v21 = vadd.f32 %v653_v52, %v2752_v63  ;;  %v788_v62 = vmul.f32 %v2383_v59, %v2784_v26  ;;  %v781_v63 = vmul.f32 %v2385_v15, %v2786_v27 }
  0xd5   : > { %v790_v32 = vsel %vm789_vm8, %v2784_v26, %v788_v62  ;;  %v783_v36 = vsel %vm782_vm9, %v2786_v27, %v781_v63  ;;  %v820_v27 = vand.u32 2147483648, %v2794_v40  ;;  %v472_v63 = vld [vmem:[%s3447_s12 + $0x10] sm:$0xff] }
  0xd6   : > { %v715_v2 = vpop.permute.xlu1 %714  ;;  %v713_v4 = vpop.permute.xlu0 %712  ;;  %v793_v44 = vsel %vm791_vm10, %v792_v42, %v790_v32  ;;  %v786_v45 = vsel %vm784_vm11, %v785_v43, %v783_v36 }
  0xd7   : > { %v2828_v5 = vadd.f32 %v715_v2, %v685_v61  ;;  %v2830_v6 = vadd.f32 %v713_v4, %v684_v0  ;;  %v2387_v28 = vpop.eup %2386 }
  0xd8   : > { %v2389_v29 = vpop.eup %2388  ;;  %v816_v37 = vmul.f32 %v2387_v28, %v2794_v40 }
  0xd9   : > { %1031 = vperm.xlu0 %2372, %v2828_v5   ;;  %1026 = vperm.xlu1 %2371, %v2830_v6   ;;  %2398 = vrsqrt.f32 %v2828_v5  ;;  %v2391_v34 = vpop.eup %2390  ;;  %v809_v17 = vmul.f32 %v2389_v29, %v2796_v41  ;;  %vm845_vm8 = vcmp.eq.f32.partialorder %v2828_v5, inf  ;;  %vm838_vm9 = vcmp.eq.f32.partialorder %v2830_v6, inf  ;;  %v473_v29 = vld [vmem:[%s3447_s12 + $0x18] sm:$0xff] }
  0xda   : > { %v719_v19 = vpop.permute.xlu1 %718  ;;  %v717_v20 = vpop.permute.xlu0 %716  ;;  %2400 = vrsqrt.f32 %v2830_v6  ;;  %v802_v48 = vmul.f32 %v2391_v34, %v2804_v46  ;;  %v818_v39 = vsel %vm817_vm12, %v2794_v40, %v816_v37  ;;  %vm847_vm10 = vcmp.eq.f32.partialorder %v2828_v5, 0.0 }
  0xdb   : > { %v2850_v24 = vadd.f32 %v719_v19, %v687_v18  ;;  %v2855_v11 = vadd.f32 %v717_v20, %v686_v21  ;;  %v2393_v16 = vpop.eup %2392  ;;  %v811_v49 = vsel %vm810_vm13, %v2796_v41, %v809_v17  ;;  %v821_v51 = vsel %vm819_vm14, %v820_v27, %v818_v39 }
  0xdc   : > { %v2395_v38 = vpop.eup %2394  ;;  %v795_v54 = vmul.f32 %v2393_v16, %v2806_v47  ;;  %v814_v52 = vsel %vm812_vm15, %v813_v55, %v811_v49  ;;  %v804_v56 = vsel %vm803_vm0, %v2804_v46, %v802_v48  ;;  %v806_v41 = vand.u32 2147483648, %v2804_v46 }
  0xdd   : > { %866 = vperm.xlu0 %2372, %v758_v22   ;;  %871 = vperm.xlu1 %2371, %v765_v23   ;;  %2402 = vrsqrt.f32 %v2850_v24  ;;  %v2397_v26 = vpop.eup %2396  ;;  %v830_v61 = vmul.f32 %v2395_v38, %v2814_v50  ;;  %vm840_vm11 = vcmp.eq.f32.partialorder %v2830_v6, 0.0  ;;  %vm859_vm12 = vcmp.eq.f32.partialorder %v2850_v24, inf  ;;  %v467_v38 = vld [vmem:[%s3445_s10] sm:$0x3] }
  0xde   : > { %2404 = vrsqrt.f32 %v2855_v11  ;;  %v797_v60 = vsel %vm796_vm1, %v2806_v47, %v795_v54  ;;  %v823_v0 = vmul.f32 %v2397_v26, %v2816_v53  ;;  %v807_v2 = vsel %vm805_vm2, %v806_v41, %v804_v56 }
  0xdf   : > { %v800_v4 = vsel %vm798_vm3, %v799_v1, %v797_v60  ;;  %v832_v58 = vsel %vm831_vm4, %v2814_v50, %v830_v61  ;;  %v834_v47 = vand.u32 2147483648, %v2814_v50  ;;  %v848_v50 = vand.u32 2147483648, %v2828_v5 }
  0xe0   : > { %v825_v59 = vsel %vm824_vm5, %v2816_v53, %v823_v0  ;;  %v841_v53 = vand.u32 2147483648, %v2830_v6  ;;  %vm852_vm13 = vcmp.eq.f32.partialorder %v2855_v11, inf  ;;  %v862_v28 = vand.u32 2147483648, %v2850_v24 }
  0xe1   : > { %881 = vperm.xlu0 %2372, %v779_v33   ;;  %876 = vperm.xlu1 %2371, %v772_v35   ;;  %v835_v14 = vsel %vm833_vm6, %v834_v47, %v832_v58  ;;  %v828_v15 = vsel %vm826_vm7, %v827_v13, %v825_v59  ;;  %v855_v7 = vand.u32 2147483648, %v2855_v11  ;;  %vm861_vm14 = vcmp.eq.f32.partialorder %v2850_v24, 0.0  ;;  %v471_v33 = vld [vmem:[%s3447_s12 + $0x8] sm:$0xff] }
  0xe2   : > { %vm854_vm15 = vcmp.eq.f32.partialorder %v2855_v11, 0.0  ;;  %v475_v30 = vpack.c.bf16 %v473_v29, %v472_v63  ;;  %v474_v35 = vpack.c.bf16 %v471_v33, %v470_v31  ;;  %v1046_v48 = vsub.s32 1, %v2625_v3 }
  0xe3   : > { %v2951_v54 = vrot.slane %v467_v38, %v2634_v8  ;;  %vm1260_vm0 = vcmask 261120   ;;  %vm1775_vm1 = vcmask 1041409   ;;  %vm1778_vm2 = vcmask 1042434  }
  0xe4   : > { %2258 = vmatprep.subr.bf16.mxu0 %v475_v30  ;;  %v2953_v26 = vrot.slane %v467_v38, %v1046_v48  ;;  %vm1781_vm3 = vcmask 1043459   ;;  %vm1784_vm4 = vcmask 1044484   ;;  %vm1787_vm5 = vcmask 1045509  }
  0xe5   : > { %891 = vperm.xlu0 %2372, %v793_v44   ;;  %886 = vperm.xlu1 %2371, %v786_v45   ;;  %vm1790_vm6 = vcmask 1046534   ;;  %vm1793_vm7 = vcmask 1047559  }
  0xe6   : > { %v2399_v57 = vpop.eup %2398  ;;  %2259 = vmatpush3.bf16.msra.mxu0 %v475_v30 }
  0xe7   : > { %v2401_v40 = vpop.eup %2400  ;;  %v844_v9 = vmul.f32 %v2399_v57, %v2828_v5  ;;  %2260 = vmatprep.subr.bf16.mxu0 %v474_v35  ;;  %v2962_v57 = vld [vmem:[%s3446_s11] ss:$0 sm:$0xff] }
  0xe8   : > { %v837_v12 = vmul.f32 %v2401_v40, %v2830_v6 }
  0xe9   : > { %911 = vperm.xlu0 %2372, %v821_v51   ;;  %906 = vperm.xlu1 %2371, %v814_v52   ;;  %v846_v18 = vsel %vm845_vm8, %v2828_v5, %v844_v9  ;;  %vm2520_vm8 = vmmov 0  }
  0xea   : > { %v2403_v10 = vpop.eup %2402  ;;  %v839_v19 = vsel %vm838_vm9, %v2830_v6, %v837_v12  ;;  %v849_v22 = vsel %vm847_vm10, %v848_v50, %v846_v18  ;;  %2261 = vmatpush3.bf16.msra.mxu0 %v474_v35 }
  0xeb   : > { %v2405_v46 = vpop.eup %2404  ;;  %v858_v20 = vmul.f32 %v2403_v10, %v2850_v24  ;;  %v842_v23 = vsel %vm840_vm11, %v841_v53, %v839_v19 }
  0xec   : > { %v851_v21 = vmul.f32 %v2405_v46, %v2855_v11 }
  0xed   : > { %901 = vperm.xlu0 %2372, %v807_v2   ;;  %896 = vperm.xlu1 %2371, %v800_v4   ;;  %v860_v25 = vsel %vm859_vm12, %v2850_v24, %v858_v20 }
  0xee   : > { %v853_v62 = vsel %vm852_vm13, %v2855_v11, %v851_v21  ;;  %v863_v5 = vsel %vm861_vm14, %v862_v28, %v860_v25 }
  0xef   : > { %v856_v6 = vsel %vm854_vm15, %v855_v7, %v853_v62 }
  0xf1   : > { %921 = vperm.xlu0 %2372, %v835_v14   ;;  %916 = vperm.xlu1 %2371, %v828_v15  }
  0xf5   : > { %931 = vperm.xlu0 %2372, %v849_v22   ;;  %926 = vperm.xlu1 %2371, %v842_v23  }
  0xf9   : > { %941 = vperm.xlu0 %2372, %v863_v5   ;;  %936 = vperm.xlu1 %2371, %v856_v6  }
  0xfd   : > { %1041 = vperm.xlu0 %2372, %v2850_v24   ;;  %1036 = vperm.xlu1 %2371, %v2855_v11  }
 0x122   : > { %v972_v34 = vpop.permute.xlu0 %971 }
 0x123   : > { %v1049_v51 = vmul.f32 %v2953_v26, %v972_v34 }
 0x124   : > { %v967_v32 = vpop.permute.xlu1 %966 }
 0x125   : > { %v1048_v52 = vmul.f32 %v2953_v26, %v967_v32 }
 0x128   : > { %v977_v36 = vpop.permute.xlu1 %976  ;;  %v982_v37 = vpop.permute.xlu0 %981 }
 0x129   : > { %v1050_v61 = vmul.f32 %v2953_v26, %v977_v36  ;;  %v1051_v0 = vmul.f32 %v2953_v26, %v982_v37 }
 0x134   : > { %v987_v17 = vpop.permute.xlu1 %986  ;;  %v992_v24 = vpop.permute.xlu0 %991 }
 0x135   : > { %v1052_v59 = vmul.f32 %v2953_v26, %v987_v17  ;;  %v1053_v12 = vmul.f32 %v2953_v26, %v992_v24 }
 0x144   : > { %v1007_v16 = vpop.permute.xlu1 %1006  ;;  %v1012_v11 = vpop.permute.xlu0 %1011 }
 0x145   : > { %v1056_v21 = vmul.f32 %v2953_v26, %v1007_v16  ;;  %v1057_v50 = vmul.f32 %v2953_v26, %v1012_v11 }
 0x148   : > { %v997_v42 = vpop.permute.xlu1 %996  ;;  %v1002_v43 = vpop.permute.xlu0 %1001 }
 0x149   : > { %v1054_v7 = vmul.f32 %v2953_v26, %v997_v42  ;;  %v1055_v5 = vmul.f32 %v2953_v26, %v1002_v43 }
 0x14c   : > { %v2938_v44 = vpop.permute.xlu1 %1016  ;;  %v2940_v45 = vpop.permute.xlu0 %1021 }
 0x154   : > { %v2946_v39 = vpop.permute.xlu1 %1026  ;;  %v2948_v49 = vpop.permute.xlu0 %1031 }
 0x158   : > { %v872_v27 = vpop.permute.xlu1 %871  ;;  %v867_v55 = vpop.permute.xlu0 %866 }
 0x159   : > { %v949_v3 = vmul.f32 %v2951_v54, %v872_v27  ;;  %v948_v56 = vmul.f32 %v2951_v54, %v867_v55 }
 0x15b   : > { %v1065_v60 = vadd.f32 %v1049_v51, %v949_v3  ;;  %v1064_v8 = vadd.f32 %v1048_v52, %v948_v56  ;;  %v1058_v52 = vmul.f32 %v2953_v26, %v2938_v44  ;;  %v1059_v3 = vmul.f32 %v2953_v26, %v2940_v45 }
 0x15c   : > { %v877_v40 = vpop.permute.xlu1 %876  ;;  %v882_v41 = vpop.permute.xlu0 %881 }
 0x15d   : > { %v2967_v1 = vadd.f32 %v2962_v57, %v1065_v60  ;;  %v2970_v2 = vadd.f32 %v2962_v57, %v1064_v8  ;;  %v950_v4 = vmul.f32 %v2951_v54, %v877_v40  ;;  %v951_v9 = vmul.f32 %v2951_v54, %v882_v41 }
 0x15e   : > { %v1060_v8 = vmul.f32 %v2953_v26, %v2946_v39 }
 0x15f   : > { %v1066_v10 = vadd.f32 %v1050_v61, %v950_v4  ;;  %v1067_v58 = vadd.f32 %v1051_v0, %v951_v9  ;;  %v1118_v13 = vmul.f32 0.044715, %v2970_v2  ;;  %v1119_v14 = vmul.f32 0.044715, %v2967_v1 }
 0x160   : > { %v887_v46 = vpop.permute.xlu1 %886  ;;  %v892_v47 = vpop.permute.xlu0 %891 }
 0x161   : > { %v2979_v15 = vadd.f32 %v2962_v57, %v1066_v10  ;;  %v2982_v18 = vadd.f32 %v2962_v57, %v1067_v58  ;;  %v952_v19 = vmul.f32 %v2951_v54, %v887_v46  ;;  %v953_v20 = vmul.f32 %v2951_v54, %v892_v47 }
 0x162   : > { %v1134_v53 = vmul.f32 %v1118_v13, %v2970_v2  ;;  %v1135_v22 = vmul.f32 %v1119_v14, %v2967_v1  ;;  %v1061_v13 = vmul.f32 %v2953_v26, %v2948_v49  ;;  %v1102_v14 = vmul.f32 0.5, %v2970_v2 }
 0x163   : > { %v1120_v23 = vmul.f32 0.044715, %v2979_v15  ;;  %v1121_v25 = vmul.f32 0.044715, %v2982_v18  ;;  %v1068_v62 = vadd.f32 %v1052_v59, %v952_v19  ;;  %v1069_v28 = vadd.f32 %v1053_v12, %v953_v20 }
 0x164   : > { %v907_v6 = vpop.permute.xlu1 %906  ;;  %v912_v63 = vpop.permute.xlu0 %911  ;;  %v1150_v29 = vmul.f32 %v1134_v53, %v2970_v2  ;;  %v1151_v30 = vmul.f32 %v1135_v22, %v2967_v1 }
 0x165   : > { %v1136_v31 = vmul.f32 %v1120_v23, %v2979_v15  ;;  %v1137_v33 = vmul.f32 %v1121_v25, %v2982_v18  ;;  %v2999_v35 = vadd.f32 %v2962_v57, %v1068_v62  ;;  %v3002_v32 = vadd.f32 %v2962_v57, %v1069_v28 }
 0x166   : > { %v956_v34 = vmul.f32 %v2951_v54, %v907_v6  ;;  %v957_v36 = vmul.f32 %v2951_v54, %v912_v63  ;;  %v1166_v37 = vadd.f32 %v1150_v29, %v2970_v2  ;;  %v1167_v17 = vadd.f32 %v1151_v30, %v2967_v1 }
 0x167   : > { %v1152_v24 = vmul.f32 %v1136_v31, %v2979_v15  ;;  %v1153_v16 = vmul.f32 %v1137_v33, %v2982_v18  ;;  %v1122_v11 = vmul.f32 0.044715, %v2999_v35  ;;  %v1123_v42 = vmul.f32 0.044715, %v3002_v32 }
 0x168   : > { %v1072_v43 = vadd.f32 %v1056_v21, %v956_v34  ;;  %v1073_v48 = vadd.f32 %v1057_v50, %v957_v36  ;;  %v897_v38 = vpop.permute.xlu1 %896  ;;  %v902_v27 = vpop.permute.xlu0 %901  ;;  %v1182_v55 = vmul.f32 0.7978846, %v1166_v37  ;;  %v1183_v51 = vmul.f32 0.7978846, %v1167_v17 }
 0x169   : > { %v954_v56 = vmul.f32 %v2951_v54, %v897_v38  ;;  %v955_v60 = vmul.f32 %v2951_v54, %v902_v27  ;;  %v1168_v0 = vadd.f32 %v1152_v24, %v2979_v15  ;;  %v1138_v40 = vmul.f32 %v1122_v11, %v2999_v35 }
 0x16a   : > { %v3021_v61 = vadd.f32 %v2962_v57, %v1072_v43  ;;  %2406 = vtanh.f32 %v1182_v55  ;;  %v1139_v44 = vmul.f32 %v1123_v42, %v3002_v32  ;;  %v3028_v9 = vadd.f32 %v2962_v57, %v1073_v48 }
 0x16b   : > { %v1070_v41 = vadd.f32 %v1054_v7, %v954_v56  ;;  %v1071_v4 = vadd.f32 %v1055_v5, %v955_v60  ;;  %2408 = vtanh.f32 %v1183_v51  ;;  %v1169_v39 = vadd.f32 %v1153_v16, %v2982_v18 }
 0x16c   : > { %v1126_v45 = vmul.f32 0.044715, %v3021_v61  ;;  %v917_v10 = vpop.permute.xlu1 %916  ;;  %v922_v58 = vpop.permute.xlu0 %921  ;;  %v1184_v19 = vmul.f32 0.7978846, %v1168_v0  ;;  %v1154_v23 = vmul.f32 %v1138_v40, %v2999_v35  ;;  %v1155_v25 = vmul.f32 %v1139_v44, %v3002_v32 }
 0x16d   : > { %v3032_v59 = vadd.f32 %v2962_v57, %v1070_v41  ;;  %v3035_v12 = vadd.f32 %v2962_v57, %v1071_v4  ;;  %v958_v46 = vmul.f32 %v2951_v54, %v917_v10  ;;  %v959_v47 = vmul.f32 %v2951_v54, %v922_v58 }
 0x16e   : > { %v1185_v20 = vmul.f32 0.7978846, %v1169_v39  ;;  %v1127_v62 = vmul.f32 0.044715, %v3028_v9  ;;  %2410 = vtanh.f32 %v1184_v19  ;;  %v1142_v49 = vmul.f32 %v1126_v45, %v3021_v61 }
 0x16f   : > { %v1124_v21 = vmul.f32 0.044715, %v3032_v59  ;;  %v1125_v50 = vmul.f32 0.044715, %v3035_v12  ;;  %v1074_v53 = vadd.f32 %v1058_v52, %v958_v46  ;;  %v1075_v22 = vadd.f32 %v1059_v3, %v959_v47 }
 0x170   : > { %v927_v28 = vpop.permute.xlu1 %926  ;;  %v932_v7 = vpop.permute.xlu0 %931  ;;  %v1103_v30 = vmul.f32 0.5, %v2967_v1  ;;  %2412 = vtanh.f32 %v1185_v20  ;;  %v1104_v34 = vmul.f32 0.5, %v2979_v15  ;;  %v3062_v36 = vmul.f32 0.5, %v2982_v18 }
 0x171   : > { %v1140_v2 = vmul.f32 %v1124_v21, %v3032_v59  ;;  %v3050_v5 = vadd.f32 %v2962_v57, %v1074_v53  ;;  %v3053_v6 = vadd.f32 %v2962_v57, %v1075_v22  ;;  %v960_v63 = vmul.f32 %v2951_v54, %v927_v28 }
 0x172   : > { %v961_v29 = vmul.f32 %v2951_v54, %v932_v7  ;;  %v1141_v31 = vmul.f32 %v1125_v50, %v3035_v12  ;;  %v1170_v11 = vadd.f32 %v1154_v23, %v2999_v35  ;;  %v1171_v42 = vadd.f32 %v1155_v25, %v3002_v32 }
 0x173   : > { %v1128_v33 = vmul.f32 0.044715, %v3050_v5  ;;  %v1076_v37 = vadd.f32 %v1060_v8, %v960_v63  ;;  %v1158_v1 = vmul.f32 %v1142_v49, %v3021_v61  ;;  %v1143_v43 = vmul.f32 %v1127_v62, %v3028_v9 }
 0x174   : > { %v1077_v17 = vadd.f32 %v1061_v13, %v961_v29  ;;  %v937_v24 = vpop.permute.xlu1 %936  ;;  %v942_v16 = vpop.permute.xlu0 %941  ;;  %v1156_v48 = vmul.f32 %v1140_v2, %v3032_v59  ;;  %v1129_v38 = vmul.f32 0.044715, %v3053_v6  ;;  %v1186_v27 = vmul.f32 0.7978846, %v1170_v11 }
 0x175   : > { %v3071_v15 = vadd.f32 %v2962_v57, %v1076_v37  ;;  %v1187_v55 = vmul.f32 0.7978846, %v1171_v42  ;;  %v1157_v52 = vmul.f32 %v1141_v31, %v3035_v12  ;;  %v1144_v3 = vmul.f32 %v1128_v33, %v3050_v5 }
 0x176   : > { %v3074_v18 = vadd.f32 %v2962_v57, %v1077_v17  ;;  %v962_v56 = vmul.f32 %v2951_v54, %v937_v24  ;;  %v963_v60 = vmul.f32 %v2951_v54, %v942_v16  ;;  %2414 = vtanh.f32 %v1186_v27 }
 0x177   : > { %v2407_v51 = vpop.eup %2406  ;;  %v1130_v8 = vmul.f32 0.044715, %v3071_v15  ;;  %2416 = vtanh.f32 %v1187_v55  ;;  %v1172_v58 = vadd.f32 %v1156_v48, %v3032_v59  ;;  %v1159_v39 = vmul.f32 %v1143_v43, %v3028_v9 }
 0x178   : > { %v1131_v0 = vmul.f32 0.044715, %v3074_v18  ;;  %v1037_v40 = vpop.permute.xlu1 %1036  ;;  %v1042_v44 = vpop.permute.xlu0 %1041  ;;  %v1214_v41 = vadd.f32 1.0, %v2407_v51  ;;  %v1145_v54 = vmul.f32 %v1129_v38, %v3053_v6  ;;  %v1173_v20 = vadd.f32 %v1157_v52, %v3035_v12 }
 0x179   : > { %v2409_v4 = vpop.eup %2408  ;;  %v1062_v45 = vmul.f32 %v2953_v26, %v1037_v40  ;;  %v1063_v10 = vmul.f32 %v2953_v26, %v1042_v44  ;;  %v1188_v21 = vmul.f32 0.7978846, %v1172_v58  ;;  %v1160_v50 = vmul.f32 %v1144_v3, %v3050_v5 }
 0x17a   : > { %v1215_v46 = vadd.f32 1.0, %v2409_v4  ;;  %v1230_v47 = vmul.f32 %v1214_v41, %v1102_v14  ;;  %v1146_v53 = vmul.f32 %v1130_v8, %v3071_v15  ;;  %v1147_v26 = vmul.f32 %v1131_v0, %v3074_v18 }
 0x17b   : > { %v1078_v13 = vadd.f32 %v1062_v45, %v962_v56  ;;  %v1079_v19 = vadd.f32 %v1063_v10, %v963_v60  ;;  %v2411_v23 = vpop.eup %2410  ;;  %v1189_v14 = vmul.f32 0.7978846, %v1173_v20  ;;  %2418 = vtanh.f32 %v1188_v21 }
 0x17c   : > { %v1231_v22 = vmul.f32 %v1215_v46, %v1103_v30  ;;  %v1161_v28 = vmul.f32 %v1145_v54, %v3053_v6  ;;  %v1216_v49 = vadd.f32 1.0, %v2411_v23  ;;  %v1174_v2 = vadd.f32 %v1158_v1, %v3021_v61 }
 0x17d   : > { %v3092_v25 = vadd.f32 %v2962_v57, %v1078_v13  ;;  %v3095_v62 = vadd.f32 %v2962_v57, %v1079_v19  ;;  %v2413_v63 = vpop.eup %2412  ;;  %2420 = vtanh.f32 %v1189_v14  ;;  %v1175_v31 = vadd.f32 %v1159_v39, %v3028_v9 }
 0x17e   : > { %v1246_v7 = vpack.c.bf16 %v1231_v22, %v1230_v47  ;;  %v1162_v33 = vmul.f32 %v1146_v53, %v3071_v15  ;;  %v1217_v57 = vadd.f32 1.0, %v2413_v63  ;;  %v1232_v37 = vmul.f32 %v1216_v49, %v1104_v34 }
 0x17f   : > { %v1132_v29 = vmul.f32 0.044715, %v3092_v25  ;;  %v1133_v30 = vmul.f32 0.044715, %v3095_v62  ;;  %v1190_v17 = vmul.f32 0.7978846, %v1174_v2  ;;  %v1163_v24 = vmul.f32 %v1147_v26, %v3074_v18 }
 0x180   : > { %2262 = vmatprep.mubr.msk.bf16.mxu0 %vm1260_vm0, %v1246_v7  ;;  %v1191_v42 = vmul.f32 0.7978846, %v1175_v31  ;;  %v1233_v1 = vmul.f32 %v1217_v57, %v3062_v36  ;;  %v1176_v43 = vadd.f32 %v1160_v50, %v3050_v5  ;;  %v1177_v48 = vadd.f32 %v1161_v28, %v3053_v6 }
 0x181   : > { %v1148_v16 = vmul.f32 %v1132_v29, %v3092_v25  ;;  %v1149_v11 = vmul.f32 %v1133_v30, %v3095_v62  ;;  %2422 = vtanh.f32 %v1190_v17  ;;  %v1106_v3 = vmul.f32 0.5, %v2999_v35 }
 0x182   : > { %2424 = vtanh.f32 %v1191_v42  ;;  %v1247_v34 = vpack.c.bf16 %v1233_v1, %v1232_v37  ;;  %v1192_v55 = vmul.f32 0.7978846, %v1176_v43  ;;  %v1193_v51 = vmul.f32 0.7978846, %v1177_v48 }
 0x183   : > { %v1164_v38 = vmul.f32 %v1148_v16, %v3092_v25  ;;  %v1165_v27 = vmul.f32 %v1149_v11, %v3095_v62  ;;  %v2415_v52 = vpop.eup %2414  ;;  %v1107_v56 = vmul.f32 0.5, %v3002_v32  ;;  %v1178_v36 = vadd.f32 %v1162_v33, %v3071_v15 }
 0x184   : > { %v1179_v60 = vadd.f32 %v1163_v24, %v3074_v18  ;;  %v2417_v8 = vpop.eup %2416  ;;  %2263 = vmatmul.mubr.msk.bf16.vlgmr.msra.gmra.mxu0 %vm1260_vm0, %v1247_v34  ;;  %v1218_v0 = vadd.f32 1.0, %v2415_v52  ;;  %2426 = vtanh.f32 %v1192_v55  ;;  %v1108_v46 = vmul.f32 0.5, %v3032_v59 }
 0x185   : > { %v1180_v40 = vadd.f32 %v1164_v38, %v3092_v25  ;;  %v1181_v44 = vadd.f32 %v1165_v27, %v3095_v62  ;;  %v1219_v41 = vadd.f32 1.0, %v2417_v8  ;;  %2428 = vtanh.f32 %v1193_v51 }
 0x186   : > { %v1194_v4 = vmul.f32 0.7978846, %v1178_v36  ;;  %v1195_v45 = vmul.f32 0.7978846, %v1179_v60  ;;  %v1234_v35 = vmul.f32 %v1218_v0, %v1106_v3  ;;  %v1109_v19 = vmul.f32 0.5, %v3035_v12  ;;  %v476_v3 = vld [vmem:[%s3437_s2] sm:$0xff] }
 0x187   : > { %v1196_v10 = vmul.f32 0.7978846, %v1180_v40  ;;  %v1197_v32 = vmul.f32 0.7978846, %v1181_v44  ;;  %v1235_v58 = vmul.f32 %v1219_v41, %v1107_v56  ;;  %v1110_v22 = vmul.f32 0.5, %v3021_v61  ;;  %v477_v56 = vld [vmem:[%s3437_s2 + $0x8] sm:$0xff] }
 0x188   : > { %2430 = vtanh.f32 %v1194_v4  ;;  %v2419_v39 = vpop.eup %2418  ;;  %v1111_v28 = vmul.f32 0.5, %v3028_v9  ;;  %v1112_v12 = vmul.f32 0.5, %v3050_v5  ;;  %v1113_v31 = vmul.f32 0.5, %v3053_v6  ;;  %v3150_v60 = vld [vmem:[%s3448_s13] ss:$0 sm:$0xff] }
 0x189   : > { %2432 = vtanh.f32 %v1195_v45  ;;  %v1248_v54 = vpack.c.bf16 %v1235_v58, %v1234_v35  ;;  %v1220_v47 = vadd.f32 1.0, %v2419_v39  ;;  %v1114_v17 = vmul.f32 0.5, %v3071_v15 }
 0x18a   : > { %2434 = vtanh.f32 %v1196_v10  ;;  %v2421_v13 = vpop.eup %2420  ;;  %v1115_v11 = vmul.f32 0.5, %v3074_v18  ;;  %v1116_v48 = vmul.f32 0.5, %v3092_v25  ;;  %v1117_v27 = vmul.f32 0.5, %v3095_v62  ;;  %v478_v18 = vld [vmem:[%s3437_s2 + $0x10] sm:$0xff]  ;;  %v479_v25 = vld [vmem:[%s3437_s2 + $0x18] sm:$0xff] }
 0x18b   : > { %2436 = vtanh.f32 %v1197_v32  ;;  %2266 = vmatprep.mubr.msk.bf16.mxu0 %vm1260_vm0, %v1248_v54  ;;  %v1221_v20 = vadd.f32 1.0, %v2421_v13  ;;  %v1236_v21 = vmul.f32 %v1220_v47, %v1108_v46  ;;  %v481_v62 = vpack.c.bf16 %v479_v25, %v478_v18 }
 0x18c   : > { %v480_v36 = vpack.c.bf16 %v477_v56, %v476_v3 }
 0x18d   : > { %v1237_v53 = vmul.f32 %v1221_v20, %v1109_v19  ;;  %2278 = vmatprep.subr.bf16.mxu1 %v481_v62 }
 0x18e   : > { %v2423_v50 = vpop.eup %2422  ;;  %2279 = vmatpush3.bf16.msra.mxu1 %v481_v62 }
 0x18f   : > { %v2425_v26 = vpop.eup %2424  ;;  %v1222_v23 = vadd.f32 1.0, %v2423_v50  ;;  %v1249_v14 = vpack.c.bf16 %v1237_v53, %v1236_v21  ;;  %2280 = vmatprep.subr.bf16.mxu1 %v480_v36 }
 0x190   : > { %v1223_v59 = vadd.f32 1.0, %v2425_v26 }
 0x191   : > { %v1238_v7 = vmul.f32 %v1222_v23, %v1110_v22  ;;  %v2427_v49 = vpop.eup %2426  ;;  %2267 = vmatmul.mubr.msk.bf16.gmra.mxu0 %vm1260_vm0, %v1249_v14 }
 0x192   : > { %v1239_v2 = vmul.f32 %v1223_v59, %v1111_v28  ;;  %v2429_v63 = vpop.eup %2428  ;;  %v1224_v29 = vadd.f32 1.0, %v2427_v49  ;;  %2281 = vmatpush3.bf16.msra.mxu1 %v480_v36 }
 0x193   : > { %v1225_v33 = vadd.f32 1.0, %v2429_v63 }
 0x194   : > { %v1250_v30 = vpack.c.bf16 %v1239_v2, %v1238_v7  ;;  %v1240_v61 = vmul.f32 %v1224_v29, %v1112_v12 }
 0x195   : > { %v2431_v57 = vpop.eup %2430  ;;  %v1241_v9 = vmul.f32 %v1225_v33, %v1113_v31 }
 0x196   : > { %v2433_v37 = vpop.eup %2432  ;;  %2270 = vmatprep.mubr.msk.bf16.mxu0 %vm1260_vm0, %v1250_v30  ;;  %v1226_v24 = vadd.f32 1.0, %v2431_v57 }
 0x197   : > { %v2435_v16 = vpop.eup %2434  ;;  %v1227_v42 = vadd.f32 1.0, %v2433_v37  ;;  %v1251_v5 = vpack.c.bf16 %v1241_v9, %v1240_v61 }
 0x198   : > { %v2437_v1 = vpop.eup %2436  ;;  %v1242_v43 = vmul.f32 %v1226_v24, %v1114_v17  ;;  %v1228_v6 = vadd.f32 1.0, %v2435_v16 }
 0x199   : > { %v1243_v38 = vmul.f32 %v1227_v42, %v1115_v11  ;;  %v1229_v34 = vadd.f32 1.0, %v2437_v1  ;;  %2271 = vmatmul.mubr.msk.bf16.gmra.mxu0 %vm1260_vm0, %v1251_v5 }
 0x19a   : > { %v1244_v55 = vmul.f32 %v1228_v6, %v1116_v48 }
 0x19b   : > { %v1252_v51 = vpack.c.bf16 %v1243_v38, %v1242_v43  ;;  %v1245_v15 = vmul.f32 %v1229_v34, %v1117_v27 }
 0x19d   : > { %2274 = vmatprep.mubr.msk.bf16.mxu0 %vm1260_vm0, %v1252_v51  ;;  %v1253_v52 = vpack.c.bf16 %v1245_v15, %v1244_v55 }
 0x1a1   : > { %2275 = vmatmul.mubr.msk.bf16.gmra.mxu0 %vm1260_vm0, %v1253_v52 }
 0x244   : > { %v2264_v8 = vpop.f32.mrf.mxu0 }
 0x245   : > { %v1328_v0 = vadd.f32 %v2264_v8, %v3150_v60 }
 0x246   : > { %v1319_v40 = vpop.f32.mrf.mxu0 }
 0x247   : > { %v1400_v44 = vmul.f32 0.044715, %v1328_v0  ;;  %v1320_v41 = vadd.f32 %v3150_v60, %v1319_v40  ;;  %v3181_v6 = vmul.f32 0.5, %v1328_v0 }
 0x248   : > { %v2265_v4 = vpop.f32.mrf.mxu0 }
 0x249   : > { %v1416_v45 = vmul.f32 %v1400_v44, %v1328_v0  ;;  %v1398_v35 = vmul.f32 0.044715, %v1320_v41  ;;  %v1331_v10 = vadd.f32 %v2265_v4, %v3150_v60  ;;  %v1382_v18 = vmul.f32 0.5, %v1320_v41 }
 0x24a   : > { %v1322_v32 = vpop.f32.mrf.mxu0 }
 0x24b   : > { %v1432_v58 = vmul.f32 %v1416_v45, %v1328_v0  ;;  %v1414_v39 = vmul.f32 %v1398_v35, %v1320_v41  ;;  %v1401_v54 = vmul.f32 0.044715, %v1331_v10  ;;  %v1323_v46 = vadd.f32 %v3150_v60, %v1322_v32 }
 0x24c   : > { %v3190_v25 = vmul.f32 0.5, %v1331_v10 }
 0x24d   : > { %v1448_v47 = vadd.f32 %v1432_v58, %v1328_v0  ;;  %v1417_v13 = vmul.f32 %v1401_v54, %v1331_v10  ;;  %v1399_v19 = vmul.f32 0.044715, %v1323_v46  ;;  %v1430_v20 = vmul.f32 %v1414_v39, %v1320_v41 }
 0x24e   : > { %v1383_v8 = vmul.f32 0.5, %v1323_v46 }
 0x24f   : > { %v1464_v21 = vmul.f32 0.7978846, %v1448_v47  ;;  %v1433_v50 = vmul.f32 %v1417_v13, %v1331_v10  ;;  %v1415_v53 = vmul.f32 %v1399_v19, %v1323_v46  ;;  %v1446_v26 = vadd.f32 %v1430_v20, %v1320_v41 }
 0x251   : > { %2438 = vtanh.f32 %v1464_v21  ;;  %v2268_v22 = vpop.f32.mrf.mxu0  ;;  %v1431_v23 = vmul.f32 %v1415_v53, %v1323_v46  ;;  %v1462_v28 = vmul.f32 0.7978846, %v1446_v26  ;;  %v1449_v59 = vadd.f32 %v1433_v50, %v1331_v10 }
 0x252   : > { %v3157_v14 = vadd.f32 %v2268_v22, %v3150_v60 }
 0x253   : > { %v1335_v7 = vpop.f32.mrf.mxu0  ;;  %v1447_v49 = vadd.f32 %v1431_v23, %v1323_v46  ;;  %2440 = vtanh.f32 %v1462_v28  ;;  %v1465_v57 = vmul.f32 0.7978846, %v1449_v59 }
 0x254   : > { %v1404_v2 = vmul.f32 0.044715, %v3157_v14  ;;  %v3161_v63 = vadd.f32 %v3150_v60, %v1335_v7 }
 0x255   : > { %v2269_v12 = vpop.f32.mrf.mxu0  ;;  %v1463_v29 = vmul.f32 0.7978846, %v1447_v49 }
 0x256   : > { %v1420_v30 = vmul.f32 %v1404_v2, %v3157_v14  ;;  %v1402_v31 = vmul.f32 0.044715, %v3161_v63  ;;  %v3166_v33 = vadd.f32 %v2269_v12, %v3150_v60 }
 0x257   : > { %v1338_v61 = vpop.f32.mrf.mxu0  ;;  %2442 = vtanh.f32 %v1463_v29 }
 0x258   : > { %v1436_v37 = vmul.f32 %v1420_v30, %v3157_v14  ;;  %v1418_v9 = vmul.f32 %v1402_v31, %v3161_v63  ;;  %v1405_v17 = vmul.f32 0.044715, %v3166_v33  ;;  %v3172_v24 = vadd.f32 %v3150_v60, %v1338_v61 }
 0x259   : > { %v2272_v16 = vpop.f32.mrf.mxu0  ;;  %2444 = vtanh.f32 %v1465_v57 }
 0x25a   : > { %v1452_v11 = vadd.f32 %v1436_v37, %v3157_v14  ;;  %v1434_v42 = vmul.f32 %v1418_v9, %v3161_v63  ;;  %v1421_v1 = vmul.f32 %v1405_v17, %v3166_v33  ;;  %v1403_v5 = vmul.f32 0.044715, %v3172_v24 }
 0x25b   : > { %v3179_v43 = vadd.f32 %v2272_v16, %v3150_v60  ;;  %v1351_v48 = vpop.f32.mrf.mxu0 }
 0x25c   : > { %v1468_v38 = vmul.f32 0.7978846, %v1452_v11  ;;  %v1450_v27 = vadd.f32 %v1434_v42, %v3161_v63  ;;  %v1437_v34 = vmul.f32 %v1421_v1, %v3166_v33  ;;  %v1419_v55 = vmul.f32 %v1403_v5, %v3172_v24 }
 0x25d   : > { %v1408_v51 = vmul.f32 0.044715, %v3179_v43  ;;  %v3188_v15 = vadd.f32 %v3150_v60, %v1351_v48  ;;  %v2273_v52 = vpop.f32.mrf.mxu0 }
 0x25e   : > { %v2439_v62 = vpop.eup %2438  ;;  %v1466_v3 = vmul.f32 0.7978846, %v1450_v27  ;;  %v1453_v56 = vadd.f32 %v1437_v34, %v3166_v33  ;;  %v1435_v36 = vmul.f32 %v1419_v55, %v3172_v24  ;;  %2446 = vtanh.f32 %v1468_v38 }
 0x25f   : > { %v1424_v0 = vmul.f32 %v1408_v51, %v3179_v43  ;;  %v1406_v40 = vmul.f32 0.044715, %v3188_v15  ;;  %v3197_v44 = vadd.f32 %v2273_v52, %v3150_v60  ;;  %v1354_v4 = vpop.f32.mrf.mxu0  ;;  %v1496_v46 = vadd.f32 1.0, %v2439_v62 }
 0x260   : > { %2448 = vtanh.f32 %v1466_v3  ;;  %v1469_v41 = vmul.f32 0.7978846, %v1453_v56  ;;  %v1451_v45 = vadd.f32 %v1435_v36, %v3172_v24  ;;  %v3201_v35 = vadd.f32 %v3150_v60, %v1354_v4  ;;  %v2441_v10 = vpop.eup %2440 }
 0x261   : > { %v1440_v32 = vmul.f32 %v1424_v0, %v3179_v43  ;;  %v1422_v58 = vmul.f32 %v1406_v40, %v3188_v15  ;;  %v1409_v39 = vmul.f32 0.044715, %v3197_v44  ;;  %v2276_v54 = vpop.f32.mrf.mxu0  ;;  %v1494_v26 = vadd.f32 1.0, %v2441_v10 }
 0x262   : > { %2450 = vtanh.f32 %v1469_v41  ;;  %v1467_v47 = vmul.f32 0.7978846, %v1451_v45  ;;  %v1407_v13 = vmul.f32 0.044715, %v3201_v35  ;;  %v3208_v19 = vadd.f32 %v2276_v54, %v3150_v60 }
 0x263   : > { %v1456_v20 = vadd.f32 %v1440_v32, %v3179_v43  ;;  %v1438_v21 = vmul.f32 %v1422_v58, %v3188_v15  ;;  %v1425_v50 = vmul.f32 %v1409_v39, %v3197_v44  ;;  %v1367_v53 = vpop.f32.mrf.mxu0  ;;  %v1510_v16 = vmul.f32 %v1494_v26, %v1382_v18 }
 0x264   : > { %v2443_v22 = vpop.eup %2442  ;;  %2452 = vtanh.f32 %v1467_v47  ;;  %v1423_v23 = vmul.f32 %v1407_v13, %v3201_v35  ;;  %v1412_v28 = vmul.f32 0.044715, %v3208_v19  ;;  %v3216_v59 = vadd.f32 %v3150_v60, %v1367_v53 }
 0x265   : > { %v1472_v7 = vmul.f32 0.7978846, %v1456_v20  ;;  %v1454_v49 = vadd.f32 %v1438_v21, %v3188_v15  ;;  %v1441_v2 = vmul.f32 %v1425_v50, %v3197_v44  ;;  %v2277_v12 = vpop.f32.mrf.mxu0  ;;  %v1495_v29 = vadd.f32 1.0, %v2443_v22 }
 0x266   : > { %v1439_v30 = vmul.f32 %v1423_v23, %v3201_v35  ;;  %v1428_v31 = vmul.f32 %v1412_v28, %v3208_v19  ;;  %v1410_v57 = vmul.f32 0.044715, %v3216_v59  ;;  %v3224_v61 = vadd.f32 %v2277_v12, %v3150_v60  ;;  %v2445_v11 = vpop.eup %2444 }
 0x267   : > { %2454 = vtanh.f32 %v1472_v7  ;;  %v1470_v37 = vmul.f32 0.7978846, %v1454_v49  ;;  %v1457_v9 = vadd.f32 %v1441_v2, %v3197_v44  ;;  %v1370_v17 = vpop.f32.mrf.mxu0  ;;  %v1511_v34 = vmul.f32 %v1495_v29, %v1383_v8 }
 0x268   : > { %v1455_v42 = vadd.f32 %v1439_v30, %v3201_v35  ;;  %v1444_v1 = vmul.f32 %v1428_v31, %v3208_v19  ;;  %v1426_v5 = vmul.f32 %v1410_v57, %v3216_v59  ;;  %v1413_v48 = vmul.f32 0.044715, %v3224_v61 }
 0x269   : > { %2456 = vtanh.f32 %v1470_v37  ;;  %v1473_v38 = vmul.f32 0.7978846, %v1457_v9  ;;  %v3232_v27 = vadd.f32 %v3150_v60, %v1370_v17  ;;  %v1526_v3 = vpack.c.bf16 %v1511_v34, %v1510_v16 }
 0x26a   : > { %v1471_v55 = vmul.f32 0.7978846, %v1455_v42  ;;  %v1460_v51 = vadd.f32 %v1444_v1, %v3208_v19  ;;  %v1442_v52 = vmul.f32 %v1426_v5, %v3216_v59  ;;  %v1429_v18 = vmul.f32 %v1413_v48, %v3224_v61 }
 0x26b   : > { %2458 = vtanh.f32 %v1473_v38  ;;  %v1411_v62 = vmul.f32 0.044715, %v3232_v27  ;;  %v1497_v56 = vadd.f32 1.0, %v2445_v11  ;;  %v2447_v36 = vpop.eup %2446  ;;  %2282 = vmatprep.mubr.msk.bf16.mxu1 %vm1260_vm0, %v1526_v3  ;;  %v1512_v41 = vmul.f32 %v1496_v46, %v3181_v6 }
 0x26c   : > { %2460 = vtanh.f32 %v1471_v55  ;;  %v1476_v0 = vmul.f32 0.7978846, %v1460_v51  ;;  %v1458_v40 = vadd.f32 %v1442_v52, %v3216_v59  ;;  %v1445_v60 = vmul.f32 %v1429_v18, %v3224_v61 }
 0x26d   : > { %v2449_v8 = vpop.eup %2448  ;;  %v1427_v4 = vmul.f32 %v1411_v62, %v3232_v27  ;;  %v1513_v45 = vmul.f32 %v1497_v56, %v3190_v25  ;;  %v1389_v6 = vmul.f32 0.5, %v3166_v33  ;;  %v1500_v25 = vadd.f32 1.0, %v2447_v36 }
 0x26e   : > { %v1474_v10 = vmul.f32 0.7978846, %v1458_v40  ;;  %v1461_v32 = vadd.f32 %v1445_v60, %v3224_v61  ;;  %2462 = vtanh.f32 %v1476_v0  ;;  %v1498_v13 = vadd.f32 1.0, %v2449_v8 }
 0x26f   : > { %v2451_v58 = vpop.eup %2450  ;;  %v1443_v39 = vmul.f32 %v1427_v4, %v3232_v27  ;;  %v1527_v54 = vpack.c.bf16 %v1513_v45, %v1512_v41  ;;  %v1386_v46 = vmul.f32 0.5, %v3161_v63  ;;  %v1387_v53 = vmul.f32 0.5, %v3172_v24 }
 0x270   : > { %v1477_v47 = vmul.f32 0.7978846, %v1461_v32  ;;  %v1501_v20 = vadd.f32 1.0, %v2451_v58  ;;  %2464 = vtanh.f32 %v1474_v10  ;;  %v1388_v23 = vmul.f32 0.5, %v3157_v14 }
 0x271   : > { %v2453_v21 = vpop.eup %2452  ;;  %v1459_v50 = vadd.f32 %v1443_v39, %v3232_v27  ;;  %2283 = vmatmul.mubr.msk.bf16.vlgmr.msra.gmra.mxu1 %vm1260_vm0, %v1527_v54  ;;  %v1514_v49 = vmul.f32 %v1498_v13, %v1386_v46  ;;  %v1393_v24 = vmul.f32 0.5, %v3197_v44  ;;  %v1390_v9 = vmul.f32 0.5, %v3188_v15 }
 0x272   : > { %2466 = vtanh.f32 %v1477_v47  ;;  %v1499_v26 = vadd.f32 1.0, %v2453_v21  ;;  %v1517_v28 = vmul.f32 %v1501_v20, %v1389_v6  ;;  %v1516_v12 = vmul.f32 %v1500_v25, %v1388_v23 }
 0x273   : > { %v1475_v22 = vmul.f32 0.7978846, %v1459_v50  ;;  %v1391_v17 = vmul.f32 0.5, %v3201_v35  ;;  %v1392_v11 = vmul.f32 0.5, %v3179_v43  ;;  %v1397_v35 = vmul.f32 0.5, %v3224_v61  ;;  %v3269_v61 = vld [vmem:[%s3435_s0] sm:$0xff] }
 0x274   : > { %v2455_v7 = vpop.eup %2454  ;;  %v1515_v2 = vmul.f32 %v1499_v26, %v1387_v53  ;;  %v1529_v31 = vpack.c.bf16 %v1517_v28, %v1516_v12  ;;  %v1394_v43 = vmul.f32 0.5, %v3216_v59  ;;  %v1395_v3 = vmul.f32 0.5, %v3232_v27 }
 0x275   : > { %2468 = vtanh.f32 %v1475_v22  ;;  %v1504_v37 = vadd.f32 1.0, %v2455_v7  ;;  %v1396_v36 = vmul.f32 0.5, %v3208_v19  ;;  %v3274_v19 = vld [vmem:[%s3435_s0 + $0x8] sm:$0xff] }
 0x276   : > { %v2457_v29 = vpop.eup %2456  ;;  %v1528_v30 = vpack.c.bf16 %v1515_v2, %v1514_v49 }
 0x277   : > { %v1502_v57 = vadd.f32 1.0, %v2457_v29  ;;  %v1520_v38 = vmul.f32 %v1504_v37, %v1392_v11 }
 0x278   : > { %v2459_v33 = vpop.eup %2458  ;;  %2286 = vmatprep.mubr.msk.bf16.mxu1 %vm1260_vm0, %v1528_v30 }
 0x279   : > { %v2461_v63 = vpop.eup %2460  ;;  %2287 = vmatmul.mubr.msk.bf16.gmra.mxu1 %vm1260_vm0, %v1529_v31  ;;  %v1505_v14 = vadd.f32 1.0, %v2459_v33  ;;  %v1518_v1 = vmul.f32 %v1502_v57, %v1390_v9 }
 0x27a   : > { %v1503_v16 = vadd.f32 1.0, %v2461_v63 }
 0x27b   : > { %v1521_v42 = vmul.f32 %v1505_v14, %v1393_v24  ;;  %v2463_v48 = vpop.eup %2462 }
 0x27c   : > { %v1519_v5 = vmul.f32 %v1503_v16, %v1391_v17  ;;  %v1508_v62 = vadd.f32 1.0, %v2463_v48 }
 0x27d   : > { %v2465_v34 = vpop.eup %2464  ;;  %v1531_v52 = vpack.c.bf16 %v1521_v42, %v1520_v38 }
 0x27e   : > { %v1530_v55 = vpack.c.bf16 %v1519_v5, %v1518_v1  ;;  %v1506_v15 = vadd.f32 1.0, %v2465_v34  ;;  %v1524_v8 = vmul.f32 %v1508_v62, %v1396_v36 }
 0x27f   : > { %v2467_v51 = vpop.eup %2466 }
 0x280   : > { %2290 = vmatprep.mubr.msk.bf16.mxu1 %vm1260_vm0, %v1530_v55  ;;  %v1509_v44 = vadd.f32 1.0, %v2467_v51  ;;  %v1522_v40 = vmul.f32 %v1506_v15, %v1394_v43 }
 0x281   : > { %2291 = vmatmul.mubr.msk.bf16.gmra.mxu1 %vm1260_vm0, %v1531_v52 }
 0x282   : > { %v2469_v18 = vpop.eup %2468  ;;  %v1525_v0 = vmul.f32 %v1509_v44, %v1397_v35 }
 0x283   : > { %v1507_v56 = vadd.f32 1.0, %v2469_v18 }
 0x284   : > { %v1533_v41 = vpack.c.bf16 %v1525_v0, %v1524_v8 }
 0x285   : > { %v1523_v60 = vmul.f32 %v1507_v56, %v1395_v3 }
 0x287   : > { %v1532_v4 = vpack.c.bf16 %v1523_v60, %v1522_v40 }
 0x289   : > { %2294 = vmatprep.mubr.msk.bf16.mxu1 %vm1260_vm0, %v1532_v4 }
 0x28a   : > { %2295 = vmatmul.mubr.msk.bf16.gmra.mxu1 %vm1260_vm0, %v1533_v41 }
 0x331   : > { %v2284_v59 = vpop.f32.mrf.mxu1 }
 0x332   : > { %v1657_v45 = vmul.f32 %v2284_v59, %v3269_v61 }
 0x333   : > { %v1592_v27 = vpop.f32.mrf.mxu1 }
 0x334   : > { %v1680_v39 = vsel %vm1260_vm0, %v1657_v45, 0.0  ;;  %v1655_v13 = vmul.f32 %v1592_v27, %v3269_v61 }
 0x335   : > { %v2285_v10 = vpop.f32.mrf.mxu1 }
 0x336   : > { %v1658_v32 = vmul.f32 %v2285_v10, %v3274_v19  ;;  %v1671_v46 = vsel %vm1260_vm0, %v1655_v13, 0.0 }
 0x337   : > { %v1595_v58 = vpop.f32.mrf.mxu1 }
 0x338   : > { %v1681_v54 = vsel %vm1260_vm0, %v1658_v32, 0.0  ;;  %v1656_v47 = vmul.f32 %v1595_v58, %v3274_v19 }
 0x339   : > { %v1682_v20 = vadd.f32 %v1681_v54, %v1680_v39  ;;  %v2288_v21 = vpop.f32.mrf.mxu1 }
 0x33a   : > { %v1672_v50 = vsel %vm1260_vm0, %v1656_v47, 0.0  ;;  %v1661_v25 = vmul.f32 %v2288_v21, %v3269_v61 }
 0x33b   : > { %v1608_v6 = vpop.f32.mrf.mxu1  ;;  %v1683_v53 = vrot.slane %v1682_v20, 4  ;;  %v1673_v22 = vadd.f32 %v1672_v50, %v1671_v46 }
 0x33c   : > { %v1659_v23 = vmul.f32 %v1608_v6, %v3269_v61  ;;  %v1698_v49 = vsel %vm1260_vm0, %v1661_v25, 0.0 }
 0x33d   : > { %v2289_v26 = vpop.f32.mrf.mxu1  ;;  %v1684_v29 = vadd.f32 %v1683_v53, %v1682_v20  ;;  %v1674_v33 = vrot.slane %v1673_v22, 4 }
 0x33e   : > { %v1662_v28 = vmul.f32 %v2289_v26, %v3274_v19  ;;  %v1689_v57 = vsel %vm1260_vm0, %v1659_v23, 0.0  ;;  %v2208_v26 = vld [vmem:[%s3438_s3] ss:$0 sm:$0xff] }
 0x33f   : > { %v1611_v7 = vpop.f32.mrf.mxu1  ;;  %v1685_v9 = vrot.slane %v1684_v29, 2  ;;  %v1675_v42 = vadd.f32 %v1674_v33, %v1673_v22 }
 0x340   : > { %v1699_v2 = vsel %vm1260_vm0, %v1662_v28, 0.0  ;;  %v1660_v12 = vmul.f32 %v1611_v7, %v3274_v19 }
 0x341   : > { %v1700_v30 = vadd.f32 %v1699_v2, %v1698_v49  ;;  %v2292_v31 = vpop.f32.mrf.mxu1  ;;  %v1686_v52 = vadd.f32 %v1685_v9, %v1684_v29  ;;  %v1676_v18 = vrot.slane %v1675_v42, 2 }
 0x342   : > { %v1690_v63 = vsel %vm1260_vm0, %v1660_v12, 0.0  ;;  %v1665_v16 = vmul.f32 %v2292_v31, %v3269_v61 }
 0x343   : > { %v1701_v24 = vrot.slane %v1700_v30, 4  ;;  %v1691_v37 = vadd.f32 %v1690_v63, %v1689_v57  ;;  %v1624_v14 = vpop.f32.mrf.mxu1  ;;  %v1687_v41 = vrot.slane %v1686_v52, 1  ;;  %v1677_v59 = vadd.f32 %v1676_v18, %v1675_v42 }
 0x344   : > { %v1663_v1 = vmul.f32 %v1624_v14, %v3269_v61  ;;  %v1716_v15 = vsel %vm1260_vm0, %v1665_v16, 0.0 }
 0x345   : > { %v1692_v17 = vrot.slane %v1691_v37, 4  ;;  %v2293_v11 = vpop.f32.mrf.mxu1  ;;  %v1702_v48 = vadd.f32 %v1701_v24, %v1700_v30  ;;  %v1688_v6 = vadd.f32 %v1687_v41, %v1686_v52  ;;  %v1678_v25 = vrot.slane %v1677_v59, 1 }
 0x346   : > { %v1666_v5 = vmul.f32 %v2293_v11, %v3274_v19  ;;  %v1707_v35 = vsel %vm1260_vm0, %v1663_v1, 0.0 }
 0x347   : > { %v1693_v38 = vadd.f32 %v1692_v17, %v1691_v37  ;;  %v1627_v34 = vpop.f32.mrf.mxu1  ;;  %v1703_v56 = vrot.slane %v1702_v48, 2  ;;  %v1759_v30 = vadd.f32 %v2208_v26, %v1688_v6  ;;  %v1679_v31 = vadd.f32 %v1678_v25, %v1677_v59 }
 0x348   : > { %v1717_v55 = vsel %vm1260_vm0, %v1666_v5, 0.0  ;;  %v1664_v51 = vmul.f32 %v1627_v34, %v3274_v19 }
 0x349   : > { %v1694_v44 = vrot.slane %v1693_v38, 2  ;;  %v1718_v62 = vadd.f32 %v1717_v55, %v1716_v15  ;;  %v1704_v10 = vadd.f32 %v1703_v56, %v1702_v48  ;;  %v1774_v17 = vrot.slane %v1759_v30, 7 }
 0x34a   : > { %v1708_v43 = vsel %vm1260_vm0, %v1664_v51, 0.0  ;;  %v2296_v3 = vpop.f32.mrf.mxu1  ;;  %v1758_v16 = vadd.f32 %v2208_v26, %v1679_v31 }
 0x34b   : > { %v1695_v36 = vadd.f32 %v1694_v44, %v1693_v38  ;;  %v1709_v0 = vadd.f32 %v1708_v43, %v1707_v35  ;;  %v1719_v40 = vrot.slane %v1718_v62, 4  ;;  %v1669_v4 = vmul.f32 %v2296_v3, %v3269_v61 }
 0x34c   : > { %v1640_v60 = vpop.f32.mrf.mxu1  ;;  %v1705_v22 = vrot.slane %v1704_v10, 1  ;;  %v1776_v52 = vsel %vm1775_vm1, %v1774_v17, %v1758_v16 }
 0x34d   : > { %v1710_v8 = vrot.slane %v1709_v0, 4  ;;  %v1720_v27 = vadd.f32 %v1719_v40, %v1718_v62  ;;  %v1696_v32 = vrot.slane %v1695_v36, 1  ;;  %v1667_v47 = vmul.f32 %v1640_v60, %v3269_v61 }
 0x34e   : > { %v2297_v45 = vpop.f32.mrf.mxu1  ;;  %v1734_v21 = vsel %vm1260_vm0, %v1669_v4, 0.0  ;;  %v1706_v24 = vadd.f32 %v1705_v22, %v1704_v10 }
 0x34f   : > { %v1711_v58 = vadd.f32 %v1710_v8, %v1709_v0  ;;  %v1670_v39 = vmul.f32 %v2297_v45, %v3274_v19  ;;  %v1721_v54 = vrot.slane %v1720_v27, 2  ;;  %v1697_v23 = vadd.f32 %v1696_v32, %v1695_v36 }
 0x350   : > { %v1643_v13 = vpop.f32.mrf.mxu1  ;;  %v1725_v61 = vsel %vm1260_vm0, %v1667_v47, 0.0  ;;  %v1761_v48 = vadd.f32 %v2208_v26, %v1706_v24 }
 0x351   : > { %v1712_v20 = vrot.slane %v1711_v58, 2  ;;  %v1735_v50 = vsel %vm1260_vm0, %v1670_v39, 0.0  ;;  %v1668_v53 = vmul.f32 %v1643_v13, %v3274_v19  ;;  %v1722_v7 = vadd.f32 %v1721_v54, %v1720_v27 }
 0x352   : > { %v1736_v46 = vadd.f32 %v1735_v50, %v1734_v21  ;;  %v1760_v57 = vadd.f32 %v2208_v26, %v1697_v23  ;;  %v1780_v35 = vrot.slane %v1761_v48, 5 }
 0x353   : > { %v1713_v28 = vadd.f32 %v1712_v20, %v1711_v58  ;;  %v1726_v2 = vsel %vm1260_vm0, %v1668_v53, 0.0  ;;  %v1723_v37 = vrot.slane %v1722_v7, 1 }
 0x354   : > { %v1737_v49 = vrot.slane %v1736_v46, 4  ;;  %v1727_v29 = vadd.f32 %v1726_v2, %v1725_v61  ;;  %v1777_v42 = vrot.slane %v1760_v57, 6 }
 0x355   : > { %v1714_v12 = vrot.slane %v1713_v28, 1  ;;  %v1724_v38 = vadd.f32 %v1723_v37, %v1722_v7 }
 0x356   : > { %v1738_v33 = vadd.f32 %v1737_v49, %v1736_v46  ;;  %v1728_v63 = vrot.slane %v1727_v29, 4  ;;  %v1779_v15 = vsel %vm1778_vm2, %v1777_v42, %v1776_v52 }
 0x357   : > { %v1715_v19 = vadd.f32 %v1714_v12, %v1713_v28  ;;  %v1763_v62 = vadd.f32 %v2208_v26, %v1724_v38  ;;  %v1782_v56 = vsel %vm1781_vm3, %v1780_v35, %v1779_v15  ;;  %v1918_v38 = vld [vmem:[%s3441_s6 + $0x10] sm:$0xff] }
 0x358   : > { %v1739_v14 = vrot.slane %v1738_v33, 2  ;;  %v1729_v9 = vadd.f32 %v1728_v63, %v1727_v29 }
 0x359   : > { %v1762_v1 = vadd.f32 %v2208_v26, %v1715_v19  ;;  %v1786_v40 = vrot.slane %v1763_v62, 3 }
 0x35a   : > { %v1740_v11 = vadd.f32 %v1739_v14, %v1738_v33  ;;  %v1730_v5 = vrot.slane %v1729_v9, 2 }
 0x35b   : > { %v1783_v18 = vrot.slane %v1762_v1, 4 }
 0x35c   : > { %v1741_v34 = vrot.slane %v1740_v11, 1  ;;  %v1731_v55 = vadd.f32 %v1730_v5, %v1729_v9  ;;  %v1919_v5 = vld [vmem:[%s3441_s6 + $0x18] sm:$0xff] }
 0x35d   : > { %v1785_v0 = vsel %vm1784_vm4, %v1783_v18, %v1782_v56  ;;  %v2209_v56 = vld [vmem:[%s3439_s4] ss:$0 sm:$0xff] }
 0x35e   : > { %v1742_v51 = vadd.f32 %v1741_v34, %v1740_v11  ;;  %v1732_v44 = vrot.slane %v1731_v55, 1  ;;  %v1788_v8 = vsel %vm1787_vm5, %v1786_v40, %v1785_v0  ;;  %v1917_v34 = vld [vmem:[%s3441_s6 + $0x8] sm:$0xff] }
 0x360   : > { %v1733_v43 = vadd.f32 %v1732_v44, %v1731_v55  ;;  %v1765_v3 = vadd.f32 %v2208_v26, %v1742_v51  ;;  %v1916_v55 = vld [vmem:[%s3441_s6] sm:$0xff]  ;;  %v2045_v51 = vld [vmem:[#allocation2 + $0x78] sm:$0xff] }
 0x362   : > { %v1764_v36 = vadd.f32 %v2208_v26, %v1733_v43  ;;  %v1792_v4 = vrot.slane %v1765_v3, 1 }
 0x364   : > { %v1789_v60 = vrot.slane %v1764_v36, 2 }
 0x366   : > { %v1791_v41 = vsel %vm1790_vm6, %v1789_v60, %v1788_v8 }
 0x367   : > { %v1794_v59 = vsel %vm1793_vm7, %v1792_v4, %v1791_v41 }
 0x368   : > { %v1796_v27 = vsel %vm1260_vm0, %v1794_v59, 0.0 }
 0x369   : > { %1797 = vadd.xlane.f32.xlu1 %v1796_v27 }
 0x3f2   : > { %v1798_v45 = vpop.xlane.xlu1 %1797 }
 0x3f3   : > { %v1800_v10 = vmul.f32 0.03125, %v1798_v45 }
 0x3f5   : > { %v1802_v32 = vrot.slane %v1800_v10, 1  ;;  %v1803_v58 = vrot.slane %v1800_v10, 2  ;;  %v1804_v39 = vrot.slane %v1800_v10, 3  ;;  %v1805_v54 = vrot.slane %v1800_v10, 4 }
 0x3f6   : > { %v1806_v47 = vrot.slane %v1800_v10, 5  ;;  %v1807_v13 = vrot.slane %v1800_v10, 6  ;;  %v1808_v20 = vrot.slane %v1800_v10, 7  ;;  %v3319_v21 = vsub.f32 %v1758_v16, %v1800_v10 }
 0x3f7   : > { %v3321_v50 = vsub.f32 %v1759_v30, %v1802_v32  ;;  %v3323_v6 = vsub.f32 %v1760_v57, %v1803_v58  ;;  %v3325_v25 = vsub.f32 %v1761_v48, %v1804_v39  ;;  %v3327_v46 = vsub.f32 %v1762_v1, %v1805_v54 }
 0x3f8   : > { %v3329_v53 = vsub.f32 %v1763_v62, %v1806_v47  ;;  %v3331_v26 = vsub.f32 %v1764_v36, %v1807_v13  ;;  %v3333_v22 = vsub.f32 %v1765_v3, %v1808_v20  ;;  %v1825_v49 = vmul.f32 %v3319_v21, %v3319_v21 }
 0x3f9   : > { %v1826_v23 = vmul.f32 %v3321_v50, %v3321_v50  ;;  %v1827_v28 = vmul.f32 %v3323_v6, %v3323_v6  ;;  %v1828_v7 = vmul.f32 %v3325_v25, %v3325_v25  ;;  %v1829_v61 = vmul.f32 %v3327_v46, %v3327_v46 }
 0x3fa   : > { %v1830_v2 = vmul.f32 %v3329_v53, %v3329_v53  ;;  %v1831_v30 = vmul.f32 %v3331_v26, %v3331_v26  ;;  %v1832_v31 = vmul.f32 %v3333_v22, %v3333_v22  ;;  %v2519_v48 = vmov 0.0  }
 0x3fb   : > { %v1841_v12 = vrot.slane %v1826_v23, 7  ;;  %v1843_v29 = vrot.slane %v1827_v28, 6  ;;  %v1845_v57 = vrot.slane %v1828_v7, 5  ;;  %v1847_v63 = vrot.slane %v1829_v61, 4  ;;  %2298 = vmatprep.subr.mxu0 %v2519_v48  ;;  %2306 = vmatprep.mubr.msk.f32.mxu0 %vm2520_vm8, %v2519_v48 }
 0x3fc   : > { %v1849_v37 = vrot.slane %v1830_v2, 3  ;;  %v1851_v9 = vrot.slane %v1831_v30, 2  ;;  %v1853_v16 = vrot.slane %v1832_v31, 1  ;;  %2299 = vmatpush3.msra.mxu0 %v1919_v5  ;;  %2309 = vmatprep.subr.mxu1 %v2519_v48  ;;  %v2037_v5 = vld [vmem:[#allocation2 + $0x38] sm:$0xff] }
 0x3fd   : > { %v1842_v33 = vsel %vm1775_vm1, %v1841_v12, %v1825_v49  ;;  %2300 = vmatprep.subr.mxu0 %v2519_v48  ;;  %2341 = vmatprep.mubr.msk.f32.mxu1 %vm2520_vm8, %v2519_v48 }
 0x3fe   : > { %v1844_v19 = vsel %vm1778_vm2, %v1843_v29, %v1842_v33  ;;  %2301 = vmatpush3.msra.mxu0 %v1918_v38  ;;  %2310 = vmatpush3.msra.mxu1 %v2045_v51  ;;  %v2036_v38 = vld [vmem:[#allocation2 + $0x30] sm:$0xff]  ;;  %v2033_v51 = vld [vmem:[#allocation2 + $0x18] sm:$0xff] }
 0x3ff   : > { %v1846_v24 = vsel %vm1781_vm3, %v1845_v57, %v1844_v19  ;;  %2302 = vmatprep.subr.mxu0 %v2519_v48  ;;  %2311 = vmatprep.subr.mxu1 %v2519_v48 }
 0x400   : > { %v1848_v14 = vsel %vm1784_vm4, %v1847_v63, %v1846_v24  ;;  %2303 = vmatpush3.msra.mxu0 %v1917_v34  ;;  %v2035_v34 = vld [vmem:[#allocation2 + $0x28] sm:$0xff] }
 0x401   : > { %v1850_v17 = vsel %vm1787_vm5, %v1849_v37, %v1848_v14  ;;  %2304 = vmatprep.subr.mxu0 %v2519_v48  ;;  %v2044_v14 = vld [vmem:[#allocation2 + $0x70] sm:$0xff] }
 0x402   : > { %v1852_v11 = vsel %vm1790_vm6, %v1851_v9, %v1850_v17  ;;  %2305 = vmatpush3.msra.mxu0 %v1916_v55  ;;  %v2043_v9 = vld [vmem:[#allocation2 + $0x68] sm:$0xff]  ;;  %2312 = vmatpush3.msra.mxu1 %v2044_v14  ;;  %v2042_v17 = vld [vmem:[#allocation2 + $0x60] sm:$0xff] }
 0x403   : > { %v1854_v42 = vsel %vm1793_vm7, %v1853_v16, %v1852_v11  ;;  %2313 = vmatprep.subr.mxu1 %v2519_v48  ;;  %v2041_v16 = vld [vmem:[#allocation2 + $0x58] sm:$0xff]  ;;  %v2040_v11 = vld [vmem:[#allocation2 + $0x50] sm:$0xff]  ;;  %v2034_v55 = vld [vmem:[#allocation2 + $0x20] sm:$0xff] }
 0x404   : > { %v1856_v1 = vsel %vm1260_vm0, %v1854_v42, 0.0  ;;  %2314 = vmatpush3.msra.mxu1 %v2043_v9  ;;  %v2039_v42 = vld [vmem:[#allocation2 + $0x48] sm:$0xff] }
 0x405   : > { %1857 = vadd.xlane.f32.xlu0 %v1856_v1  ;;  %2315 = vmatprep.subr.mxu1 %v2519_v48  ;;  %v2038_v1 = vld [vmem:[#allocation2 + $0x40] sm:$0xff] }
 0x406   : > { %2316 = vmatpush3.msra.mxu1 %v2042_v17 }
 0x407   : > { %2317 = vmatprep.subr.mxu1 %v2519_v48 }
 0x408   : > { %2318 = vmatpush3.msra.mxu1 %v2041_v16 }
 0x409   : > { %2319 = vmatprep.subr.mxu1 %v2519_v48 }
 0x40a   : > { %2320 = vmatpush3.msra.mxu1 %v2040_v11 }
 0x40b   : > { %2321 = vmatprep.subr.mxu1 %v2519_v48 }
 0x40c   : > { %2322 = vmatpush3.msra.mxu1 %v2039_v42 }
 0x40d   : > { %2323 = vmatprep.subr.mxu1 %v2519_v48 }
 0x40e   : > { %2324 = vmatpush3.msra.mxu1 %v2038_v1 }
 0x40f   : > { %2325 = vmatprep.subr.mxu1 %v2519_v48 }
 0x410   : > { %2326 = vmatpush3.msra.mxu1 %v2037_v5 }
 0x411   : > { %2327 = vmatprep.subr.mxu1 %v2519_v48 }
 0x412   : > { %2328 = vmatpush3.msra.mxu1 %v2036_v38 }
 0x413   : > { %2329 = vmatprep.subr.mxu1 %v2519_v48 }
 0x414   : > { %2330 = vmatpush3.msra.mxu1 %v2035_v34 }
 0x415   : > { %2331 = vmatprep.subr.mxu1 %v2519_v48 }
 0x416   : > { %2332 = vmatpush3.msra.mxu1 %v2034_v55 }
 0x417   : > { %2333 = vmatprep.subr.mxu1 %v2519_v48 }
 0x418   : > { %2334 = vmatpush3.msra.mxu1 %v2033_v51 }
 0x419   : > { %2335 = vmatprep.subr.mxu1 %v2519_v48 }
 0x48e   : > { %v1858_v52 = vpop.xlane.xlu0 %1857 }
 0x48f   : > { %v1859_v44 = vmul.f32 0.03125, %v1858_v52  ;;  %v2032_v52 = vld [vmem:[#allocation2 + $0x10] sm:$0xff] }
 0x490   : > { %2336 = vmatpush3.msra.mxu1 %v2032_v52 }
 0x491   : > { %v1860_v15 = vadd.f32 1e-05, %v1859_v44  ;;  %v2031_v44 = vld [vmem:[#allocation2 + $0x8] sm:$0xff]  ;;  %2337 = vmatprep.subr.mxu1 %v2519_v48 }
 0x492   : > { %2338 = vmatpush3.msra.mxu1 %v2031_v44 }
 0x493   : > { %2470 = vrsqrt.f32 %v1860_v15  ;;  %v2030_v15 = vld [vmem:[#allocation2] sm:$0xff]  ;;  %2339 = vmatprep.subr.mxu1 %v2519_v48 }
 0x494   : > { %2340 = vmatpush3.msra.mxu1 %v2030_v15 }
 0x4a0   : > { %v2471_v18 = vpop.eup %2470 }
 0x4a1   : > { %v1863_v35 = vrot.slane %v2471_v18, 1  ;;  %v1864_v62 = vrot.slane %v2471_v18, 2  ;;  %v1865_v43 = vrot.slane %v2471_v18, 3  ;;  %v1866_v3 = vrot.slane %v2471_v18, 4 }
 0x4a2   : > { %v1867_v36 = vrot.slane %v2471_v18, 5  ;;  %v1868_v0 = vrot.slane %v2471_v18, 6  ;;  %v1869_v40 = vrot.slane %v2471_v18, 7  ;;  %v1878_v60 = vmul.f32 %v2471_v18, %v3319_v21  ;;  %v2210_v21 = vld [vmem:[%s3440_s5] ss:$0 sm:$0xff] }
 0x4a3   : > { %v1879_v8 = vmul.f32 %v1863_v35, %v3321_v50  ;;  %v1880_v4 = vmul.f32 %v1864_v62, %v3323_v6  ;;  %v1881_v41 = vmul.f32 %v1865_v43, %v3325_v25  ;;  %v1882_v59 = vmul.f32 %v1866_v3, %v3327_v46  ;;  %v2211_v18 = vld [vmem:[%s3442_s7] ss:$0 sm:$0xff] }
 0x4a4   : > { %v1883_v27 = vmul.f32 %v1867_v36, %v3329_v53  ;;  %v1884_v45 = vmul.f32 %v1868_v0, %v3331_v26  ;;  %v1885_v10 = vmul.f32 %v1869_v40, %v3333_v22  ;;  %v1893_v32 = vmul.f32 %v2209_v56, %v1878_v60 }
 0x4a5   : > { %v1894_v58 = vmul.f32 %v2209_v56, %v1879_v8  ;;  %v1895_v39 = vmul.f32 %v2209_v56, %v1880_v4  ;;  %v1896_v54 = vmul.f32 %v2209_v56, %v1881_v41  ;;  %v1897_v47 = vmul.f32 %v2209_v56, %v1882_v59  ;;  %v2213_v41 = vld [vmem:[%s3444_s9] ss:$0 sm:$0xff] }
 0x4a6   : > { %v1898_v13 = vmul.f32 %v2209_v56, %v1883_v27  ;;  %v1899_v20 = vmul.f32 %v2209_v56, %v1884_v45  ;;  %v1900_v50 = vmul.f32 %v2209_v56, %v1885_v10  ;;  %v1908_v23 = vadd.f32 %v2210_v21, %v1893_v32  ;;  %v466_v59 = vld [vmem:[%s465_s26] sm:$0xff] }
 0x4a7   : > { %v1909_v6 = vadd.f32 %v2210_v21, %v1894_v58  ;;  %v1910_v25 = vadd.f32 %v2210_v21, %v1895_v39  ;;  %v1911_v46 = vadd.f32 %v2210_v21, %v1896_v54  ;;  %v1912_v53 = vadd.f32 %v2210_v21, %v1897_v47 }
 0x4a8   : > { %v1913_v26 = vadd.f32 %v2210_v21, %v1898_v13  ;;  %v1914_v7 = vadd.f32 %v2210_v21, %v1899_v20  ;;  %v1915_v61 = vadd.f32 %v2210_v21, %v1900_v50 }
 0x4a9   : > { %v1935_v28 = vrot.slane %v1909_v6, 7  ;;  %v1937_v22 = vrot.slane %v1910_v25, 6  ;;  %v1939_v2 = vrot.slane %v1911_v46, 5  ;;  %v1941_v29 = vrot.slane %v1912_v53, 4 }
 0x4aa   : > { %v1943_v31 = vrot.slane %v1913_v26, 3  ;;  %v1945_v57 = vrot.slane %v1914_v7, 2  ;;  %v1947_v63 = vrot.slane %v1915_v61, 1 }
 0x4ab   : > { %v1936_v49 = vsel %vm1775_vm1, %v1935_v28, %v1908_v23 }
 0x4ac   : > { %v1938_v12 = vsel %vm1778_vm2, %v1937_v22, %v1936_v49 }
 0x4ad   : > { %v1940_v30 = vsel %vm1781_vm3, %v1939_v2, %v1938_v12 }
 0x4ae   : > { %v1942_v33 = vsel %vm1784_vm4, %v1941_v29, %v1940_v30 }
 0x4af   : > { %v1944_v19 = vsel %vm1787_vm5, %v1943_v31, %v1942_v33 }
 0x4b0   : > { %v1946_v24 = vsel %vm1790_vm6, %v1945_v57, %v1944_v19 }
 0x4b1   : > { %v1948_v37 = vsel %vm1793_vm7, %v1947_v63, %v1946_v24 }
 0x4b2   : > { %2307 = vmatmul.mubr.msk.f32.vlgmr.msra.gmra.mxu0 %vm1260_vm0, %v1948_v37 }
 0x572   : > { %v2017_v35 = vpop.f32.mrf.mxu0 }
 0x573   : > { %v2018_v62 = vadd.f32 %v2211_v18, %v2017_v35 }
 0x574   : > { %v2308_v43 = vpop.f32.mrf.mxu0 }
 0x575   : > { %v2022_v3 = vmul.f32 0.044715, %v2018_v62  ;;  %v2021_v8 = vmul.f32 0.5, %v2018_v62 }
 0x577   : > { %v2023_v56 = vmul.f32 %v2022_v3, %v2018_v62 }
 0x579   : > { %v2024_v36 = vmul.f32 %v2023_v56, %v2018_v62 }
 0x57b   : > { %v2025_v0 = vadd.f32 %v2024_v36, %v2018_v62 }
 0x57d   : > { %v2026_v40 = vmul.f32 0.7978846, %v2025_v0 }
 0x57f   : > { %2472 = vtanh.f32 %v2026_v40 }
 0x58c   : > { %v2473_v60 = vpop.eup %2472 }
 0x58d   : > { %v2028_v48 = vadd.f32 1.0, %v2473_v60 }
 0x58f   : > { %v2029_v4 = vmul.f32 %v2028_v48, %v2021_v8 }
 0x591   : > { %2342 = vmatmul.mubr.f32.vlgmr.msra.gmra.mxu1 %v2029_v4 }
 0x651   : > { %v2119_v27 = vpop.f32.mrf.mxu1 }
 0x652   : > { %v2120_v45 = vadd.f32 %v2213_v41, %v2119_v27 }
 0x653   : > { %v2343_v10 = vpop.f32.mrf.mxu1 }
 0x654   : > { %v2123_v32 = vadd.f32 %v2120_v45, %v466_v59 }
 0x656   : > { %2124 = vst.msk [vmem:[%s460_s18] sm:$0xff] %vm1260_vm0, %v2123_v32 }
 0x657 PF: > { %s25_s29 = sadd.s32 1, %s2510_s29  }
 0x658   : > { %p22_p1 = scmp.ge.s32.totalorder %s25_s29, 4  }
 0x65a   :  { %24 = sbr.rel (!%p22_p1) target bundleno = 1 (0x1), region = 110 }
 0x65f   :  { %2144 = vsyncpa [#allocation3], 1 }
 0x660   :  { %2146 = vsyncpa [#allocation3 + $0x1], 1 }

</bundles_post_ra>
